<compile_context>
chip_gen: v6e
topology: v6e:2x2x1
jax: 0.10.0
libtpu: 0.0.40
codegen_flags: <defaults>
</compile_context>

<pallas_src>
import functools

import jax
import jax.numpy as jnp
from jax.experimental import pallas as pl
from jax.experimental.pallas import tpu as pltpu


# -----------------------------------------------------------------------------
# Fused forward kernel (one grid step = one batch sample).
# -----------------------------------------------------------------------------
def _fused_kernel(col1_ref, w1_ref, b1_ref, w2_ref, b2_ref,
                  r_ref, vt_ref, g_ref, b3_ref, out_ref,
                  a1_ref, col2_ref, *, W1, H2, KH, KW, C1):
    # ---- conv1: one matmul over K = KH*KW*Cin (= 9), bf16 MXU / f32 acc ------
    a1 = jnp.dot(col1_ref[0], w1_ref[...],
                 preferred_element_type=jnp.float32)           # (rows1, C1)
    a1_ref[...] = jnp.maximum(a1 + b1_ref[...], 0.0)           # ReLU, f32, in VMEM

    # ---- conv2 im2col, built from the VMEM-resident a1 ------------------------
    # a1 rows are (y, x) with row pitch W1.  With a W1-wide ("wide") output row
    # pitch, the source rows for tap (dy, dx) form ONE contiguous sublane run of
    # length H2*W1, so the whole im2col is 9 ref-to-ref slab copies.  Columns
    # with x' >= W2 are garbage but finite; vt_ref zero-masks them later.
    run = H2 * W1
    for dy in range(KH):
        for dx in range(KW):
            t = dy * KW + dx
            start = dy * W1 + dx
            col2_ref[:, pl.ds(t * C1, C1)] = a1_ref[pl.ds(start, run), :]

    # ---- conv2: one matmul over K = KH*KW*C1 (= 72) ---------------------------
    a2 = jnp.dot(col2_ref[...].astype(jnp.bfloat16), w2_ref[...],
                 preferred_element_type=jnp.float32)           # (run, C2)
    a2 = jnp.maximum(a2 + b2_ref[...], 0.0)                    # ReLU, f32

    # ---- fused flatten + linear (no in-kernel relayout) -----------------------
    # (a2 @ R)[row, c*10 + o] == a2[row, c];  vt carries the CHW-ordered linear
    # weights (zeros on the wide/garbage columns);  G sums the channel groups.
    at = jnp.dot(a2, r_ref[...], preferred_element_type=jnp.float32)    # (run, 160)
    s = jnp.sum(at * vt_ref[...], axis=0, keepdims=True)                # (1, 160)
    out = jnp.dot(s, g_ref[...], preferred_element_type=jnp.float32) + b3_ref[...]
    out_ref[0] = out.astype(out_ref.dtype)                              # (1, 10)


# -----------------------------------------------------------------------------
# Wrapper: one-time weight rearrangements + layer-1 im2col, then the fused call.
# -----------------------------------------------------------------------------
def image_classifier_forward(x_nchw, params):
    N, Cin, H, W = x_nchw.shape
    assert Cin == 1
    KH = KW = 3
    C1, C2, NOUT = 8, 16, 10
    H1, W1 = H - KH + 1, W - KW + 1            # conv1 output spatial (14, 14)
    H2, W2 = H1 - KH + 1, W1 - KW + 1          # conv2 output spatial (12, 12)
    run = H2 * W1                              # "wide" rows per sample (168)
    rows1 = (KH - 1) * W1 + (KW - 1) + run     # padded conv1 rows (198)

    x = x_nchw[:, 0]                           # (N, H, W)

    # Layer-1 im2col in XLA (Cin=1, tiny); pad a couple of zero rows so the
    # widest in-kernel tap run stays in bounds.  Shipped as bf16 (MXU operand).
    cols = [x[:, dy:dy + H1, dx:dx + W1].reshape(N, H1 * W1, 1)
            for dy in range(KH) for dx in range(KW)]
    col1 = jnp.concatenate(cols, axis=-1)                          # (N, 196, 9)
    col1 = jnp.pad(col1, ((0, 0), (0, rows1 - H1 * W1), (0, 0)))   # (N, 198, 9)
    col1 = col1.astype(jnp.bfloat16)

    # Conv weights folded over (kh, kw, cin) to match the im2col column order;
    # cast once here so the kernel never re-casts per grid step.
    w1f = params["w1"].reshape(KH * KW * Cin, C1).astype(jnp.bfloat16)   # (9, 8)
    b1 = params["b1"].reshape(1, C1).astype(jnp.float32)
    w2f = params["w2"].reshape(KH * KW * C1, C2).astype(jnp.bfloat16)    # (72, 16)
    b2 = params["b2"].reshape(1, C2).astype(jnp.float32)

    # Linear weight rearranged once: CHW-flat (c*H2*W2 + y*W2 + x) -> wide (y, x)
    # rows with (c, o) lane groups; zero rows on the padded x >= W2 columns.
    v = params["w3"].reshape(C2, H2, W2, NOUT)                     # (c, y, x, o)
    v = jnp.transpose(v, (1, 2, 0, 3))                             # (y, x, c, o)
    v = jnp.pad(v, ((0, 0), (0, W1 - W2), (0, 0), (0, 0)))
    vt = v.reshape(run, C2 * NOUT).astype(jnp.float32)             # (168, 160)
    r_mat = jnp.repeat(jnp.eye(C2, dtype=jnp.float32), NOUT, axis=1)   # (16, 160)
    g_mat = jnp.tile(jnp.eye(NOUT, dtype=jnp.float32), (C2, 1))        # (160, 10)
    b3 = params["b3"].reshape(1, NOUT).astype(jnp.float32)

    kernel = functools.partial(_fused_kernel, W1=W1, H2=H2, KH=KH, KW=KW, C1=C1)

    def resident(arr):  # full-array block, same tile every grid step (stays in VMEM)
        return pl.BlockSpec(arr.shape, lambda n: (0, 0))

    out = pl.pallas_call(
        kernel,
        out_shape=jax.ShapeDtypeStruct((N, 1, NOUT), jnp.float32),
        grid=(N,),
        in_specs=[
            pl.BlockSpec((1, rows1, KH * KW * Cin), lambda n: (n, 0, 0)),
            resident(w1f), resident(b1),
            resident(w2f), resident(b2),
            resident(r_mat), resident(vt), resident(g_mat), resident(b3),
        ],
        out_specs=pl.BlockSpec((1, 1, NOUT), lambda n: (n, 0, 0)),
        scratch_shapes=[
            pltpu.VMEM((rows1, C1), jnp.float32),            # conv1 activations
            pltpu.VMEM((run, KH * KW * C1), jnp.float32),    # conv2 im2col
        ],
        compiler_params=pltpu.CompilerParams(dimension_semantics=("parallel",)),
    )(col1, w1f, b1, w2f, b2, r_mat, vt, g_mat, b3)
    return out[:, 0, :]


# Pure-JAX reference (same math, no Pallas) used as a sanity check.
def _reference_forward(x_nchw, params):
    x = jnp.transpose(x_nchw, (0, 2, 3, 1))
    for w, b in ((params["w1"], params["b1"]), (params["w2"], params["b2"])):
        x = jax.lax.conv_general_dilated(
            x, w, window_strides=(1, 1), padding="VALID",
            dimension_numbers=("NHWC", "HWIO", "NHWC")) + b
        x = jnp.maximum(x, 0.0)
    x = jnp.transpose(x, (0, 3, 1, 2)).reshape(x.shape[0], -1)
    return x @ params["w3"] + params["b3"]


def init_params(key, H=16, W=16):
    flat_dim = 16 * (H - 4) * (W - 4)  # what LazyLinear would infer
    k1, k2, k3, k4, k5, k6 = jax.random.split(key, 6)
    return {
        # conv1: PyTorch (8, 1, 3, 3) stored here as HWIO (3, 3, 1, 8)
        "w1": jax.random.normal(k1, (3, 3, 1, 8), jnp.float32) * 0.2,
        "b1": jax.random.normal(k2, (8,), jnp.float32) * 0.05,
        # conv2: PyTorch (16, 8, 3, 3) stored here as HWIO (3, 3, 8, 16)
        "w2": jax.random.normal(k3, (3, 3, 8, 16), jnp.float32) * 0.1,
        "b2": jax.random.normal(k4, (16,), jnp.float32) * 0.05,
        # linear: PyTorch (10, flat_dim) stored here transposed (flat_dim, 10),
        # flat_dim indexed in CHW (PyTorch flatten) order.
        "w3": jax.random.normal(k5, (flat_dim, 10), jnp.float32) * 0.02,
        "b3": jax.random.normal(k6, (10,), jnp.float32) * 0.05,
    }


if __name__ == "__main__":
    key = jax.random.PRNGKey(0)
    kx, kp = jax.random.split(key)

    # Input consistent with the module: batch=2, 1 channel, 16x16 spatial.
    x = jax.random.normal(kx, (2, 1, 16, 16), jnp.float32)
    params = init_params(kp, H=16, W=16)

    fwd = jax.jit(image_classifier_forward)
    out = jax.block_until_ready(fwd(x, params))
    assert out.shape == (2, 10), out.shape

    ref = _reference_forward(x, params)
    # bf16 MXU operands with f32 accumulation -> small drift vs the f32 reference.
    err = float(jnp.max(jnp.abs(out - ref)))
    assert jnp.allclose(out, ref, rtol=5e-2, atol=5e-2), err

    print("KERNEL_OK")
</pallas_src>

<mosaic_0001>
module attributes {stable_mosaic.version = 11 : i64} {
  func.func @_fused_kernel(%arg0: i32, %arg1: memref<1x198x9xbf16, #tpu.memory_space<vmem>>, %arg2: memref<9x8xbf16, #tpu.memory_space<vmem>>, %arg3: memref<1x8xf32, #tpu.memory_space<vmem>>, %arg4: memref<72x16xbf16, #tpu.memory_space<vmem>>, %arg5: memref<1x16xf32, #tpu.memory_space<vmem>>, %arg6: memref<16x160xf32, #tpu.memory_space<vmem>>, %arg7: memref<168x160xf32, #tpu.memory_space<vmem>>, %arg8: memref<160x10xf32, #tpu.memory_space<vmem>>, %arg9: memref<1x10xf32, #tpu.memory_space<vmem>>, %arg10: memref<1x1x10xf32, #tpu.memory_space<vmem>>, %arg11: memref<198x8xf32, #tpu.memory_space<vmem>>, %arg12: memref<168x72xf32, #tpu.memory_space<vmem>>) attributes {dimension_semantics = [#tpu.dimension_semantics<parallel>], iteration_bounds = array<i64: 2>, scalar_prefetch = 0 : i64, scratch_operands = 2 : i64, tpu.core_type = #tpu.core_type<tc>, window_params = [{transform_indices = @transform_0, window_bounds = array<i64: 1, 198, 9>}, {pipeline_mode = #tpu.pipeline_mode<synchronous>, transform_indices = @transform_1, window_bounds = array<i64: 9, 8>}, {pipeline_mode = #tpu.pipeline_mode<synchronous>, transform_indices = @transform_2, window_bounds = array<i64: 1, 8>}, {pipeline_mode = #tpu.pipeline_mode<synchronous>, transform_indices = @transform_3, window_bounds = array<i64: 72, 16>}, {pipeline_mode = #tpu.pipeline_mode<synchronous>, transform_indices = @transform_4, window_bounds = array<i64: 1, 16>}, {pipeline_mode = #tpu.pipeline_mode<synchronous>, transform_indices = @transform_5, window_bounds = array<i64: 16, 160>}, {pipeline_mode = #tpu.pipeline_mode<synchronous>, transform_indices = @transform_6, window_bounds = array<i64: 168, 160>}, {pipeline_mode = #tpu.pipeline_mode<synchronous>, transform_indices = @transform_7, window_bounds = array<i64: 160, 10>}, {pipeline_mode = #tpu.pipeline_mode<synchronous>, transform_indices = @transform_8, window_bounds = array<i64: 1, 10>}, {transform_indices = @transform_9, window_bounds = array<i64: 1, 1, 10>}]} {
    %c0 = arith.constant 0 : index
    %c0_0 = arith.constant 0 : index
    %c0_1 = arith.constant 0 : index
    %0 = vector.load %arg1[%c0, %c0_0, %c0_1] : memref<1x198x9xbf16, #tpu.memory_space<vmem>>, vector<1x198x9xbf16>
    %1 = vector.shape_cast %0 : vector<1x198x9xbf16> to vector<198x9xbf16>
    %c0_2 = arith.constant 0 : index
    %c0_3 = arith.constant 0 : index
    %2 = vector.load %arg2[%c0_2, %c0_3] : memref<9x8xbf16, #tpu.memory_space<vmem>>, vector<9x8xbf16>
    %cst = arith.constant dense<0.000000e+00> : vector<198x8xf32>
    %3 = tpu.matmul %1, %2, %cst {dimension_numbers = #tpu.dot_dimension_numbers<[1], [0], [0], [1], [0, 0, 1, 1], [], []>} : vector<198x9xbf16>, vector<9x8xbf16>, vector<198x8xf32> -> vector<198x8xf32>
    %c0_4 = arith.constant 0 : index
    %c0_5 = arith.constant 0 : index
    %4 = vector.load %arg3[%c0_4, %c0_5] : memref<1x8xf32, #tpu.memory_space<vmem>>, vector<1x8xf32>
    %5 = vector.broadcast %4 : vector<1x8xf32> to vector<198x8xf32>
    %6 = arith.addf %3, %5 : vector<198x8xf32>
    %cst_6 = arith.constant 0.000000e+00 : f32
    %7 = vector.broadcast %cst_6 : f32 to vector<198x8xf32>
    %8 = arith.maximumf %6, %7 : vector<198x8xf32>
    %c0_7 = arith.constant 0 : index
    %c0_8 = arith.constant 0 : index
    %9 = vector.load %arg11[%c0_7, %c0_8] : memref<198x8xf32, #tpu.memory_space<vmem>>, vector<198x8xf32>
    tpu.vector_store %arg11[%c0_7, %c0_8], %8 {strides = array<i32>} : memref<198x8xf32, #tpu.memory_space<vmem>>, vector<198x8xf32>,
    %c0_9 = arith.constant 0 : index
    %c0_10 = arith.constant 0 : index
    %10 = vector.load %arg11[%c0_9, %c0_10] : memref<198x8xf32, #tpu.memory_space<vmem>>, vector<168x8xf32>
    %c0_11 = arith.constant 0 : index
    %c0_12 = arith.constant 0 : index
    %11 = vector.load %arg12[%c0_11, %c0_12] : memref<168x72xf32, #tpu.memory_space<vmem>>, vector<168x8xf32>
    tpu.vector_store %arg12[%c0_11, %c0_12], %10 {strides = array<i32>} : memref<168x72xf32, #tpu.memory_space<vmem>>, vector<168x8xf32>,
    %c1 = arith.constant 1 : index
    %c0_13 = arith.constant 0 : index
    %12 = vector.load %arg11[%c1, %c0_13] : memref<198x8xf32, #tpu.memory_space<vmem>>, vector<168x8xf32>
    %c0_14 = arith.constant 0 : index
    %c8 = arith.constant 8 : index
    %13 = vector.load %arg12[%c0_14, %c8] : memref<168x72xf32, #tpu.memory_space<vmem>>, vector<168x8xf32>
    tpu.vector_store %arg12[%c0_14, %c8], %12 {strides = array<i32>} : memref<168x72xf32, #tpu.memory_space<vmem>>, vector<168x8xf32>,
    %c2 = arith.constant 2 : index
    %c0_15 = arith.constant 0 : index
    %14 = vector.load %arg11[%c2, %c0_15] : memref<198x8xf32, #tpu.memory_space<vmem>>, vector<168x8xf32>
    %c0_16 = arith.constant 0 : index
    %c16 = arith.constant 16 : index
    %15 = vector.load %arg12[%c0_16, %c16] : memref<168x72xf32, #tpu.memory_space<vmem>>, vector<168x8xf32>
    tpu.vector_store %arg12[%c0_16, %c16], %14 {strides = array<i32>} : memref<168x72xf32, #tpu.memory_space<vmem>>, vector<168x8xf32>,
    %c14 = arith.constant 14 : index
    %c0_17 = arith.constant 0 : index
    %16 = vector.load %arg11[%c14, %c0_17] : memref<198x8xf32, #tpu.memory_space<vmem>>, vector<168x8xf32>
    %c0_18 = arith.constant 0 : index
    %c24 = arith.constant 24 : index
    %17 = vector.load %arg12[%c0_18, %c24] : memref<168x72xf32, #tpu.memory_space<vmem>>, vector<168x8xf32>
    tpu.vector_store %arg12[%c0_18, %c24], %16 {strides = array<i32>} : memref<168x72xf32, #tpu.memory_space<vmem>>, vector<168x8xf32>,
    %c15 = arith.constant 15 : index
    %c0_19 = arith.constant 0 : index
    %18 = vector.load %arg11[%c15, %c0_19] : memref<198x8xf32, #tpu.memory_space<vmem>>, vector<168x8xf32>
    %c0_20 = arith.constant 0 : index
    %c32 = arith.constant 32 : index
    %19 = vector.load %arg12[%c0_20, %c32] : memref<168x72xf32, #tpu.memory_space<vmem>>, vector<168x8xf32>
    tpu.vector_store %arg12[%c0_20, %c32], %18 {strides = array<i32>} : memref<168x72xf32, #tpu.memory_space<vmem>>, vector<168x8xf32>,
    %c16_21 = arith.constant 16 : index
    %c0_22 = arith.constant 0 : index
    %20 = vector.load %arg11[%c16_21, %c0_22] : memref<198x8xf32, #tpu.memory_space<vmem>>, vector<168x8xf32>
    %c0_23 = arith.constant 0 : index
    %c40 = arith.constant 40 : index
    %21 = vector.load %arg12[%c0_23, %c40] : memref<168x72xf32, #tpu.memory_space<vmem>>, vector<168x8xf32>
    tpu.vector_store %arg12[%c0_23, %c40], %20 {strides = array<i32>} : memref<168x72xf32, #tpu.memory_space<vmem>>, vector<168x8xf32>,
    %c28 = arith.constant 28 : index
    %c0_24 = arith.constant 0 : index
    %22 = vector.load %arg11[%c28, %c0_24] : memref<198x8xf32, #tpu.memory_space<vmem>>, vector<168x8xf32>
    %c0_25 = arith.constant 0 : index
    %c48 = arith.constant 48 : index
    %23 = vector.load %arg12[%c0_25, %c48] : memref<168x72xf32, #tpu.memory_space<vmem>>, vector<168x8xf32>
    tpu.vector_store %arg12[%c0_25, %c48], %22 {strides = array<i32>} : memref<168x72xf32, #tpu.memory_space<vmem>>, vector<168x8xf32>,
    %c29 = arith.constant 29 : index
    %c0_26 = arith.constant 0 : index
    %24 = vector.load %arg11[%c29, %c0_26] : memref<198x8xf32, #tpu.memory_space<vmem>>, vector<168x8xf32>
    %c0_27 = arith.constant 0 : index
    %c56 = arith.constant 56 : index
    %25 = vector.load %arg12[%c0_27, %c56] : memref<168x72xf32, #tpu.memory_space<vmem>>, vector<168x8xf32>
    tpu.vector_store %arg12[%c0_27, %c56], %24 {strides = array<i32>} : memref<168x72xf32, #tpu.memory_space<vmem>>, vector<168x8xf32>,
    %c30 = arith.constant 30 : index
    %c0_28 = arith.constant 0 : index
    %26 = vector.load %arg11[%c30, %c0_28] : memref<198x8xf32, #tpu.memory_space<vmem>>, vector<168x8xf32>
    %c0_29 = arith.constant 0 : index
    %c64 = arith.constant 64 : index
    %27 = vector.load %arg12[%c0_29, %c64] : memref<168x72xf32, #tpu.memory_space<vmem>>, vector<168x8xf32>
    tpu.vector_store %arg12[%c0_29, %c64], %26 {strides = array<i32>} : memref<168x72xf32, #tpu.memory_space<vmem>>, vector<168x8xf32>,
    %c0_30 = arith.constant 0 : index
    %c0_31 = arith.constant 0 : index
    %28 = vector.load %arg12[%c0_30, %c0_31] : memref<168x72xf32, #tpu.memory_space<vmem>>, vector<168x72xf32>
    %29 = arith.truncf %28 : vector<168x72xf32> to vector<168x72xbf16>
    %c0_32 = arith.constant 0 : index
    %c0_33 = arith.constant 0 : index
    %30 = vector.load %arg4[%c0_32, %c0_33] : memref<72x16xbf16, #tpu.memory_space<vmem>>, vector<72x16xbf16>
    %cst_34 = arith.constant dense<0.000000e+00> : vector<168x16xf32>
    %31 = tpu.matmul %29, %30, %cst_34 {dimension_numbers = #tpu.dot_dimension_numbers<[1], [0], [0], [1], [0, 0, 1, 1], [], []>} : vector<168x72xbf16>, vector<72x16xbf16>, vector<168x16xf32> -> vector<168x16xf32>
    %c0_35 = arith.constant 0 : index
    %c0_36 = arith.constant 0 : index
    %32 = vector.load %arg5[%c0_35, %c0_36] : memref<1x16xf32, #tpu.memory_space<vmem>>, vector<1x16xf32>
    %33 = vector.broadcast %32 : vector<1x16xf32> to vector<168x16xf32>
    %34 = arith.addf %31, %33 : vector<168x16xf32>
    %cst_37 = arith.constant 0.000000e+00 : f32
    %35 = vector.broadcast %cst_37 : f32 to vector<168x16xf32>
    %36 = arith.maximumf %34, %35 : vector<168x16xf32>
    %c0_38 = arith.constant 0 : index
    %c0_39 = arith.constant 0 : index
    %37 = vector.load %arg6[%c0_38, %c0_39] : memref<16x160xf32, #tpu.memory_space<vmem>>, vector<16x160xf32>
    %cst_40 = arith.constant dense<0.000000e+00> : vector<168x160xf32>
    %38 = tpu.matmul %36, %37, %cst_40 {dimension_numbers = #tpu.dot_dimension_numbers<[1], [0], [0], [1], [0, 0, 1, 1], [], []>} : vector<168x16xf32>, vector<16x160xf32>, vector<168x160xf32> -> vector<168x160xf32>
    %c0_41 = arith.constant 0 : index
    %c0_42 = arith.constant 0 : index
    %39 = vector.load %arg7[%c0_41, %c0_42] : memref<168x160xf32, #tpu.memory_space<vmem>>, vector<168x160xf32>
    %40 = arith.mulf %38, %39 : vector<168x160xf32>
    %cst_43 = arith.constant dense<0.000000e+00> : vector<160xf32>
    %41 = vector.multi_reduction <add>, %40, %cst_43 [0] : vector<168x160xf32> to vector<160xf32>
    %42 = vector.shape_cast %41 : vector<160xf32> to vector<1x160xf32>
    %c0_44 = arith.constant 0 : index
    %c0_45 = arith.constant 0 : index
    %43 = vector.load %arg8[%c0_44, %c0_45] : memref<160x10xf32, #tpu.memory_space<vmem>>, vector<160x10xf32>
    %cst_46 = arith.constant dense<0.000000e+00> : vector<1x10xf32>
    %44 = tpu.matmul %42, %43, %cst_46 {dimension_numbers = #tpu.dot_dimension_numbers<[1], [0], [0], [1], [0, 0, 1, 1], [], []>} : vector<1x160xf32>, vector<160x10xf32>, vector<1x10xf32> -> vector<1x10xf32>
    %c0_47 = arith.constant 0 : index
    %c0_48 = arith.constant 0 : index
    %45 = vector.load %arg9[%c0_47, %c0_48] : memref<1x10xf32, #tpu.memory_space<vmem>>, vector<1x10xf32>
    %46 = arith.addf %44, %45 : vector<1x10xf32>
    %c0_49 = arith.constant 0 : index
    %c0_50 = arith.constant 0 : index
    %c0_51 = arith.constant 0 : index
    %47 = vector.load %arg10[%c0_49, %c0_50, %c0_51] : memref<1x1x10xf32, #tpu.memory_space<vmem>>, vector<1x1x10xf32>
    %48 = vector.shape_cast %47 : vector<1x1x10xf32> to vector<1x10xf32>
    %49 = vector.shape_cast %46 : vector<1x10xf32> to vector<1x1x10xf32>
    tpu.vector_store %arg10[%c0_49, %c0_50, %c0_51], %49 {strides = array<i32>} : memref<1x1x10xf32, #tpu.memory_space<vmem>>, vector<1x1x10xf32>,
    return
  }
  func.func @transform_0(%arg0: i32) -> (i32, i32, i32) {
    %c0_i32 = arith.constant 0 : i32
    %c0_i32_0 = arith.constant 0 : i32
    %c0_i32_1 = arith.constant 0 : i32
    return %arg0, %c0_i32, %c0_i32_0 : i32, i32, i32
  }
  func.func @transform_1(%arg0: i32) -> (i32, i32) {
    %c0_i32 = arith.constant 0 : i32
    %c0_i32_0 = arith.constant 0 : i32
    %c0_i32_1 = arith.constant 0 : i32
    return %c0_i32, %c0_i32_0 : i32, i32
  }
  func.func @transform_2(%arg0: i32) -> (i32, i32) {
    %c0_i32 = arith.constant 0 : i32
    %c0_i32_0 = arith.constant 0 : i32
    %c0_i32_1 = arith.constant 0 : i32
    return %c0_i32, %c0_i32_0 : i32, i32
  }
  func.func @transform_3(%arg0: i32) -> (i32, i32) {
    %c0_i32 = arith.constant 0 : i32
    %c0_i32_0 = arith.constant 0 : i32
    %c0_i32_1 = arith.constant 0 : i32
    return %c0_i32, %c0_i32_0 : i32, i32
  }
  func.func @transform_4(%arg0: i32) -> (i32, i32) {
    %c0_i32 = arith.constant 0 : i32
    %c0_i32_0 = arith.constant 0 : i32
    %c0_i32_1 = arith.constant 0 : i32
    return %c0_i32, %c0_i32_0 : i32, i32
  }
  func.func @transform_5(%arg0: i32) -> (i32, i32) {
    %c0_i32 = arith.constant 0 : i32
    %c0_i32_0 = arith.constant 0 : i32
    %c0_i32_1 = arith.constant 0 : i32
    return %c0_i32, %c0_i32_0 : i32, i32
  }
  func.func @transform_6(%arg0: i32) -> (i32, i32) {
    %c0_i32 = arith.constant 0 : i32
    %c0_i32_0 = arith.constant 0 : i32
    %c0_i32_1 = arith.constant 0 : i32
    return %c0_i32, %c0_i32_0 : i32, i32
  }
  func.func @transform_7(%arg0: i32) -> (i32, i32) {
    %c0_i32 = arith.constant 0 : i32
    %c0_i32_0 = arith.constant 0 : i32
    %c0_i32_1 = arith.constant 0 : i32
    return %c0_i32, %c0_i32_0 : i32, i32
  }
  func.func @transform_8(%arg0: i32) -> (i32, i32) {
    %c0_i32 = arith.constant 0 : i32
    %c0_i32_0 = arith.constant 0 : i32
    %c0_i32_1 = arith.constant 0 : i32
    return %c0_i32, %c0_i32_0 : i32, i32
  }
  func.func @transform_9(%arg0: i32) -> (i32, i32, i32) {
    %c0_i32 = arith.constant 0 : i32
    %c0_i32_0 = arith.constant 0 : i32
    %c0_i32_1 = arith.constant 0 : i32
    return %arg0, %c0_i32, %c0_i32_0 : i32, i32, i32
  }
}

</mosaic_0001>

<bundles_post_ra>
// kernel: tile.9
= control target key start
LH: loop header
LB: loop body
LE: loop exit
PB: predicated region body
PF: predicated region fallthrough
CT: control target
= control target key end

     0   :  { %s108_s6 = smov 3  ;;  %vm60_vm0 = vcmask 64512   ;;  %s70_s9 = smov 3  ;;  %vm6_vm1 = vcmask 1043458   ;;  %vm10_vm2 = vcmask 1045508   ;;  %vm14_vm3 = vcmask 1047558   ;;  %s1070_s0 = inlined_call_operand.vmem [shape: f32[16,10,10], index: 0, kind: input, shape index: {}]   ;;  %s1071_s1 = inlined_call_operand.vmem [shape: f32[160,10], index: 1, kind: output, shape index: {}]  }
   0x1   :  { %v527_v0 = vld [vmem:[%s1070_s0 + $0x8b] ss:$16 sm:%s108_s6]   ;;  %s625_s10 = smov 110   ;;  %v519_v1 = vld [vmem:[%s1070_s0 + $0x8c] ss:$16 sm:%s70_s9]   ;;  %s73_s13 = smov 3 }
   0x2   :  { %110 = vrot.lane.b32.xlu1 %v527_v0, %s625_s10  ;;  %s86_s14 = smov 3  ;;  %v520_v2 = vld [vmem:[%s1070_s0 + $0x8c] ss:$16 sm:%s73_s13]   ;;  %s89_s19 = smov 12  ;;  %vm16_vm4 = vcmask 80896   ;;  %vm64_vm5 = vcmask 15360  }
   0x3   :  { %v523_v3 = vld [vmem:[%s1070_s0 + $0xb] ss:$16 sm:%s86_s14]   ;;  %s94_s20 = smov 48  ;;  %v76_v4 = vsel %vm60_vm0, %v520_v2, %v519_v1  ;;  %s99_s25 = smov 192  ;;  %vm67_vm6 = vcmask 1048512   ;;  %vm105_vm7 = vcmask 982896  }
   0x4   :  { %v524_v5 = vld [vmem:[%s1070_s0 + $0xb] ss:$16 sm:%s89_s19]   ;;  %s25_s26 = smov 3  ;;  %s626_s27 = smov 120   ;;  %vm135_vm8 = vcmask 900896   ;;  %vm165_vm9 = vcmask 818896  }
   0x5   :  { %v525_v6 = vld [vmem:[%s1070_s0 + $0xb] ss:$16 sm:%s94_s20]   ;;  %77 = vrot.lane.b32.xlu0 %v76_v4, %s626_s27  ;;  %v92_v7 = vsel %vm6_vm1, %v524_v5, %v523_v3  ;;  %s28_s30 = smov 12  ;;  %s33_s2 = smov 48  ;;  %vm195_vm10 = vcmask 736896   ;;  %vm225_vm11 = vcmask 654896  }
   0x6   :  { %v526_v8 = vld [vmem:[%s1070_s0 + $0xb] ss:$16 sm:%s99_s25]   ;;  %v97_v9 = vsel %vm10_vm2, %v525_v6, %v92_v7  ;;  %v510_v10 = vld [vmem:[%s1070_s0 + $0xc] ss:$16 sm:%s25_s26]   ;;  %s38_s7 = smov 192  ;;  %s43_s8 = smov 3 }
   0x7   :  { %v511_v11 = vld [vmem:[%s1070_s0 + $0xc] ss:$16 sm:%s28_s30]   ;;  %v102_v12 = vsel %vm14_vm3, %v526_v8, %v97_v9  ;;  %s46_s14 = smov 12  ;;  %s51_s15 = smov 48  ;;  %vm255_vm12 = vcmask 572896   ;;  %vm285_vm13 = vcmask 490896  }
   0x8   :  { %v31_v13 = vsel %vm6_vm1, %v511_v11, %v510_v10  ;;  %v512_v14 = vld [vmem:[%s1070_s0 + $0xc] ss:$16 sm:%s33_s2]   ;;  %103 = vrot.lane.b32.xlu1 %v102_v12, %s625_s10  ;;  %s56_s17 = smov 192  ;;  %s138_s22 = smov 3  ;;  %vm315_vm14 = vcmask 408896   ;;  %vm345_vm15 = vcmask 326896  }
   0x9   :  { %v513_v15 = vld [vmem:[%s1070_s0 + $0xc] ss:$16 sm:%s38_s7]   ;;  %v36_v16 = vsel %vm10_vm2, %v512_v14, %v31_v13  ;;  %s116_s23 = smov 3  ;;  %v533_v23 = vld [vmem:[%s1070_s0 + $0x8a] ss:$16 sm:%s138_s22]   ;;  %s119_s29 = smov 12 }
   0xa   :  { %v514_v17 = vld [vmem:[%s1070_s0 + $0xc] ss:$16 sm:%s43_s8]   ;;  %v41_v20 = vsel %vm14_vm3, %v513_v15, %v36_v16  ;;  %s124_s30 = smov 48  ;;  %v529_v25 = vld [vmem:[%s1070_s0 + $0xa] ss:$16 sm:%s116_s23]   ;;  %s129_s6 = smov 192 }
   0xb   :  { %v515_v18 = vld [vmem:[%s1070_s0 + $0xc] ss:$16 sm:%s46_s14]   ;;  %v530_v26 = vld [vmem:[%s1070_s0 + $0xa] ss:$16 sm:%s119_s29]   ;;  %s627_s7 = smov 100   ;;  %s168_s11 = smov 3 }
   0xc   :  { %v516_v19 = vld [vmem:[%s1070_s0 + $0xc] ss:$16 sm:%s51_s15]   ;;  %v49_v21 = vsel %vm6_vm1, %v515_v18, %v514_v17  ;;  %140 = vrot.lane.b32.xlu1 %v533_v23, %s627_s7  ;;  %v122_v28 = vsel %vm6_vm1, %v530_v26, %v529_v25  ;;  %s146_s12 = smov 3  ;;  %s149_s16 = smov 12 }
   0xd   :  { %v517_v22 = vld [vmem:[%s1070_s0 + $0xc] ss:$16 sm:%s56_s17]   ;;  %v54_v24 = vsel %vm10_vm2, %v516_v19, %v49_v21  ;;  %v531_v29 = vld [vmem:[%s1070_s0 + $0xa] ss:$16 sm:%s124_s30]   ;;  %s154_s17 = smov 48  ;;  %s159_s19 = smov 192 }
   0xe   :  { %v59_v27 = vsel %vm14_vm3, %v517_v22, %v54_v24  ;;  %v127_v31 = vsel %vm10_vm2, %v531_v29, %v122_v28  ;;  %v532_v32 = vld [vmem:[%s1070_s0 + $0xa] ss:$16 sm:%s129_s6]   ;;  %v539_v33 = vld [vmem:[%s1070_s0 + $0x89] ss:$16 sm:%s168_s11]   ;;  %s198_s24 = smov 3  ;;  %s176_s25 = smov 3 }
   0xf   :  { %v61_v30 = vsel %vm60_vm0, %v59_v27, %v41_v20  ;;  %v535_v34 = vld [vmem:[%s1070_s0 + $0x9] ss:$16 sm:%s146_s12]   ;;  %v132_v35 = vsel %vm14_vm3, %v532_v32, %v127_v31  ;;  %s628_s26 = smov 90   ;;  %s179_s30 = smov 12  ;;  %v545_v41 = vld [vmem:[%s1070_s0 + $0x88] ss:$16 sm:%s198_s24]  }
  0x10   :  { %62 = vrot.lane.b32.xlu0 %v61_v30, %s626_s27  ;;  %v536_v36 = vld [vmem:[%s1070_s0 + $0x9] ss:$16 sm:%s149_s16]   ;;  %170 = vrot.lane.b32.xlu1 %v539_v33, %s628_s26  ;;  %s184_s2 = smov 48  ;;  %s189_s8 = smov 192  ;;  %vm375_vm0 = vcmask 261296  }
  0x11   :  { %v537_v37 = vld [vmem:[%s1070_s0 + $0x9] ss:$16 sm:%s154_s17]   ;;  %v152_v38 = vsel %vm6_vm1, %v536_v36, %v535_v34  ;;  %v541_v42 = vld [vmem:[%s1070_s0 + $0x8] ss:$16 sm:%s176_s25]   ;;  %s228_s11 = smov 3  ;;  %s206_s12 = smov 3 }
  0x12   :  { %v538_v39 = vld [vmem:[%s1070_s0 + $0x9] ss:$16 sm:%s159_s19]   ;;  %v157_v40 = vsel %vm10_vm2, %v537_v37, %v152_v38  ;;  %v542_v43 = vld [vmem:[%s1070_s0 + $0x8] ss:$16 sm:%s179_s30]   ;;  %s209_s16 = smov 12  ;;  %s214_s17 = smov 48 }
  0x13   :  { %v162_v44 = vsel %vm14_vm3, %v538_v39, %v157_v40  ;;  %v182_v45 = vsel %vm6_vm1, %v542_v43, %v541_v42  ;;  %v543_v46 = vld [vmem:[%s1070_s0 + $0x8] ss:$16 sm:%s184_s2]   ;;  %s629_s27 = smov 80   ;;  %v551_v49 = vld [vmem:[%s1070_s0 + $0x87] ss:$16 sm:%s228_s11]   ;;  %s219_s20 = smov 192 }
  0x14   :  { %133 = vrot.lane.b32.xlu0 %v132_v35, %s627_s7  ;;  %v544_v47 = vld [vmem:[%s1070_s0 + $0x8] ss:$16 sm:%s189_s8]   ;;  %200 = vrot.lane.b32.xlu1 %v545_v41, %s629_s27  ;;  %v187_v48 = vsel %vm10_vm2, %v543_v46, %v182_v45  ;;  %s258_s25 = smov 3  ;;  %s236_s28 = smov 3 }
  0x15   :  { %v547_v50 = vld [vmem:[%s1070_s0 + $0x7] ss:$16 sm:%s206_s12]   ;;  %s239_s30 = smov 12  ;;  %s244_s2 = smov 48  ;;  %v192_v54 = vsel %vm14_vm3, %v544_v47, %v187_v48  ;;  %v557_v56 = vld [vmem:[%s1070_s0 + $0x86] ss:$16 sm:%s258_s25]  }
  0x16   :  { %v548_v51 = vld [vmem:[%s1070_s0 + $0x7] ss:$16 sm:%s209_s16]   ;;  %s630_s8 = smov 70   ;;  %v553_v58 = vld [vmem:[%s1070_s0 + $0x6] ss:$16 sm:%s236_s28]   ;;  %s249_s11 = smov 192 }
  0x17   :  { %v212_v52 = vsel %vm6_vm1, %v548_v51, %v547_v50  ;;  %v549_v53 = vld [vmem:[%s1070_s0 + $0x7] ss:$16 sm:%s214_s17]   ;;  %s266_s12 = smov 3  ;;  %v554_v59 = vld [vmem:[%s1070_s0 + $0x6] ss:$16 sm:%s239_s30]   ;;  %s269_s16 = smov 12 }
  0x18   :  { %163 = vrot.lane.b32.xlu0 %v162_v44, %s628_s26  ;;  %v550_v55 = vld [vmem:[%s1070_s0 + $0x7] ss:$16 sm:%s219_s20]   ;;  %230 = vrot.lane.b32.xlu1 %v551_v49, %s630_s8  ;;  %v217_v57 = vsel %vm10_vm2, %v549_v53, %v212_v52  ;;  %v242_v61 = vsel %vm6_vm1, %v554_v59, %v553_v58  ;;  %s288_s17 = smov 3  ;;  %s631_s22 = smov 60  }
  0x19   :  { %v555_v60 = vld [vmem:[%s1070_s0 + $0x6] ss:$16 sm:%s244_s2]   ;;  %v222_v62 = vsel %vm14_vm3, %v550_v55, %v217_v57  ;;  %v559_v0 = vld [vmem:[%s1070_s0 + $0x5] ss:$16 sm:%s266_s12]   ;;  %s296_s25 = smov 3  ;;  %s299_s28 = smov 12 }
  0x1a   :  { %v556_v63 = vld [vmem:[%s1070_s0 + $0x6] ss:$16 sm:%s249_s11]   ;;  %v247_v1 = vsel %vm10_vm2, %v555_v60, %v242_v61  ;;  %v560_v2 = vld [vmem:[%s1070_s0 + $0x5] ss:$16 sm:%s269_s16]   ;;  %s279_s3 = smov 192  ;;  %s318_s4 = smov 3 }
  0x1b   :  { %v563_v3 = vld [vmem:[%s1070_s0 + $0x85] ss:$16 sm:%s288_s17]   ;;  %v272_v4 = vsel %vm6_vm1, %v560_v2, %v559_v0  ;;  %s304_s5 = smov 48  ;;  %v252_v6 = vsel %vm14_vm3, %v556_v63, %v247_v1  ;;  %v565_v7 = vld [vmem:[%s1070_s0 + $0x4] ss:$16 sm:%s296_s25]   ;;  %s326_s11 = smov 3 }
  0x1c   :  { %193 = vrot.lane.b32.xlu0 %v192_v54, %s629_s27  ;;  %s274_s27 = smov 48  ;;  %260 = vrot.lane.b32.xlu1 %v557_v56, %s631_s22  ;;  %v566_v8 = vld [vmem:[%s1070_s0 + $0x4] ss:$16 sm:%s299_s28]   ;;  %s632_s12 = smov 50  }
  0x1d   :  { %v561_v5 = vld [vmem:[%s1070_s0 + $0x5] ss:$16 sm:%s274_s27]   ;;  %s309_s15 = smov 192  ;;  %s329_s10 = smov 12  ;;  %v569_v11 = vld [vmem:[%s1070_s0 + $0x84] ss:$16 sm:%s318_s4]   ;;  %v302_v12 = vsel %vm6_vm1, %v566_v8, %v565_v7 }
  0x1e   :  { %v277_v9 = vsel %vm10_vm2, %v561_v5, %v272_v4  ;;  %v562_v10 = vld [vmem:[%s1070_s0 + $0x5] ss:$16 sm:%s279_s3]   ;;  %v567_v13 = vld [vmem:[%s1070_s0 + $0x4] ss:$16 sm:%s304_s5]   ;;  %s348_s19 = smov 3  ;;  %s356_s23 = smov 3 }
  0x1f   :  { %v571_v14 = vld [vmem:[%s1070_s0 + $0x3] ss:$16 sm:%s326_s11]   ;;  %v282_v15 = vsel %vm14_vm3, %v562_v10, %v277_v9  ;;  %v568_v16 = vld [vmem:[%s1070_s0 + $0x4] ss:$16 sm:%s309_s15]   ;;  %s359_s29 = smov 12  ;;  %s633_s30 = smov 40   ;;  %v307_v18 = vsel %vm10_vm2, %v567_v13, %v302_v12 }
  0x20   :  { %223 = vrot.lane.b32.xlu0 %v222_v62, %s630_s8  ;;  %290 = vrot.lane.b32.xlu1 %v563_v3, %s632_s12  ;;  %v572_v17 = vld [vmem:[%s1070_s0 + $0x3] ss:$16 sm:%s329_s10]   ;;  %s339_s4 = smov 192  ;;  %s379_s8 = smov 3  ;;  %v312_v24 = vsel %vm14_vm3, %v568_v16, %v307_v18 }
  0x21   :  { %v575_v19 = vld [vmem:[%s1070_s0 + $0x83] ss:$16 sm:%s348_s19]   ;;  %v332_v20 = vsel %vm6_vm1, %v572_v17, %v571_v14  ;;  %v577_v22 = vld [vmem:[%s1070_s0 + $0xf] ss:$16 sm:%s356_s23]   ;;  %s364_s13 = smov 48  ;;  %s387_s14 = smov 3 }
  0x22   :  { %v578_v23 = vld [vmem:[%s1070_s0 + $0xf] ss:$16 sm:%s359_s29]   ;;  %v574_v25 = vld [vmem:[%s1070_s0 + $0x3] ss:$16 sm:%s339_s4]   ;;  %s390_s16 = smov 12  ;;  %s634_s17 = smov 30  }
  0x23   :  { %v582_v27 = vld [vmem:[%s1070_s0 + $0x8f] ss:$16 sm:%s379_s8]   ;;  %s369_s19 = smov 192  ;;  %v362_v28 = vsel %vm6_vm1, %v578_v23, %v577_v22  ;;  %v584_v30 = vld [vmem:[%s1070_s0 + $0x2] ss:$16 sm:%s387_s14]   ;;  %s395_s26 = smov 48 }
  0x24   :  { %253 = vrot.lane.b32.xlu0 %v252_v6, %s631_s22  ;;  %s334_s22 = smov 48  ;;  %320 = vrot.lane.b32.xlu1 %v569_v11, %s633_s30  ;;  %v579_v29 = vld [vmem:[%s1070_s0 + $0xf] ss:$16 sm:%s364_s13]   ;;  %s417_s29 = smov 3 }
  0x25   :  { %v573_v21 = vld [vmem:[%s1070_s0 + $0x3] ss:$16 sm:%s334_s22]   ;;  %s409_s22 = smov 3  ;;  %v585_v31 = vld [vmem:[%s1070_s0 + $0x2] ss:$16 sm:%s390_s16]   ;;  %s420_s3 = smov 12  ;;  %v367_v34 = vsel %vm10_vm2, %v579_v29, %v362_v28 }
  0x26   :  { %v337_v26 = vsel %vm10_vm2, %v573_v21, %v332_v20  ;;  %v580_v33 = vld [vmem:[%s1070_s0 + $0xf] ss:$16 sm:%s369_s19]   ;;  %s635_s4 = smov 22   ;;  %v588_v35 = vld [vmem:[%s1070_s0 + $0x82] ss:$16 sm:%s409_s22]   ;;  %s400_s8 = smov 192  ;;  %v393_v36 = vsel %vm6_vm1, %v585_v31, %v584_v30 }
  0x27   :  { %v342_v32 = vsel %vm14_vm3, %v574_v25, %v337_v26  ;;  %v586_v37 = vld [vmem:[%s1070_s0 + $0x2] ss:$16 sm:%s395_s26]   ;;  %s440_s11 = smov 3  ;;  %v590_v38 = vld [vmem:[%s1070_s0 + $0xe] ss:$16 sm:%s417_s29]   ;;  %s425_s10 = smov 48  ;;  %v372_v40 = vsel %vm14_vm3, %v580_v33, %v367_v34 }
  0x28   :  { %283 = vrot.lane.b32.xlu0 %v282_v15, %s632_s12  ;;  %350 = vrot.lane.b32.xlu1 %v575_v19, %s634_s17  ;;  %v591_v39 = vld [vmem:[%s1070_s0 + $0xe] ss:$16 sm:%s420_s3]   ;;  %s448_s16 = smov 3  ;;  %s430_s18 = smov 192  ;;  %v398_v42 = vsel %vm10_vm2, %v586_v37, %v393_v36 }
  0x29   :  { %v587_v41 = vld [vmem:[%s1070_s0 + $0x2] ss:$16 sm:%s400_s8]   ;;  %s451_s19 = smov 12  ;;  %s636_s20 = smov 20   ;;  %v595_v43 = vld [vmem:[%s1070_s0 + $0x8e] ss:$16 sm:%s440_s11]   ;;  %v423_v44 = vsel %vm6_vm1, %v591_v39, %v590_v38 }
  0x2a   :  { %s470_s23 = smov 3  ;;  %s456_s24 = smov 48  ;;  %v592_v45 = vld [vmem:[%s1070_s0 + $0xe] ss:$16 sm:%s425_s10]   ;;  %v597_v46 = vld [vmem:[%s1070_s0 + $0x1] ss:$16 sm:%s448_s16]   ;;  %v403_v49 = vsel %vm14_vm3, %v587_v41, %v398_v42 }
  0x2b   :  { %v593_v47 = vld [vmem:[%s1070_s0 + $0xe] ss:$16 sm:%s430_s18]   ;;  %v598_v48 = vld [vmem:[%s1070_s0 + $0x1] ss:$16 sm:%s451_s19]   ;;  %s481_s6 = smov 12  ;;  %s19_s8 = smov 3  ;;  %v428_v52 = vsel %vm10_vm2, %v592_v45, %v423_v44 }
  0x2c   :  { %313 = vrot.lane.b32.xlu0 %v312_v24, %s633_s30  ;;  %381 = vrot.lane.b32.xlu1 %v582_v27, %s635_s4  ;;  %s478_s30 = smov 3  ;;  %v601_v50 = vld [vmem:[%s1070_s0 + $0x81] ss:$16 sm:%s470_s23]   ;;  %s461_s13 = smov 192  ;;  %v454_v54 = vsel %vm6_vm1, %v598_v48, %v597_v46  ;;  %v433_v59 = vsel %vm14_vm3, %v593_v47, %v428_v52 }
  0x2d   :  { %v599_v51 = vld [vmem:[%s1070_s0 + $0x1] ss:$16 sm:%s456_s24]   ;;  %s2_s14 = smov 3  ;;  %s637_s15 = smov 12   ;;  %v603_v53 = vld [vmem:[%s1070_s0 + $0xd] ss:$16 sm:%s478_s30]  }
  0x2e   :  { %s8_s27 = smov 48  ;;  %v604_v55 = vld [vmem:[%s1070_s0 + $0xd] ss:$16 sm:%s481_s6]   ;;  %v508_v56 = vld [vmem:[%s1070_s0 + $0x80] ss:$16 sm:%s19_s8]   ;;  %s12_s23 = smov 192  ;;  %v459_v62 = vsel %vm10_vm2, %v599_v51, %v454_v54 }
  0x2f   :  { %v600_v57 = vld [vmem:[%s1070_s0 + $0x1] ss:$16 sm:%s461_s13]   ;;  %s501_s25 = smov 3  ;;  %s486_s28 = smov 48  ;;  %509 = vst.msk [vmem:[%s1071_s1 + $0x10] sm:$0x3] %vm16_vm4, %v508_v56   ;;  %v484_v2 = vsel %vm6_vm1, %v604_v55, %v603_v53 }
  0x30   :  { %343 = vrot.lane.b32.xlu0 %v342_v32, %s634_s17  ;;  %411 = vrot.lane.b32.xlu1 %v588_v35, %s636_s20  ;;  %s4_s17 = smov 12  ;;  %v3_v58 = vld [vmem:[%s1070_s0] ss:$16 sm:%s2_s14]   ;;  %s638_s8 = smov 10   ;;  %v464_v6 = vsel %vm14_vm3, %v600_v57, %v459_v62 }
  0x31   :  { %v5_v60 = vld [vmem:[%s1070_s0] ss:$16 sm:%s4_s17]   ;;  %v608_v1 = vld [vmem:[%s1070_s0 + $0x8d] ss:$16 sm:%s501_s25]   ;;  %s491_s10 = smov 192  ;;  %s639_s17 = smov 2  }
  0x32   :  { %v9_v61 = vld [vmem:[%s1070_s0] ss:$16 sm:%s8_s27]   ;;  %v7_v63 = vsel %vm6_vm1, %v5_v60, %v3_v58  ;;  %v605_v3 = vld [vmem:[%s1070_s0 + $0xd] ss:$16 sm:%s486_s28]   ;;  %vm406_vm1 = vcmask 244896  }
  0x33   :  { %v13_v0 = vld [vmem:[%s1070_s0] ss:$16 sm:%s12_s23]   ;;  %v11_v4 = vsel %vm10_vm2, %v9_v61, %v7_v63  ;;  %v489_v7 = vsel %vm10_vm2, %v605_v3, %v484_v2  ;;  %v606_v8 = vld [vmem:[%s1070_s0 + $0xd] ss:$16 sm:%s491_s10]   ;;  %vm436_vm2 = vcmask 179296  }
  0x34   :  { %373 = vrot.lane.b32.xlu0 %v372_v40, %s635_s4  ;;  %442 = vrot.lane.b32.xlu1 %v595_v43, %s637_s15  ;;  %v15_v5 = vsel %vm14_vm3, %v13_v0, %v11_v4  ;;  %v494_v9 = vsel %vm14_vm3, %v606_v8, %v489_v7  ;;  %vm467_vm3 = vcmask 162896  }
  0x35   :  { %17 = vst.msk [vmem:[%s1071_s1] sm:$0xff] %vm16_vm4, %v15_v5   ;;  %vm497_vm4 = vcmask 97296  }
  0x38   :  { %404 = vrot.lane.b32.xlu0 %v403_v49, %s636_s20  ;;  %472 = vrot.lane.b32.xlu1 %v601_v50, %s638_s8 }
  0x3c   :  { %434 = vrot.lane.b32.xlu0 %v433_v59, %s637_s15  ;;  %503 = vrot.lane.b32.xlu1 %v608_v1, %s639_s17 }
  0x40   :  { %465 = vrot.lane.b32.xlu0 %v464_v6, %s638_s8 }
  0x44   :  { %495 = vrot.lane.b32.xlu0 %v494_v9, %s639_s17 }
  0x74   :  { %v111_v10 = vpop.permute.xlu1 %110  }
  0x77   :  { %v78_v11 = vpop.permute.xlu0 %77  }
  0x78   :  { %521 = vst.msk [vmem:[%s1071_s1 + $0x18] sm:$0x3] %vm64_vm5, %v78_v11  }
  0x79   :  { %522 = vst.msk [vmem:[%s1071_s1 + $0x10] sm:$0x3] %vm67_vm6, %v78_v11  }
  0x7a   :  { %528 = vst.msk [vmem:[%s1071_s1 + $0x10] sm:$0x3] %vm105_vm7, %v111_v10   ;;  %v104_v12 = vpop.permute.xlu1 %103  }
  0x7e   :  { %v141_v13 = vpop.permute.xlu1 %140  }
  0x7f   :  { %534 = vst.msk [vmem:[%s1071_s1 + $0x10] sm:$0x3] %vm135_vm8, %v141_v13  }
  0x82   :  { %v63_v14 = vpop.permute.xlu0 %62   ;;  %v171_v15 = vpop.permute.xlu1 %170  }
  0x83   :  { %518 = vst.msk [vmem:[%s1071_s1 + $0x8] sm:$0xff] %vm64_vm5, %v63_v14  }
  0x84   :  { %68 = vst.msk [vmem:[%s1071_s1] sm:$0xff] %vm67_vm6, %v63_v14  }
  0x85   :  { %106 = vst.msk [vmem:[%s1071_s1] sm:$0xff] %vm105_vm7, %v104_v12  }
  0x86   :  { %540 = vst.msk [vmem:[%s1071_s1 + $0x10] sm:$0x3] %vm165_vm9, %v171_v15   ;;  %v134_v16 = vpop.permute.xlu0 %133   ;;  %v201_v17 = vpop.permute.xlu1 %200  }
  0x87   :  { %136 = vst.msk [vmem:[%s1071_s1] sm:$0xff] %vm135_vm8, %v134_v16  }
  0x88   :  { %546 = vst.msk [vmem:[%s1071_s1 + $0x10] sm:$0x3] %vm195_vm10, %v201_v17  }
  0x8a   :  { %v164_v18 = vpop.permute.xlu0 %163   ;;  %v231_v19 = vpop.permute.xlu1 %230  }
  0x8b   :  { %166 = vst.msk [vmem:[%s1071_s1] sm:$0xff] %vm165_vm9, %v164_v18  }
  0x8c   :  { %552 = vst.msk [vmem:[%s1071_s1 + $0x10] sm:$0x3] %vm225_vm11, %v231_v19  }
  0x8e   :  { %v194_v20 = vpop.permute.xlu0 %193   ;;  %v261_v21 = vpop.permute.xlu1 %260  }
  0x8f   :  { %196 = vst.msk [vmem:[%s1071_s1] sm:$0xff] %vm195_vm10, %v194_v20  }
  0x90   :  { %558 = vst.msk [vmem:[%s1071_s1 + $0x10] sm:$0x3] %vm255_vm12, %v261_v21  }
  0x92   :  { %v224_v22 = vpop.permute.xlu0 %223   ;;  %v291_v23 = vpop.permute.xlu1 %290  }
  0x93   :  { %226 = vst.msk [vmem:[%s1071_s1] sm:$0xff] %vm225_vm11, %v224_v22  }
  0x94   :  { %564 = vst.msk [vmem:[%s1071_s1 + $0x10] sm:$0x3] %vm285_vm13, %v291_v23  }
  0x96   :  { %v254_v24 = vpop.permute.xlu0 %253   ;;  %v321_v25 = vpop.permute.xlu1 %320  }
  0x97   :  { %256 = vst.msk [vmem:[%s1071_s1] sm:$0xff] %vm255_vm12, %v254_v24  }
  0x98   :  { %570 = vst.msk [vmem:[%s1071_s1 + $0x10] sm:$0x3] %vm315_vm14, %v321_v25  }
  0x9a   :  { %v284_v26 = vpop.permute.xlu0 %283   ;;  %v351_v27 = vpop.permute.xlu1 %350  }
  0x9b   :  { %286 = vst.msk [vmem:[%s1071_s1] sm:$0xff] %vm285_vm13, %v284_v26  }
  0x9c   :  { %576 = vst.msk [vmem:[%s1071_s1 + $0x10] sm:$0x3] %vm345_vm15, %v351_v27  }
  0x9e   :  { %v314_v28 = vpop.permute.xlu0 %313   ;;  %v382_v29 = vpop.permute.xlu1 %381  }
  0x9f   :  { %316 = vst.msk [vmem:[%s1071_s1] sm:$0xff] %vm315_vm14, %v314_v28  }
  0xa0   :  { %583 = vst.msk [vmem:[%s1071_s1 + $0x18] sm:$0x3] %vm375_vm0, %v382_v29  }
  0xa2   :  { %v344_v30 = vpop.permute.xlu0 %343   ;;  %v412_v31 = vpop.permute.xlu1 %411  }
  0xa3   :  { %346 = vst.msk [vmem:[%s1071_s1] sm:$0xff] %vm345_vm15, %v344_v30  }
  0xa4   :  { %589 = vst.msk [vmem:[%s1071_s1 + $0x10] sm:$0x3] %vm406_vm1, %v412_v31  }
  0xa6   :  { %v374_v32 = vpop.permute.xlu0 %373   ;;  %v443_v33 = vpop.permute.xlu1 %442  }
  0xa7   :  { %581 = vst.msk [vmem:[%s1071_s1 + $0x8] sm:$0xff] %vm375_vm0, %v374_v32  }
  0xa8   :  { %596 = vst.msk [vmem:[%s1071_s1 + $0x18] sm:$0x3] %vm436_vm2, %v443_v33  }
  0xaa   :  { %v405_v34 = vpop.permute.xlu0 %404   ;;  %v473_v35 = vpop.permute.xlu1 %472  }
  0xab   :  { %407 = vst.msk [vmem:[%s1071_s1] sm:$0xff] %vm406_vm1, %v405_v34  }
  0xac   :  { %602 = vst.msk [vmem:[%s1071_s1 + $0x10] sm:$0x3] %vm467_vm3, %v473_v35  }
  0xae   :  { %v435_v36 = vpop.permute.xlu0 %434   ;;  %v504_v37 = vpop.permute.xlu1 %503  }
  0xaf   :  { %594 = vst.msk [vmem:[%s1071_s1 + $0x8] sm:$0xff] %vm436_vm2, %v435_v36  }
  0xb0   :  { %609 = vst.msk [vmem:[%s1071_s1 + $0x18] sm:$0x3] %vm497_vm4, %v504_v37  }
  0xb2   :  { %v466_v38 = vpop.permute.xlu0 %465  }
  0xb3   :  { %468 = vst.msk [vmem:[%s1071_s1] sm:$0xff] %vm467_vm3, %v466_v38  }
  0xb6   :  { %v496_v39 = vpop.permute.xlu0 %495  }
  0xb7   :  { %607 = vst.msk [vmem:[%s1071_s1 + $0x8] sm:$0xff] %vm497_vm4, %v496_v39  }

// kernel: image_classifier_forward.1
= control target key start
LH: loop header
LB: loop body
LE: loop exit
PB: predicated region body
PF: predicated region fallthrough
CT: control target
= control target key end

     0   :  { %14 = vsyncpa [#allocation5], 0  ;;  %s4072_s0 = inlined_call_operand.vmem [shape: bf16[2,198,9], index: 0, kind: input, shape index: {}]   ;;  %s4073_s1 = inlined_call_operand.vmem [shape: bf16[9,8], index: 1, kind: input, shape index: {}]   ;;  %s4074_s2 = inlined_call_operand.vmem [shape: f32[1,8], index: 2, kind: input, shape index: {}]   ;;  %s4075_s3 = inlined_call_operand.vmem [shape: bf16[72,16], index: 3, kind: input, shape index: {}]   ;;  %s4076_s4 = inlined_call_operand.vmem [shape: f32[1,16], index: 4, kind: input, shape index: {}]   ;;  %s4077_s5 = inlined_call_operand.vmem [shape: f32[16,160], index: 5, kind: input, shape index: {}]   ;;  %s4078_s6 = inlined_call_operand.vmem [shape: f32[168,160], index: 6, kind: input, shape index: {}]   ;;  %s4079_s7 = inlined_call_operand.vmem [shape: f32[160,10], index: 7, kind: input, shape index: {}]   ;;  %s4080_s8 = inlined_call_operand.vmem [shape: f32[1,10], index: 8, kind: input, shape index: {}]   ;;  %s4081_s9 = inlined_call_operand.hbm [shape: f32[2,1,10], index: 9, kind: output, shape index: {}]  }
   0x1   :  { %16 = vsyncpa [#allocation5 + $0x1], 0  ;;  %s2969_s30 = smov 0   ;;  %s2971_s10 = smov 0  }
   0x2   :  { %s2973_s11 = smov 0   ;;  %s2975_s12 = smov 0  }
   0x3 LB: > { %s2990_s13 = sadd.s32 4294967295, %s2905_s12   ;;  %s2560_s14 = sadd.s32 4294967294, %s2905_s12   ;;  %s2905_s12 = sphi %s2975_s12, %s4094_s12   ;;  %s2901_s11 = sphi %s2973_s11, %s4093_s11   ;;  %s2897_s10 = sphi %s2971_s10, %s4092_s10   ;;  %s2893_s30 = sphi %s2969_s30, %s4091_s30  }
   0x4   : > { %s2994_s15 = sadd.s32 1, %s2905_s12   ;;  %s223_s16 = sadd.s32 1, %s2901_s11 }
   0x5   : > { %s220_s17 = ssub.s32 %s2905_s12, %s2994_s15  ;;  %p233_p0 = scmp.ne.s32.totalorder %s2901_s11, %s2897_s10 }
   0x6   : > { %p221_p1 = scmp.eq.s32.totalorder %s220_s17, 0  ;;  %p234_p2 = scmp.eq.s32.totalorder %s2990_s13, 1 }
   0x7   : > { %p239_p3 = scmp.ne.s32.totalorder %s2897_s10, %s2893_s30  ;;  %p240_p4 = scmp.eq.s32.totalorder %s2560_s14, 1 }
   0x8   : > { %s3005_s18 = scalar_select %p221_p1, %s2901_s11, %s223_s16  }
   0x9   : > { %p3007_p5 = por %p234_p2, %p233_p0  ;;  %p3011_p6 = por %p240_p4, %p239_p3 }
   0xa   : > { %p2563_p7 = scmp.ge.s32.totalorder %s2905_s12, 1  ;;  %p290_p8 = scmp.lt.s32.totalorder %s2905_s12, 3 }
   0xc   : > { %p291_p9 = pnand %p2563_p7, %p290_p8 }
   0xd   : > { %p325_p10 = scmp.lt.s32.totalorder (!%p291_p9), %s2990_s13, 1  ;;  %s2910_s14 = smov (!%p291_p9), 40  }
   0xe   : > { %294 = sbr.rel (%p291_p9) target bundleno = 1311 (0x51f), region = 56  ;;  %s4085_s16 = smov (!%p291_p9), 16  }
   0xf   : > { %s4082_s17 = smov (!%p291_p9), 8   ;;  %s2913_s21 = smov (!%p291_p9), 48  }
  0x10   : > { %s2914_s22 = smov (!%p291_p9), 56   ;;  %s2917_s25 = smov (!%p291_p9), 32  }
  0x11   : > { %s323_s26 = sand.u32 (!%p291_p9), 1, %s2897_s10  }
  0x13   : > { %vm473_vm0 = vcmask 1043456   ;;  %v2907_v0 = vmov 0.0   ;;  %v2826_v1 = vld [vmem:[%s4073_s1] sm:$0x1f]   ;;  %vm474_vm1 = vcmask 1044480   ;;  %v2908_v2 = vmov 65535  }
  0x14   : > { %2665 = vmatprep.subr.bf16.mxu0 %v2907_v0  ;;  %2773 = vmatprep.subr.bf16.mxu1 %v2907_v0  ;;  %v475_v3 = vsel %vm473_vm0, 4294967295, %v2908_v2  ;;  %vm2909_vm2 = vmmov 0   ;;  %s326_s23 = scalar_select %p325_p10, %s2990_s13, 1  ;;  %vm433_vm3 = vcmask 72704   ;;  %v3089_v19 = vld [vmem:[%s4074_s2] ss:$0 sm:$0xff] }
  0x15   : > { %2667 = vmatprep.mubr.msk.bf16.mxu0 %vm2909_vm2, %v2907_v0  ;;  %2695 = vmatprep.mubr.msk.bf16.mxu1 %vm2909_vm2, %v2907_v0  ;;  %v476_v4 = vsel %vm474_vm1, %v475_v3, 0  ;;  %vm641_vm4 = vcmask 64512   ;;  %vm815_vm5 = vcmask 130112   ;;  %vm942_vm6 = vcmask 195712  }
  0x16   : > { %v478_v5 = vand.u32 %v2826_v1, %v476_v4  ;;  %s2775_s24 = smul.u32 100, %s326_s23  ;;  %s4083_s23 = smov 64   ;;  %vm1069_vm7 = vcmask 261312   ;;  %vm1196_vm8 = vcmask 326912   ;;  %vm1323_vm9 = vcmask 392512  }
  0x17   : > { %vm666_vm10 = vcmask 62464   ;;  %vm1450_vm11 = vcmask 458112   ;;  %vm1577_vm12 = vcmask 523712   ;;  %vm1704_vm13 = vcmask 589312  }
  0x18   : > { %2666 = vmatpush3.bf16.msra.mxu0 %v478_v5  ;;  %2774 = vmatpush3.bf16.msra.mxu1 %v478_v5  ;;  %s3032_s27 = scalar_lea.vmem %s4072_s0, %s2775_s24  ;;  %s2916_s24 = smov 24   ;;  %vm1801_vm14 = vcmask 588800   ;;  %vm1983_vm15 = vcmask 130048   ;;  %vm2490_vm1 = vcmask 73728  }
  0x19   : > { %2719 = vmatprep.subr.bf16.mxu1 %v2907_v0  ;;  %v2827_v6 = vld [vmem:[%s3032_s27] sm:$0xff]   ;;  %v2828_v7 = vld [vmem:[%s3032_s27 + $0x38] sm:$0xff]   ;;  %v2829_v8 = vld [vmem:[%s3032_s27 + $0x8] sm:$0xff]  }
  0x1a   : > { %v2830_v9 = vld [vmem:[%s3032_s27 + $0x40] sm:$0xff]   ;;  %v2831_v10 = vld [vmem:[%s3032_s27 + $0x10] sm:$0xff]   ;;  %v2834_v11 = vld [vmem:[%s3032_s27 + $0x48] sm:$0xff]  }
  0x1b   : > { %2668 = vmatmul.mubr.msk.bf16.vlgmr.msra.gmra.mxu0 %vm433_vm3, %v2827_v6  ;;  %2696 = vmatmul.mubr.msk.bf16.vlgmr.msra.gmra.mxu1 %vm433_vm3, %v2828_v7  ;;  %v2832_v12 = vld [vmem:[%s3032_s27 + $0x18] sm:$0xff]   ;;  %v2837_v13 = vld [vmem:[%s3032_s27 + $0x50] sm:$0xff]   ;;  %v2833_v14 = vld [vmem:[%s3032_s27 + $0x20] sm:$0xff]  }
  0x1c   : > { %2671 = vmatprep.mubr.msk.bf16.mxu0 %vm2909_vm2, %v2907_v0  ;;  %2699 = vmatprep.mubr.msk.bf16.mxu1 %vm2909_vm2, %v2907_v0  ;;  %v2835_v15 = vld [vmem:[%s3032_s27 + $0x28] sm:$0xff]   ;;  %v2836_v16 = vld [vmem:[%s3032_s27 + $0x30] sm:$0xff]   ;;  %v2838_v17 = vld [vmem:[%s3032_s27 + $0x58] sm:$0xff]  }
  0x1d   : > { %v2839_v18 = vld [vmem:[%s3032_s27 + $0x60] ss:$0 sps:$4 sm:$0x77]  }
  0x23   : > { %2672 = vmatmul.mubr.msk.bf16.gmra.mxu0 %vm433_vm3, %v2829_v8  ;;  %2700 = vmatmul.mubr.msk.bf16.gmra.mxu1 %vm433_vm3, %v2830_v9 }
  0x24   : > { %2675 = vmatprep.mubr.msk.bf16.mxu0 %vm2909_vm2, %v2907_v0  ;;  %2703 = vmatprep.mubr.msk.bf16.mxu1 %vm2909_vm2, %v2907_v0 }
  0x2b   : > { %2676 = vmatmul.mubr.msk.bf16.gmra.mxu0 %vm433_vm3, %v2831_v10  ;;  %2704 = vmatmul.mubr.msk.bf16.gmra.mxu1 %vm433_vm3, %v2834_v11 }
  0x2c   : > { %2679 = vmatprep.mubr.msk.bf16.mxu0 %vm2909_vm2, %v2907_v0  ;;  %2707 = vmatprep.mubr.msk.bf16.mxu1 %vm2909_vm2, %v2907_v0 }
  0x33   : > { %2680 = vmatmul.mubr.msk.bf16.gmra.mxu0 %vm433_vm3, %v2832_v12  ;;  %2708 = vmatmul.mubr.msk.bf16.gmra.mxu1 %vm433_vm3, %v2837_v13 }
  0x34   : > { %2683 = vmatprep.mubr.msk.bf16.mxu0 %vm2909_vm2, %v2907_v0  ;;  %2711 = vmatprep.mubr.msk.bf16.mxu1 %vm2909_vm2, %v2907_v0 }
  0x3b   : > { %2684 = vmatmul.mubr.msk.bf16.gmra.mxu0 %vm433_vm3, %v2833_v14  ;;  %2712 = vmatmul.mubr.msk.bf16.gmra.mxu1 %vm433_vm3, %v2838_v17 }
  0x3c   : > { %2687 = vmatprep.mubr.msk.bf16.mxu0 %vm2909_vm2, %v2907_v0  ;;  %2715 = vmatprep.mubr.msk.bf16.mxu1 %vm2909_vm2, %v2907_v0 }
  0x43   : > { %2688 = vmatmul.mubr.msk.bf16.gmra.mxu0 %vm433_vm3, %v2835_v15  ;;  %2716 = vmatmul.mubr.msk.bf16.gmra.mxu1 %vm433_vm3, %v2839_v18 }
  0x44   : > { %2691 = vmatprep.mubr.msk.bf16.mxu0 %vm2909_vm2, %v2907_v0  ;;  %2729 = vmatprep.mubr.msk.bf16.mxu1 %vm2909_vm2, %v2907_v0 }
  0x4b   : > { %2692 = vmatmul.mubr.msk.bf16.gmra.mxu0 %vm433_vm3, %v2836_v16 }
  0x4c   : > { %2111 = vmatprep.mubr.f32.mxu0 %v2907_v0 }
  0xdb   : > { %v514_v20 = vpop.f32.mrf.mxu0  ;;  %v570_v22 = vpop.f32.mrf.mxu1 }
  0xdc   : > { %v515_v21 = vadd.f32 %v3089_v19, %v514_v20  ;;  %v571_v23 = vadd.f32 %v3089_v19, %v570_v22 }
  0xdd   : > { %v2669_v24 = vpop.f32.mrf.mxu0  ;;  %v2697_v26 = vpop.f32.mrf.mxu1 }
  0xde   : > { %v616_v25 = vmax.f32 %v515_v21, 0.0  ;;  %v630_v27 = vmax.f32 %v571_v23, 0.0 }
  0xdf   : > { %v517_v28 = vpop.f32.mrf.mxu0  ;;  %v573_v30 = vpop.f32.mrf.mxu1 }
  0xe0   : > { %642 = vst.msk [vmem:[#allocation2] sm:$0xff] %vm641_vm4, %v616_v25  ;;  %v518_v29 = vadd.f32 %v3089_v19, %v517_v28  ;;  %656 = vst.msk [vmem:[#allocation2 + $0x70] sm:$0xff] %vm641_vm4, %v630_v27  ;;  %v574_v31 = vadd.f32 %v3089_v19, %v573_v30 }
  0xe1   : > { %v2670_v32 = vpop.f32.mrf.mxu0  ;;  %v2698_v34 = vpop.f32.mrf.mxu1 }
  0xe2   : > { %v617_v33 = vmax.f32 %v518_v29, 0.0  ;;  %v631_v35 = vmax.f32 %v574_v31, 0.0 }
  0xe3   : > { %v522_v36 = vpop.f32.mrf.mxu0  ;;  %v578_v38 = vpop.f32.mrf.mxu1 }
  0xe4   : > { %643 = vst.msk [vmem:[#allocation2 + $0x8] sm:$0xff] %vm641_vm4, %v617_v33  ;;  %v523_v37 = vadd.f32 %v3089_v19, %v522_v36  ;;  %657 = vst.msk [vmem:[#allocation2 + $0x78] sm:$0xff] %vm641_vm4, %v631_v35  ;;  %v579_v39 = vadd.f32 %v3089_v19, %v578_v38 }
  0xe5   : > { %v2673_v40 = vpop.f32.mrf.mxu0  ;;  %v2701_v42 = vpop.f32.mrf.mxu1 }
  0xe6   : > { %v618_v41 = vmax.f32 %v523_v37, 0.0  ;;  %v632_v43 = vmax.f32 %v579_v39, 0.0 }
  0xe7   : > { %v525_v44 = vpop.f32.mrf.mxu0  ;;  %v668_v45 = vld [vmem:[#allocation2] sm:$0xff]  ;;  %v1230_v47 = vld [vmem:[#allocation2 + $0x70] sm:$0xff]  ;;  %v581_v48 = vpop.f32.mrf.mxu1 }
  0xe8   : > { %644 = vst.msk [vmem:[#allocation2 + $0x10] sm:$0xff] %vm641_vm4, %v618_v41  ;;  %v526_v46 = vadd.f32 %v3089_v19, %v525_v44  ;;  %689 = vst.msk [vmem:[#allocation3] sm:$0xff] %vm641_vm4, %v668_v45  ;;  %1284 = vrot.lane.b32.xlu0 %v1230_v47, %s2910_s14  ;;  %v582_v50 = vadd.f32 %v3089_v19, %v581_v48 }
  0xe9   : > { %658 = vst.msk [vmem:[#allocation2 + $0x80] sm:$0xff] %vm641_vm4, %v632_v43  ;;  %v2674_v49 = vpop.f32.mrf.mxu0  ;;  %703 = vst.msk [vmem:[#allocation3 + $0x70] sm:$0xff] %vm641_vm4, %v1230_v47  ;;  %v2702_v52 = vpop.f32.mrf.mxu1 }
  0xea   : > { %v619_v51 = vmax.f32 %v526_v46, 0.0  ;;  %v633_v56 = vmax.f32 %v582_v50, 0.0 }
  0xeb   : > { %v530_v53 = vpop.f32.mrf.mxu0  ;;  %v837_v54 = vld [vmem:[#allocation2 + $0x2] sm:$0xff]  ;;  %v586_v59 = vpop.f32.mrf.mxu1  ;;  %v3115_v63 = vld [vmem:[#allocation2 + $0x78] sm:$0xff] }
  0xec   : > { %v710_v55 = vld [vmem:[#allocation2 + $0x1] sm:$0xff]  ;;  %645 = vst.msk [vmem:[#allocation2 + $0x18] sm:$0xff] %vm641_vm4, %v619_v51  ;;  %v531_v58 = vadd.f32 %v3089_v19, %v530_v53  ;;  %879 = vrot.lane.b32.xlu1 %v837_v54, %s4085_s16  ;;  %659 = vst.msk [vmem:[#allocation2 + $0x88] sm:$0xff] %vm641_vm4, %v633_v56  ;;  %v587_v61 = vadd.f32 %v3089_v19, %v586_v59  ;;  %v1356_v3 = vld [vmem:[#allocation2 + $0x74] sm:$0xff] }
  0xed   : > { %v669_v57 = vld [vmem:[#allocation2 + $0x8] sm:$0xff]  ;;  %752 = vrot.lane.b32.xlu0 %v710_v55, %s4082_s17  ;;  %v2677_v60 = vpop.f32.mrf.mxu0  ;;  %v2705_v1 = vpop.f32.mrf.mxu1  ;;  %704 = vst.msk [vmem:[#allocation3 + $0x78] sm:$0xff] %vm641_vm4, %v3115_v63  ;;  %v724_v6 = vld [vmem:[#allocation2 + $0x71] sm:$0xff] }
  0xee   : > { %690 = vst.msk [vmem:[#allocation3 + $0x8] sm:$0xff] %vm641_vm4, %v669_v57  ;;  %v620_v62 = vmax.f32 %v531_v58, 0.0  ;;  %v634_v4 = vmax.f32 %v587_v61, 0.0  ;;  %v1483_v15 = vld [vmem:[#allocation2 + $0x75] sm:$0xff] }
  0xef   : > { %v533_v2 = vpop.f32.mrf.mxu0  ;;  %v3122_v7 = vld [vmem:[#allocation2 + $0x10] sm:$0xff]  ;;  %v589_v8 = vpop.f32.mrf.mxu1 }
  0xf0   : > { %646 = vst.msk [vmem:[#allocation2 + $0x20] sm:$0xff] %vm641_vm4, %v620_v62  ;;  %v534_v5 = vadd.f32 %v3089_v19, %v533_v2  ;;  %1409 = vrot.lane.b32.xlu1 %v1356_v3, %s2913_s21  ;;  %660 = vst.msk [vmem:[#allocation2 + $0x90] sm:$0xff] %vm641_vm4, %v634_v4  ;;  %v590_v10 = vadd.f32 %v3089_v19, %v589_v8  ;;  %v3129_v12 = vld [vmem:[#allocation2 + $0x80] sm:$0xff]  ;;  %v851_v20 = vld [vmem:[#allocation2 + $0x72] sm:$0xff] }
  0xf1   : > { %780 = vrot.lane.b32.xlu0 %v724_v6, %s4082_s17  ;;  %v2678_v9 = vpop.f32.mrf.mxu0  ;;  %691 = vst.msk [vmem:[#allocation3 + $0x10] sm:$0xff] %vm641_vm4, %v3122_v7  ;;  %v2706_v13 = vpop.f32.mrf.mxu1  ;;  %705 = vst.msk [vmem:[#allocation3 + $0x80] sm:$0xff] %vm641_vm4, %v3129_v12  ;;  %v1610_v28 = vld [vmem:[#allocation2 + $0x76] sm:$0xff]  ;;  %v711_v31 = vld [vmem:[#allocation2 + $0x9] sm:$0xff] }
  0xf2   : > { %v621_v11 = vmax.f32 %v534_v5, 0.0  ;;  %v635_v17 = vmax.f32 %v590_v10, 0.0  ;;  %v964_v37 = vld [vmem:[#allocation2 + $0xe] sm:$0xff]  ;;  %v1104_v42 = vld [vmem:[#allocation2 + $0x77] sm:$0xff] }
  0xf3   : > { %v538_v14 = vpop.f32.mrf.mxu0  ;;  %v3131_v16 = vld [vmem:[#allocation2 + $0x18] sm:$0xff]  ;;  %v594_v21 = vpop.f32.mrf.mxu1  ;;  %v3143_v25 = vld [vmem:[#allocation2 + $0x88] sm:$0xff] }
  0xf4   : > { %647 = vst.msk [vmem:[#allocation2 + $0x28] sm:$0xff] %vm641_vm4, %v621_v11  ;;  %v539_v18 = vadd.f32 %v3089_v19, %v538_v14  ;;  %1536 = vrot.lane.b32.xlu1 %v1483_v15, %s2914_s22  ;;  %692 = vst.msk [vmem:[#allocation3 + $0x18] sm:$0xff] %vm641_vm4, %v3131_v16  ;;  %v595_v23 = vadd.f32 %v3089_v19, %v594_v21  ;;  %v1091_v44 = vld [vmem:[#allocation2 + $0xf] sm:$0xff]  ;;  %v1357_v58 = vld [vmem:[#allocation2 + $0x7c] sm:$0xff] }
  0xf5   : > { %907 = vrot.lane.b32.xlu0 %v851_v20, %s4085_s16  ;;  %v2681_v22 = vpop.f32.mrf.mxu0  ;;  %661 = vst.msk [vmem:[#allocation2 + $0x98] sm:$0xff] %vm641_vm4, %v635_v17  ;;  %v2709_v26 = vpop.f32.mrf.mxu1  ;;  %706 = vst.msk [vmem:[#allocation3 + $0x88] sm:$0xff] %vm641_vm4, %v3143_v25  ;;  %v838_v56 = vld [vmem:[#allocation2 + $0xa] sm:$0xff]  ;;  %v1484_v2 = vld [vmem:[#allocation2 + $0x7d] sm:$0xff] }
  0xf6   : > { %v622_v24 = vmax.f32 %v539_v18, 0.0  ;;  %v636_v29 = vmax.f32 %v595_v23, 0.0  ;;  %v1611_v9 = vld [vmem:[#allocation2 + $0x7e] sm:$0xff]  ;;  %v965_v13 = vld [vmem:[#allocation2 + $0x16] sm:$0xff]  ;;  %v1106_v26 = vld [vmem:[#allocation2 + $0x87] sm:$0xff] }
  0xf7   : > { %v541_v27 = vpop.f32.mrf.mxu0  ;;  %v3152_v33 = vld [vmem:[#allocation2 + $0x20] sm:$0xff]  ;;  %v3172_v47 = vld [vmem:[#allocation2 + $0x90] sm:$0xff] }
  0xf8   : > { %648 = vst.msk [vmem:[#allocation2 + $0x30] sm:$0xff] %vm641_vm4, %v622_v24  ;;  %v542_v30 = vadd.f32 %v3089_v19, %v541_v27  ;;  %1663 = vrot.lane.b32.xlu1 %v1610_v28, %s4083_s23  ;;  %662 = vst.msk [vmem:[#allocation2 + $0xa0] sm:$0xff] %vm641_vm4, %v636_v29  ;;  %v1092_v14 = vld [vmem:[#allocation2 + $0x17] sm:$0xff]  ;;  %v1105_v15 = vld [vmem:[#allocation2 + $0x7f] sm:$0xff] }
  0xf9   : > { %754 = vrot.lane.b32.xlu0 %v711_v31, %s4082_s17  ;;  %v2682_v32 = vpop.f32.mrf.mxu0  ;;  %693 = vst.msk [vmem:[#allocation3 + $0x20] sm:$0xff] %vm641_vm4, %v3152_v33  ;;  %707 = vst.msk [vmem:[#allocation3 + $0x90] sm:$0xff] %vm641_vm4, %v3172_v47  ;;  %v1358_v17 = vld [vmem:[#allocation2 + $0x84] sm:$0xff]  ;;  %v712_v18 = vld [vmem:[#allocation2 + $0x11] sm:$0xff] }
  0xfa   : > { %v623_v34 = vmax.f32 %v542_v30, 0.0  ;;  %v1485_v20 = vld [vmem:[#allocation2 + $0x85] sm:$0xff]  ;;  %v839_v21 = vld [vmem:[#allocation2 + $0x12] sm:$0xff]  ;;  %v1345_v27 = vld [vmem:[#allocation2 + $0x1c] sm:$0xff] }
  0xfb   : > { %v546_v35 = vpop.f32.mrf.mxu0  ;;  %v3159_v38 = vld [vmem:[#allocation2 + $0x28] sm:$0xff]  ;;  %v713_v29 = vld [vmem:[#allocation2 + $0x19] sm:$0xff] }
  0xfc   : > { %649 = vst.msk [vmem:[#allocation2 + $0x38] sm:$0xff] %vm641_vm4, %v623_v34  ;;  %v547_v36 = vadd.f32 %v3089_v19, %v546_v35  ;;  %1032 = vrot.lane.b32.xlu1 %v1610_v28, %s2916_s24  ;;  %694 = vst.msk [vmem:[#allocation3 + $0x28] sm:$0xff] %vm641_vm4, %v3159_v38  ;;  %v3174_v48 = vld [vmem:[#allocation2 + $0x98] sm:$0xff]  ;;  %v853_v24 = vld [vmem:[#allocation2 + $0x82] sm:$0xff] }
  0xfd   : > { %1006 = vrot.lane.b32.xlu0 %v964_v37, %s2916_s24  ;;  %v2685_v39 = vpop.f32.mrf.mxu0  ;;  %708 = vst.msk [vmem:[#allocation3 + $0x98] sm:$0xff] %vm641_vm4, %v3174_v48  ;;  %v1472_v28 = vld [vmem:[#allocation2 + $0x1d] sm:$0xff]  ;;  %v727_v35 = vld [vmem:[#allocation2 + $0x89] sm:$0xff] }
  0xfe   : > { %v624_v40 = vmax.f32 %v547_v36, 0.0  ;;  %v1599_v30 = vld [vmem:[#allocation2 + $0x1e] sm:$0xff]  ;;  %v2842_v37 = vld [vmem:[%s4075_s3 + $0x10] sm:$0xff]  }
  0xff   : > { %v549_v41 = vpop.f32.mrf.mxu0  ;;  %v3167_v45 = vld [vmem:[#allocation2 + $0x30] sm:$0xff]  ;;  %v2840_v31 = vld [vmem:[%s4075_s3 + $0x20] ss:$0 sps:$4 sm:$0xff]  }
 0x100   : > { %650 = vst.msk [vmem:[#allocation2 + $0x40] sm:$0xff] %vm641_vm4, %v624_v40  ;;  %v550_v43 = vadd.f32 %v3089_v19, %v549_v41  ;;  %1159 = vrot.lane.b32.xlu1 %v1104_v42, %s2917_s25  ;;  %695 = vst.msk [vmem:[#allocation3 + $0x30] sm:$0xff] %vm641_vm4, %v3167_v45  ;;  %v840_v32 = vld [vmem:[#allocation2 + $0x1a] sm:$0xff]  ;;  %v1836_v34 = vsel %vm473_vm0, %v2840_v31, 0  ;;  %v854_v39 = vld [vmem:[#allocation2 + $0x8a] sm:$0xff]  ;;  %vm2348_vm0 = vcmask 261120  }
 0x101   : > { %1133 = vrot.lane.b32.xlu0 %v1091_v44, %s2917_s25  ;;  %v2686_v46 = vpop.f32.mrf.mxu0  ;;  %2720 = vmatpush3.bf16.msra.mxu1 %v1836_v34  ;;  %v1093_v36 = vld [vmem:[#allocation2 + $0x1f] sm:$0xff]  ;;  %v2843_v40 = vld [vmem:[%s4075_s3 + $0x8] sm:$0xff]  }
 0x102   : > { %v625_v49 = vmax.f32 %v550_v43, 0.0  ;;  %2721 = vmatprep.subr.bf16.mxu1 %v2907_v0  ;;  %v1346_v42 = vld [vmem:[#allocation2 + $0x24] sm:$0xff]  ;;  %v1359_v44 = vld [vmem:[#allocation2 + $0x8c] sm:$0xff] }
 0x103   : > { %v554_v50 = vpop.f32.mrf.mxu0  ;;  %v3186_v53 = vld [vmem:[#allocation2 + $0x38] sm:$0xff]  ;;  %v1473_v46 = vld [vmem:[#allocation2 + $0x25] sm:$0xff] }
 0x104   : > { %651 = vst.msk [vmem:[#allocation2 + $0x48] sm:$0xff] %vm641_vm4, %v625_v49  ;;  %v555_v51 = vadd.f32 %v3089_v19, %v554_v50  ;;  %1286 = vrot.lane.b32.xlu1 %v3115_v63, %s2910_s14  ;;  %696 = vst.msk [vmem:[#allocation3 + $0x38] sm:$0xff] %vm641_vm4, %v3186_v53  ;;  %v725_v63 = vld [vmem:[#allocation2 + $0x79] sm:$0xff]  ;;  %v1486_v49 = vld [vmem:[#allocation2 + $0x8d] sm:$0xff] }
 0x105   : > { %1260 = vrot.lane.b32.xlu0 %v3122_v7, %s2910_s14  ;;  %v2689_v52 = vpop.f32.mrf.mxu0  ;;  %v852_v7 = vld [vmem:[#allocation2 + $0x7a] sm:$0xff]  ;;  %v1600_v50 = vld [vmem:[#allocation2 + $0x26] sm:$0xff]  ;;  %v716_v31 = vld [vmem:[#allocation2 + $0x31] sm:$0xff] }
 0x106   : > { %v626_v54 = vmax.f32 %v555_v51, 0.0  ;;  %v1613_v51 = vld [vmem:[#allocation2 + $0x8e] sm:$0xff] }
 0x107   : > { %v557_v55 = vpop.f32.mrf.mxu0  ;;  %v3193_v59 = vld [vmem:[#allocation2 + $0x40] sm:$0xff] }
 0x108   : > { %652 = vst.msk [vmem:[#allocation2 + $0x50] sm:$0xff] %vm641_vm4, %v626_v54  ;;  %v558_v57 = vadd.f32 %v3089_v19, %v557_v55  ;;  %881 = vrot.lane.b32.xlu1 %v838_v56, %s4085_s16  ;;  %697 = vst.msk [vmem:[#allocation3 + $0x40] sm:$0xff] %vm641_vm4, %v3193_v59  ;;  %v1094_v52 = vld [vmem:[#allocation2 + $0x27] sm:$0xff] }
 0x109   : > { %1411 = vrot.lane.b32.xlu0 %v1357_v58, %s2913_s21  ;;  %v2690_v60 = vpop.f32.mrf.mxu0  ;;  %v714_v54 = vld [vmem:[#allocation2 + $0x21] sm:$0xff] }
 0x10a   : > { %v627_v61 = vmax.f32 %v558_v57, 0.0  ;;  %v841_v56 = vld [vmem:[#allocation2 + $0x22] sm:$0xff]  ;;  %v1360_v60 = vld [vmem:[#allocation2 + $0x94] sm:$0xff] }
 0x10b   : > { %v562_v62 = vpop.f32.mrf.mxu0  ;;  %v3202_v4 = vld [vmem:[#allocation2 + $0x48] sm:$0xff] }
 0x10c   : > { %653 = vst.msk [vmem:[#allocation2 + $0x58] sm:$0xff] %vm641_vm4, %v627_v61  ;;  %v563_v1 = vadd.f32 %v3089_v19, %v562_v62  ;;  %782 = vrot.lane.b32.xlu1 %v725_v63, %s4082_s17  ;;  %698 = vst.msk [vmem:[#allocation3 + $0x48] sm:$0xff] %vm641_vm4, %v3202_v4  ;;  %v1347_v61 = vld [vmem:[#allocation2 + $0x2c] sm:$0xff]  ;;  %v1487_v63 = vld [vmem:[#allocation2 + $0x95] sm:$0xff] }
 0x10d   : > { %1538 = vrot.lane.b32.xlu0 %v1484_v2, %s2914_s22  ;;  %v2693_v3 = vpop.f32.mrf.mxu0 }
 0x10e   : > { %v628_v5 = vmax.f32 %v563_v1, 0.0  ;;  %v1474_v1 = vld [vmem:[#allocation2 + $0x2d] sm:$0xff] }
 0x10f   : > { %v565_v6 = vpop.f32.mrf.mxu0  ;;  %v3223_v22 = vld [vmem:[#allocation2 + $0x50] sm:$0xff] }
 0x110   : > { %654 = vst.msk [vmem:[#allocation2 + $0x60] sm:$0xff] %vm641_vm4, %v628_v5  ;;  %v566_v8 = vadd.f32 %v3089_v19, %v565_v6  ;;  %909 = vrot.lane.b32.xlu1 %v852_v7, %s4085_s16  ;;  %699 = vst.msk [vmem:[#allocation3 + $0x50] sm:$0xff] %vm641_vm4, %v3223_v22  ;;  %v1614_v5 = vld [vmem:[#allocation2 + $0x96] sm:$0xff]  ;;  %v1601_v6 = vld [vmem:[#allocation2 + $0x2e] sm:$0xff] }
 0x111   : > { %1665 = vrot.lane.b32.xlu0 %v1611_v9, %s4083_s23  ;;  %v2694_v10 = vpop.f32.mrf.mxu0 }
 0x112   : > { %v629_v11 = vmax.f32 %v566_v8, 0.0 }
 0x113   : > { %v3228_v23 = vld [vmem:[#allocation2 + $0x58] sm:$0xff] }
 0x114   : > { %655 = vst.msk [vmem:[#allocation2 + $0x68] sm:$0xff] %vm641_vm4, %v629_v11  ;;  %1008 = vrot.lane.b32.xlu1 %v965_v13, %s2916_s24  ;;  %700 = vst.msk [vmem:[#allocation3 + $0x58] sm:$0xff] %vm641_vm4, %v3228_v23 }
 0x115   : > { %1034 = vrot.lane.b32.xlu0 %v1611_v9, %s2916_s24  ;;  %v597_v9 = vpop.f32.mrf.mxu1 }
 0x116   : > { %v598_v10 = vadd.f32 %v3089_v19, %v597_v9  ;;  %v844_v9 = vld [vmem:[#allocation2 + $0x3a] sm:$0xff] }
 0x117   : > { %v3265_v41 = vld [vmem:[#allocation2 + $0x60] sm:$0xff]  ;;  %v2710_v13 = vpop.f32.mrf.mxu1 }
 0x118   : > { %1135 = vrot.lane.b32.xlu1 %v1092_v14, %s2917_s25  ;;  %701 = vst.msk [vmem:[#allocation3 + $0x60] sm:$0xff] %vm641_vm4, %v3265_v41 }
 0x119   : > { %1161 = vrot.lane.b32.xlu0 %v1105_v15, %s2917_s25  ;;  %v715_v15 = vld [vmem:[#allocation2 + $0x29] sm:$0xff] }
 0x11b   : > { %v3269_v43 = vld [vmem:[#allocation2 + $0x68] sm:$0xff] }
 0x11c   : > { %1262 = vrot.lane.b32.xlu1 %v3131_v16, %s2910_s14  ;;  %v1612_v16 = vld [vmem:[#allocation2 + $0x86] sm:$0xff]  ;;  %702 = vst.msk [vmem:[#allocation3 + $0x68] sm:$0xff] %vm641_vm4, %v3269_v43 }
 0x11d   : > { %1288 = vrot.lane.b32.xlu0 %v3129_v12, %s2910_s14  ;;  %v726_v12 = vld [vmem:[#allocation2 + $0x81] sm:$0xff] }
 0x120   : > { %1413 = vrot.lane.b32.xlu1 %v1358_v17, %s2913_s21  ;;  %v637_v17 = vmax.f32 %v598_v10, 0.0 }
 0x121   : > { %756 = vrot.lane.b32.xlu0 %v712_v18, %s4082_s17  ;;  %v1095_v18 = vld [vmem:[#allocation2 + $0x2f] sm:$0xff] }
 0x122   : > { %663 = vst.msk [vmem:[#allocation2 + $0xa8] sm:$0xff] %vm641_vm4, %v637_v17  ;;  %v1350_v17 = vld [vmem:[#allocation2 + $0x44] sm:$0xff] }
 0x124   : > { %1540 = vrot.lane.b32.xlu1 %v1485_v20, %s2914_s22  ;;  %v602_v20 = vpop.f32.mrf.mxu1 }
 0x125   : > { %883 = vrot.lane.b32.xlu0 %v839_v21, %s4085_s16  ;;  %v603_v21 = vadd.f32 %v3089_v19, %v602_v20 }
 0x128   : > { %1667 = vrot.lane.b32.xlu1 %v1612_v16, %s4083_s23 }
 0x129   : > { %784 = vrot.lane.b32.xlu0 %v726_v12, %s4082_s17  ;;  %v2713_v12 = vpop.f32.mrf.mxu1 }
 0x12a   : > { %v1477_v12 = vld [vmem:[#allocation2 + $0x45] sm:$0xff] }
 0x12c   : > { %1036 = vrot.lane.b32.xlu1 %v1612_v16, %s2916_s24 }
 0x12d   : > { %911 = vrot.lane.b32.xlu0 %v853_v24, %s4085_s16 }
 0x130   : > { %1163 = vrot.lane.b32.xlu1 %v1106_v26, %s2917_s25  ;;  %v842_v26 = vld [vmem:[#allocation2 + $0x2a] sm:$0xff] }
 0x131   : > { %1387 = vrot.lane.b32.xlu0 %v1345_v27, %s2913_s21  ;;  %v638_v27 = vmax.f32 %v603_v21, 0.0 }
 0x133   : > { %664 = vst.msk [vmem:[#allocation2 + $0xb0] sm:$0xff] %vm641_vm4, %v638_v27  ;;  %v1604_v27 = vld [vmem:[#allocation2 + $0x46] sm:$0xff] }
 0x134   : > { %1290 = vrot.lane.b32.xlu1 %v3143_v25, %s2910_s14  ;;  %v2841_v25 = vld [vmem:[%s4075_s3 + $0x18] sm:$0xff]  }
 0x135   : > { %1514 = vrot.lane.b32.xlu0 %v1472_v28, %s2914_s22  ;;  %2722 = vmatpush3.bf16.msra.mxu1 %v2841_v25  ;;  %v843_v25 = vld [vmem:[#allocation2 + $0x32] sm:$0xff] }
 0x136   : > { %2723 = vmatprep.subr.bf16.mxu1 %v2907_v0 }
 0x138   : > { %758 = vrot.lane.b32.xlu1 %v713_v29, %s4082_s17 }
 0x139   : > { %1641 = vrot.lane.b32.xlu0 %v1599_v30, %s4083_s23  ;;  %2724 = vmatpush3.bf16.msra.mxu1 %v2842_v37  ;;  %v1602_v37 = vld [vmem:[#allocation2 + $0x36] sm:$0xff] }
 0x13a   : > { %2725 = vmatprep.subr.bf16.mxu1 %v2907_v0 }
 0x13c   : > { %885 = vrot.lane.b32.xlu1 %v840_v32, %s4085_s16 }
 0x13d   : > { %1010 = vrot.lane.b32.xlu0 %v1599_v30, %s2916_s24  ;;  %2726 = vmatpush3.bf16.msra.mxu1 %v2843_v40  ;;  %v1348_v30 = vld [vmem:[#allocation2 + $0x34] sm:$0xff]  ;;  %v1349_v40 = vld [vmem:[#allocation2 + $0x3c] sm:$0xff] }
 0x13e   : > { %2727 = vmatprep.subr.bf16.mxu1 %v2907_v0 }
 0x140   : > { %786 = vrot.lane.b32.xlu1 %v727_v35, %s4082_s17 }
 0x141   : > { %1137 = vrot.lane.b32.xlu0 %v1093_v36, %s2917_s25 }
 0x144   : > { %913 = vrot.lane.b32.xlu1 %v854_v39, %s4085_s16  ;;  %v3340_v39 = vld [vmem:[#allocation2 + $0xa0] sm:$0xff] }
 0x145   : > { %1264 = vrot.lane.b32.xlu0 %v3152_v33, %s2910_s14  ;;  %v2844_v33 = vld [vmem:[%s4075_s3] sm:$0xff]   ;;  %709 = vst.msk [vmem:[#allocation3 + $0xa0] sm:$0xff] %vm641_vm4, %v3340_v39 }
 0x146   : > { %2728 = vmatpush3.bf16.msra.mxu1 %v2844_v33  ;;  %v1476_v33 = vld [vmem:[#allocation2 + $0x3d] sm:$0xff] }
 0x147   : > { %2420 = vmatprep.subr.mxu1 %v2907_v0 }
 0x148   : > { %1389 = vrot.lane.b32.xlu1 %v1346_v42, %s2913_s21 }
 0x149   : > { %1415 = vrot.lane.b32.xlu0 %v1359_v44, %s2913_s21 }
 0x14c   : > { %1516 = vrot.lane.b32.xlu1 %v1473_v46, %s2914_s22 }
 0x14d   : > { %1542 = vrot.lane.b32.xlu0 %v1486_v49, %s2914_s22 }
 0x150   : > { %1643 = vrot.lane.b32.xlu1 %v1600_v50, %s4083_s23 }
 0x151   : > { %1669 = vrot.lane.b32.xlu0 %v1613_v51, %s4083_s23 }
 0x154   : > { %1012 = vrot.lane.b32.xlu1 %v1600_v50, %s2916_s24  ;;  %v1096_v50 = vld [vmem:[#allocation2 + $0x37] sm:$0xff] }
 0x155   : > { %1038 = vrot.lane.b32.xlu0 %v1613_v51, %s2916_s24  ;;  %v1603_v51 = vld [vmem:[#allocation2 + $0x3e] sm:$0xff] }
 0x158   : > { %1139 = vrot.lane.b32.xlu1 %v1094_v52, %s2917_s25 }
 0x159   : > { %760 = vrot.lane.b32.xlu0 %v714_v54, %s4082_s17 }
 0x15a   : > { %v3288_v55 = vpop.permute.xlu0 %1284 }
 0x15c   : > { %1266 = vrot.lane.b32.xlu1 %v3159_v38, %s2910_s14 }
 0x15d   : > { %887 = vrot.lane.b32.xlu0 %v841_v56, %s4085_s16  ;;  %v605_v56 = vpop.f32.mrf.mxu1 }
 0x15e   : > { %v880_v57 = vpop.permute.xlu1 %879 }
 0x15f   : > { %v753_v58 = vpop.permute.xlu0 %752 }
 0x160   : > { %816 = vst.msk [vmem:[#allocation3] sm:$0xff] %vm815_vm5, %v753_v58  ;;  %1417 = vrot.lane.b32.xlu1 %v1360_v60, %s2913_s21  ;;  %v2714_v60 = vpop.f32.mrf.mxu1 }
 0x161   : > { %1391 = vrot.lane.b32.xlu0 %v1347_v61, %s2913_s21  ;;  %943 = vst.msk [vmem:[#allocation3] sm:$0xff] %vm942_vm6, %v880_v57  ;;  %v606_v57 = vadd.f32 %v3089_v19, %v605_v56 }
 0x162   : > { %v3297_v62 = vpop.permute.xlu1 %1409 }
 0x163   : > { %v781_v38 = vpop.permute.xlu0 %780 }
 0x164   : > { %830 = vst.msk [vmem:[#allocation3 + $0x70] sm:$0xff] %vm815_vm5, %v781_v38  ;;  %1544 = vrot.lane.b32.xlu1 %v1487_v63, %s2914_s22  ;;  %v717_v38 = vld [vmem:[#allocation2 + $0x39] sm:$0xff]  ;;  %v639_v63 = vmax.f32 %v606_v57, 0.0 }
 0x165   : > { %1518 = vrot.lane.b32.xlu0 %v1474_v1, %s2914_s22  ;;  %v1097_v1 = vld [vmem:[#allocation2 + $0x3f] sm:$0xff]  ;;  %v1352_v57 = vld [vmem:[#allocation2 + $0x54] sm:$0xff] }
 0x166   : > { %v3302_v2 = vpop.permute.xlu1 %1536  ;;  %665 = vst.msk [vmem:[#allocation2 + $0xb8] sm:$0xff] %vm641_vm4, %v639_v63 }
 0x167   : > { %v908_v3 = vpop.permute.xlu0 %907 }
 0x168   : > { %957 = vst.msk [vmem:[#allocation3 + $0x70] sm:$0xff] %vm942_vm6, %v908_v3  ;;  %1671 = vrot.lane.b32.xlu1 %v1614_v5, %s4083_s23  ;;  %v610_v3 = vpop.f32.mrf.mxu1 }
 0x169   : > { %1645 = vrot.lane.b32.xlu0 %v1601_v6, %s4083_s23 }
 0x16a   : > { %v3307_v7 = vpop.permute.xlu1 %1663 }
 0x16b   : > { %v755_v8 = vpop.permute.xlu0 %754 }
 0x16c   : > { %817 = vst.msk [vmem:[#allocation3 + $0x8] sm:$0xff] %vm815_vm5, %v755_v8  ;;  %1040 = vrot.lane.b32.xlu1 %v1614_v5, %s2916_s24 }
 0x16d   : > { %1014 = vrot.lane.b32.xlu0 %v1601_v6, %s2916_s24  ;;  %v2717_v6 = vpop.f32.mrf.mxu1 }
 0x16e   : > { %v3313_v11 = vpop.permute.xlu1 %1032 }
 0x16f   : > { %v1007_v14 = vpop.permute.xlu0 %1006  ;;  %v613_v13 = vpop.f32.mrf.mxu1 }
 0x170   : > { %1070 = vst.msk [vmem:[#allocation3] sm:$0xff] %vm1069_vm7, %v1007_v14  ;;  %762 = vrot.lane.b32.xlu1 %v715_v15, %s4082_s17 }
 0x171   : > { %1141 = vrot.lane.b32.xlu0 %v1095_v18, %s2917_s25  ;;  %v2718_v15 = vpop.f32.mrf.mxu1  ;;  %v718_v18 = vld [vmem:[#allocation2 + $0x41] sm:$0xff] }
 0x172   : > { %v3320_v16 = vpop.permute.xlu1 %1159  ;;  %v1100_v15 = vld [vmem:[#allocation2 + $0x57] sm:$0xff] }
 0x173   : > { %v1134_v24 = vpop.permute.xlu0 %1133 }
 0x174   : > { %1197 = vst.msk [vmem:[#allocation3] sm:$0xff] %vm1196_vm8, %v1134_v24  ;;  %889 = vrot.lane.b32.xlu1 %v842_v26, %s4085_s16 }
 0x175   : > { %1268 = vrot.lane.b32.xlu0 %v3167_v45, %s2910_s14  ;;  %v1475_v45 = vld [vmem:[#allocation2 + $0x35] sm:$0xff] }
 0x176   : > { %v3327_v28 = vpop.permute.xlu1 %1286 }
 0x177   : > { %v1261_v29 = vpop.permute.xlu0 %1260 }
 0x178   : > { %1324 = vst.msk [vmem:[#allocation3] sm:$0xff] %vm1323_vm9, %v1261_v29  ;;  %1393 = vrot.lane.b32.xlu1 %v1348_v30, %s2913_s21  ;;  %v1351_v29 = vld [vmem:[#allocation2 + $0x4c] sm:$0xff] }
 0x179   : > { %764 = vrot.lane.b32.xlu0 %v716_v31, %s4082_s17 }
 0x17a   : > { %v882_v32 = vpop.permute.xlu1 %881 }
 0x17b   : > { %944 = vst.msk [vmem:[#allocation3 + $0x8] sm:$0xff] %vm942_vm6, %v882_v32  ;;  %v3333_v34 = vpop.permute.xlu0 %1411  ;;  %v1478_v32 = vld [vmem:[#allocation2 + $0x4d] sm:$0xff] }
 0x17c   : > { %1520 = vrot.lane.b32.xlu1 %v1475_v45, %s2914_s22 }
 0x17d   : > { %891 = vrot.lane.b32.xlu0 %v843_v25, %s4085_s16 }
 0x17e   : > { %v783_v35 = vpop.permute.xlu1 %782 }
 0x17f   : > { %831 = vst.msk [vmem:[#allocation3 + $0x78] sm:$0xff] %vm815_vm5, %v783_v35  ;;  %v3338_v36 = vpop.permute.xlu0 %1538  ;;  %v1098_v35 = vld [vmem:[#allocation2 + $0x47] sm:$0xff] }
 0x180   : > { %1647 = vrot.lane.b32.xlu1 %v1602_v37, %s4083_s23 }
 0x181   : > { %1395 = vrot.lane.b32.xlu0 %v1349_v40, %s2913_s21 }
 0x182   : > { %v910_v42 = vpop.permute.xlu1 %909 }
 0x183   : > { %958 = vst.msk [vmem:[#allocation3 + $0x78] sm:$0xff] %vm942_vm6, %v910_v42  ;;  %v3347_v44 = vpop.permute.xlu0 %1665 }
 0x184   : > { %1016 = vrot.lane.b32.xlu1 %v1602_v37, %s2916_s24  ;;  %v1605_v37 = vld [vmem:[#allocation2 + $0x4e] sm:$0xff] }
 0x185   : > { %1522 = vrot.lane.b32.xlu0 %v1476_v33, %s2914_s22 }
 0x186   : > { %v1009_v46 = vpop.permute.xlu1 %1008 }
 0x187   : > { %v1035_v49 = vpop.permute.xlu0 %1034  ;;  %1071 = vst.msk [vmem:[#allocation3 + $0x8] sm:$0xff] %vm1069_vm7, %v1009_v46 }
 0x188   : > { %1084 = vst.msk [vmem:[#allocation3 + $0x70] sm:$0xff] %vm1069_vm7, %v1035_v49  ;;  %1143 = vrot.lane.b32.xlu1 %v1096_v50, %s2917_s25  ;;  %v719_v49 = vld [vmem:[#allocation2 + $0x49] sm:$0xff] }
 0x189   : > { %1649 = vrot.lane.b32.xlu0 %v1603_v51, %s4083_s23  ;;  %v1099_v50 = vld [vmem:[#allocation2 + $0x4f] sm:$0xff] }
 0x18a   : > { %v1136_v52 = vpop.permute.xlu1 %1135 }
 0x18b   : > { %v1162_v54 = vpop.permute.xlu0 %1161  ;;  %1198 = vst.msk [vmem:[#allocation3 + $0x8] sm:$0xff] %vm1196_vm8, %v1136_v52 }
 0x18c   : > { %1211 = vst.msk [vmem:[#allocation3 + $0x70] sm:$0xff] %vm1196_vm8, %v1162_v54  ;;  %1270 = vrot.lane.b32.xlu1 %v3186_v53, %s2910_s14  ;;  %v611_v53 = vadd.f32 %v3089_v19, %v610_v3  ;;  %v846_v54 = vld [vmem:[#allocation2 + $0x4a] sm:$0xff]  ;;  %v1606_v3 = vld [vmem:[#allocation2 + $0x56] sm:$0xff] }
 0x18d   : > { %1018 = vrot.lane.b32.xlu0 %v1603_v51, %s2916_s24 }
 0x18e   : > { %v1263_v58 = vpop.permute.xlu1 %1262  ;;  %v640_v10 = vmax.f32 %v611_v53, 0.0  ;;  %v1353_v53 = vld [vmem:[#allocation2 + $0x5c] sm:$0xff] }
 0x18f   : > { %v1289_v61 = vpop.permute.xlu0 %1288  ;;  %1325 = vst.msk [vmem:[#allocation3 + $0x8] sm:$0xff] %vm1323_vm9, %v1263_v58  ;;  %v720_v58 = vld [vmem:[#allocation2 + $0x51] sm:$0xff] }
 0x190   : > { %1338 = vst.msk [vmem:[#allocation3 + $0x70] sm:$0xff] %vm1323_vm9, %v1289_v61  ;;  %766 = vrot.lane.b32.xlu1 %v717_v38, %s4082_s17  ;;  %v1479_v38 = vld [vmem:[#allocation2 + $0x55] sm:$0xff] }
 0x191   : > { %1145 = vrot.lane.b32.xlu0 %v1097_v1, %s2917_s25  ;;  %667 = vst.msk [vmem:[#allocation2 + $0xc0] sm:$0x3f] %vm666_vm10, %v640_v10 }
 0x192   : > { %v3367_v5 = vpop.permute.xlu1 %1413 }
 0x193   : > { %v757_v8 = vpop.permute.xlu0 %756 }
 0x194   : > { %818 = vst.msk [vmem:[#allocation3 + $0x10] sm:$0xff] %vm815_vm5, %v757_v8  ;;  %893 = vrot.lane.b32.xlu1 %v844_v9, %s4085_s16  ;;  %v1480_v9 = vld [vmem:[#allocation2 + $0x5d] sm:$0xff] }
 0x195   : > { %1272 = vrot.lane.b32.xlu0 %v3193_v59, %s2910_s14  ;;  %v845_v59 = vld [vmem:[#allocation2 + $0x42] sm:$0xff] }
 0x196   : > { %v3373_v14 = vpop.permute.xlu1 %1540 }
 0x197   : > { %v884_v19 = vpop.permute.xlu0 %883 }
 0x198   : > { %945 = vst.msk [vmem:[#allocation3 + $0x10] sm:$0xff] %vm942_vm6, %v884_v19  ;;  %1397 = vrot.lane.b32.xlu1 %v1350_v17, %s2913_s21  ;;  %v1607_v19 = vld [vmem:[#allocation2 + $0x5e] sm:$0xff] }
 0x199   : > { %768 = vrot.lane.b32.xlu0 %v718_v18, %s4082_s17 }
 0x19a   : > { %v3378_v20 = vpop.permute.xlu1 %1667 }
 0x19b   : > { %v785_v21 = vpop.permute.xlu0 %784 }
 0x19c   : > { %832 = vst.msk [vmem:[#allocation3 + $0x80] sm:$0xff] %vm815_vm5, %v785_v21  ;;  %1524 = vrot.lane.b32.xlu1 %v1477_v12, %s2914_s22 }
 0x19d   : > { %895 = vrot.lane.b32.xlu0 %v845_v59, %s4085_s16 }
 0x19e   : > { %v1037_v24 = vpop.permute.xlu1 %1036 }
 0x19f   : > { %1085 = vst.msk [vmem:[#allocation3 + $0x78] sm:$0xff] %vm1069_vm7, %v1037_v24  ;;  %v912_v26 = vpop.permute.xlu0 %911 }
 0x1a0   : > { %959 = vst.msk [vmem:[#allocation3 + $0x80] sm:$0xff] %vm942_vm6, %v912_v26  ;;  %1651 = vrot.lane.b32.xlu1 %v1604_v27, %s4083_s23 }
 0x1a1   : > { %1399 = vrot.lane.b32.xlu0 %v1351_v29, %s2913_s21  ;;  %v1101_v29 = vld [vmem:[#allocation2 + $0x5f] sm:$0xff] }
 0x1a2   : > { %v1164_v30 = vpop.permute.xlu1 %1163 }
 0x1a3   : > { %1212 = vst.msk [vmem:[#allocation3 + $0x78] sm:$0xff] %vm1196_vm8, %v1164_v30  ;;  %v1388_v31 = vpop.permute.xlu0 %1387 }
 0x1a4   : > { %1451 = vst.msk [vmem:[#allocation3] sm:$0xff] %vm1450_vm11, %v1388_v31  ;;  %1020 = vrot.lane.b32.xlu1 %v1604_v27, %s2916_s24  ;;  %v721_v27 = vld [vmem:[#allocation2 + $0x59] sm:$0xff] }
 0x1a5   : > { %1526 = vrot.lane.b32.xlu0 %v1478_v32, %s2914_s22  ;;  %v848_v31 = vld [vmem:[#allocation2 + $0x5a] sm:$0xff] }
 0x1a6   : > { %v1291_v45 = vpop.permute.xlu1 %1290 }
 0x1a7   : > { %1339 = vst.msk [vmem:[#allocation3 + $0x78] sm:$0xff] %vm1323_vm9, %v1291_v45  ;;  %v1515_v25 = vpop.permute.xlu0 %1514 }
 0x1a8   : > { %1578 = vst.msk [vmem:[#allocation3] sm:$0xff] %vm1577_vm12, %v1515_v25  ;;  %1147 = vrot.lane.b32.xlu1 %v1098_v35, %s2917_s25  ;;  %v1354_v25 = vld [vmem:[#allocation2 + $0x64] sm:$0xff]  ;;  %v1355_v35 = vld [vmem:[#allocation2 + $0x6c] sm:$0xff] }
 0x1a9   : > { %1653 = vrot.lane.b32.xlu0 %v1605_v37, %s4083_s23 }
 0x1aa   : > { %v759_v40 = vpop.permute.xlu1 %758 }
 0x1ab   : > { %v1642_v42 = vpop.permute.xlu0 %1641  ;;  %819 = vst.msk [vmem:[#allocation3 + $0x18] sm:$0xff] %vm815_vm5, %v759_v40 }
 0x1ac   : > { %1705 = vst.msk [vmem:[#allocation3] sm:$0xff] %vm1704_vm13, %v1642_v42  ;;  %1274 = vrot.lane.b32.xlu1 %v3202_v4, %s2910_s14  ;;  %v1481_v42 = vld [vmem:[#allocation2 + $0x65] sm:$0xff] }
 0x1ad   : > { %1022 = vrot.lane.b32.xlu0 %v1605_v37, %s2916_s24 }
 0x1ae   : > { %v886_v33 = vpop.permute.xlu1 %885 }
 0x1af   : > { %v1011_v46 = vpop.permute.xlu0 %1010  ;;  %946 = vst.msk [vmem:[#allocation3 + $0x18] sm:$0xff] %vm942_vm6, %v886_v33 }
 0x1b0   : > { %1072 = vst.msk [vmem:[#allocation3 + $0x10] sm:$0xff] %vm1069_vm7, %v1011_v46  ;;  %770 = vrot.lane.b32.xlu1 %v719_v49, %s4082_s17  ;;  %v1608_v49 = vld [vmem:[#allocation2 + $0x66] sm:$0xff] }
 0x1b1   : > { %1149 = vrot.lane.b32.xlu0 %v1099_v50, %s2917_s25  ;;  %v1609_v50 = vld [vmem:[#allocation2 + $0x6e] sm:$0xff] }
 0x1b2   : > { %v787_v51 = vpop.permute.xlu1 %786 }
 0x1b3   : > { %v1138_v52 = vpop.permute.xlu0 %1137  ;;  %833 = vst.msk [vmem:[#allocation3 + $0x88] sm:$0xff] %vm815_vm5, %v787_v51  ;;  %v1726_v18 = vld [vmem:[#allocation3] sm:$0xff] }
 0x1b4   : > { %1199 = vst.msk [vmem:[#allocation3 + $0x10] sm:$0xff] %vm1196_vm8, %v1138_v52  ;;  %897 = vrot.lane.b32.xlu1 %v846_v54, %s4085_s16  ;;  %v722_v54 = vld [vmem:[#allocation2 + $0x61] sm:$0xff] }
 0x1b5   : > { %1276 = vrot.lane.b32.xlu0 %v3223_v22, %s2910_s14  ;;  %v847_v22 = vld [vmem:[#allocation2 + $0x52] sm:$0xff] }
 0x1b6   : > { %v914_v4 = vpop.permute.xlu1 %913 }
 0x1b7   : > { %v1265_v56 = vpop.permute.xlu0 %1264  ;;  %960 = vst.msk [vmem:[#allocation3 + $0x88] sm:$0xff] %vm942_vm6, %v914_v4 }
 0x1b8   : > { %1326 = vst.msk [vmem:[#allocation3 + $0x10] sm:$0xff] %vm1323_vm9, %v1265_v56  ;;  %1401 = vrot.lane.b32.xlu1 %v1352_v57, %s2913_s21  ;;  %v1102_v57 = vld [vmem:[#allocation2 + $0x67] sm:$0xff] }
 0x1b9   : > { %772 = vrot.lane.b32.xlu0 %v720_v58, %s4082_s17  ;;  %v849_v58 = vld [vmem:[#allocation2 + $0x62] sm:$0xff] }
 0x1ba   : > { %v1390_v60 = vpop.permute.xlu1 %1389 }
 0x1bb   : > { %v1416_v61 = vpop.permute.xlu0 %1415  ;;  %1452 = vst.msk [vmem:[#allocation3 + $0x8] sm:$0xff] %vm1450_vm11, %v1390_v60 }
 0x1bc   : > { %1465 = vst.msk [vmem:[#allocation3 + $0x70] sm:$0xff] %vm1450_vm11, %v1416_v61  ;;  %1528 = vrot.lane.b32.xlu1 %v1479_v38, %s2914_s22 }
 0x1bd   : > { %899 = vrot.lane.b32.xlu0 %v847_v22, %s4085_s16 }
 0x1be   : > { %v1517_v63 = vpop.permute.xlu1 %1516 }
 0x1bf   : > { %v1543_v1 = vpop.permute.xlu0 %1542  ;;  %1579 = vst.msk [vmem:[#allocation3 + $0x8] sm:$0xff] %vm1577_vm12, %v1517_v63  ;;  %v723_v63 = vld [vmem:[#allocation2 + $0x69] sm:$0xff] }
 0x1c0   : > { %1592 = vst.msk [vmem:[#allocation3 + $0x70] sm:$0xff] %vm1577_vm12, %v1543_v1  ;;  %1655 = vrot.lane.b32.xlu1 %v1606_v3, %s4083_s23  ;;  %v1103_v1 = vld [vmem:[#allocation2 + $0x6f] sm:$0xff] }
 0x1c1   : > { %1403 = vrot.lane.b32.xlu0 %v1353_v53, %s2913_s21 }
 0x1c2   : > { %v1644_v6 = vpop.permute.xlu1 %1643 }
 0x1c3   : > { %v1670_v8 = vpop.permute.xlu0 %1669  ;;  %1706 = vst.msk [vmem:[#allocation3 + $0x8] sm:$0xff] %vm1704_vm13, %v1644_v6  ;;  %v850_v6 = vld [vmem:[#allocation2 + $0x6a] sm:$0xff] }
 0x1c4   : > { %1719 = vst.msk [vmem:[#allocation3 + $0x70] sm:$0xff] %vm1704_vm13, %v1670_v8  ;;  %1024 = vrot.lane.b32.xlu1 %v1606_v3, %s2916_s24 }
 0x1c5   : > { %1530 = vrot.lane.b32.xlu0 %v1480_v9, %s2914_s22 }
 0x1c6   : > { %v1013_v10 = vpop.permute.xlu1 %1012 }
 0x1c7   : > { %v1039_v13 = vpop.permute.xlu0 %1038  ;;  %1073 = vst.msk [vmem:[#allocation3 + $0x18] sm:$0xff] %vm1069_vm7, %v1013_v10  ;;  %v1108_v10 = vld [vmem:[#allocation2 + $0x97] sm:$0xff] }
 0x1c8   : > { %1086 = vst.msk [vmem:[#allocation3 + $0x80] sm:$0xff] %vm1069_vm7, %v1039_v13  ;;  %1151 = vrot.lane.b32.xlu1 %v1100_v15, %s2917_s25 }
 0x1c9   : > { %1657 = vrot.lane.b32.xlu0 %v1607_v19, %s4083_s23 }
 0x1ca   : > { %v1140_v17 = vpop.permute.xlu1 %1139  ;;  %v1727_v21 = vld [vmem:[#allocation3 + $0x8] sm:$0xff] }
 0x1cb   : > { %1200 = vst.msk [vmem:[#allocation3 + $0x18] sm:$0xff] %vm1196_vm8, %v1140_v17  ;;  %v761_v12 = vpop.permute.xlu0 %760  ;;  %v1747_v59 = vpack.c.bf16 %v1727_v21, %v1726_v18  ;;  %v1361_v21 = vld [vmem:[#allocation2 + $0x9c] sm:$0xff] }
 0x1cc   : > { %820 = vst.msk [vmem:[#allocation3 + $0x20] sm:$0xff] %vm815_vm5, %v761_v12  ;;  %1278 = vrot.lane.b32.xlu1 %v3228_v23, %s2910_s14 }
 0x1cd   : > { %1026 = vrot.lane.b32.xlu0 %v1607_v19, %s2916_s24  ;;  %2730 = vmatmul.mubr.msk.bf16.vlgmr.msra.gmra.mxu1 %vm1801_vm14, %v1747_v59  ;;  %v1362_v59 = vld [vmem:[#allocation2 + $0xa4] sm:$0xff] }
 0x1ce   : > { %v1267_v24 = vpop.permute.xlu1 %1266  ;;  %2733 = vmatprep.mubr.msk.bf16.mxu1 %vm2909_vm2, %v2907_v0 }
 0x1cf   : > { %1327 = vst.msk [vmem:[#allocation3 + $0x18] sm:$0xff] %vm1323_vm9, %v1267_v24  ;;  %v888_v26 = vpop.permute.xlu0 %887  ;;  %v1488_v24 = vld [vmem:[#allocation2 + $0x9d] sm:$0xff] }
 0x1d0   : > { %947 = vst.msk [vmem:[#allocation3 + $0x20] sm:$0xff] %vm942_vm6, %v888_v26  ;;  %774 = vrot.lane.b32.xlu1 %v721_v27, %s4082_s17  ;;  %v1489_v27 = vld [vmem:[#allocation2 + $0xa5] sm:$0xff] }
 0x1d1   : > { %1153 = vrot.lane.b32.xlu0 %v1101_v29, %s2917_s25  ;;  %v1615_v29 = vld [vmem:[#allocation2 + $0x9e] sm:$0xff] }
 0x1d2   : > { %v1418_v23 = vpop.permute.xlu1 %1417 }
 0x1d3   : > { %1466 = vst.msk [vmem:[#allocation3 + $0x78] sm:$0xff] %vm1450_vm11, %v1418_v23  ;;  %v1392_v30 = vpop.permute.xlu0 %1391 }
 0x1d4   : > { %1453 = vst.msk [vmem:[#allocation3 + $0x10] sm:$0xff] %vm1450_vm11, %v1392_v30  ;;  %901 = vrot.lane.b32.xlu1 %v848_v31, %s4085_s16  ;;  %v1616_v31 = vld [vmem:[#allocation2 + $0xa6] sm:$0xff] }
 0x1d5   : > { %1280 = vrot.lane.b32.xlu0 %v3265_v41, %s2910_s14  ;;  %v1482_v41 = vld [vmem:[#allocation2 + $0x6d] sm:$0xff] }
 0x1d6   : > { %v1545_v32 = vpop.permute.xlu1 %1544 }
 0x1d7   : > { %1593 = vst.msk [vmem:[#allocation3 + $0x78] sm:$0xff] %vm1577_vm12, %v1545_v32  ;;  %v1519_v45 = vpop.permute.xlu0 %1518  ;;  %v728_v32 = vld [vmem:[#allocation2 + $0x91] sm:$0xff] }
 0x1d8   : > { %1580 = vst.msk [vmem:[#allocation3 + $0x10] sm:$0xff] %vm1577_vm12, %v1519_v45  ;;  %1405 = vrot.lane.b32.xlu1 %v1354_v25, %s2913_s21 }
 0x1d9   : > { %1407 = vrot.lane.b32.xlu0 %v1355_v35, %s2913_s21  ;;  %v729_v35 = vld [vmem:[#allocation2 + $0x99] sm:$0xff] }
 0x1da   : > { %v1672_v37 = vpop.permute.xlu1 %1671 }
 0x1db   : > { %1720 = vst.msk [vmem:[#allocation3 + $0x78] sm:$0xff] %vm1704_vm13, %v1672_v37  ;;  %v1646_v40 = vpop.permute.xlu0 %1645  ;;  %v855_v37 = vld [vmem:[#allocation2 + $0x92] sm:$0xff] }
 0x1dc   : > { %1707 = vst.msk [vmem:[#allocation3 + $0x10] sm:$0xff] %vm1704_vm13, %v1646_v40  ;;  %1532 = vrot.lane.b32.xlu1 %v1481_v42, %s2914_s22 }
 0x1dd   : > { %1534 = vrot.lane.b32.xlu0 %v1482_v41, %s2914_s22  ;;  %v856_v41 = vld [vmem:[#allocation2 + $0x9a] sm:$0xff] }
 0x1de   : > { %v1041_v33 = vpop.permute.xlu1 %1040 }
 0x1df   : > { %1087 = vst.msk [vmem:[#allocation3 + $0x88] sm:$0xff] %vm1069_vm7, %v1041_v33  ;;  %v1015_v46 = vpop.permute.xlu0 %1014  ;;  %v1982_v33 = vld [vmem:[%s4077_s5 + $0x18] sm:$0xff] }
 0x1e0   : > { %1074 = vst.msk [vmem:[#allocation3 + $0x20] sm:$0xff] %vm1069_vm7, %v1015_v46  ;;  %1659 = vrot.lane.b32.xlu1 %v1608_v49, %s4083_s23  ;;  %v1981_v46 = vld [vmem:[%s4077_s5 + $0x10] sm:$0xff]  ;;  %2075 = vmatprep.subr.mxu0 %v1982_v33 }
 0x1e1   : > { %1661 = vrot.lane.b32.xlu0 %v1609_v50, %s4083_s23  ;;  %2076 = vmatpush1.msra.mxu0 %v1981_v46 }
 0x1e2   : > { %v763_v51 = vpop.permute.xlu1 %762 }
 0x1e3   : > { %v1142_v52 = vpop.permute.xlu0 %1141  ;;  %821 = vst.msk [vmem:[#allocation3 + $0x28] sm:$0xff] %vm815_vm5, %v763_v51  ;;  %v1728_v15 = vld [vmem:[#allocation3 + $0x10] sm:$0xff] }
 0x1e4   : > { %1201 = vst.msk [vmem:[#allocation3 + $0x20] sm:$0xff] %vm1196_vm8, %v1142_v52  ;;  %1028 = vrot.lane.b32.xlu1 %v1608_v49, %s2916_s24  ;;  %v1980_v49 = vld [vmem:[%s4077_s5 + $0x8] sm:$0xff]  ;;  %v1979_v52 = vld [vmem:[%s4077_s5] sm:$0xff] }
 0x1e5   : > { %776 = vrot.lane.b32.xlu0 %v722_v54, %s4082_s17  ;;  %2077 = vmatprep.subr.mxu0 %v1980_v49  ;;  %v1109_v54 = vld [vmem:[#allocation2 + $0x9f] sm:$0xff] }
 0x1e6   : > { %v890_v4 = vpop.permute.xlu1 %889  ;;  %2078 = vmatpush1.msra.mxu0 %v1979_v52 }
 0x1e7   : > { %v1269_v56 = vpop.permute.xlu0 %1268  ;;  %948 = vst.msk [vmem:[#allocation3 + $0x28] sm:$0xff] %vm942_vm6, %v890_v4 }
 0x1e8   : > { %1328 = vst.msk [vmem:[#allocation3 + $0x20] sm:$0xff] %vm1323_vm9, %v1269_v56  ;;  %1155 = vrot.lane.b32.xlu1 %v1102_v57, %s2917_s25  ;;  %v1110_v57 = vld [vmem:[#allocation2 + $0xa7] sm:$0xff] }
 0x1e9   : > { %903 = vrot.lane.b32.xlu0 %v849_v58, %s4085_s16 }
 0x1ea   : > { %v1394_v60 = vpop.permute.xlu1 %1393 }
 0x1eb   : > { %1454 = vst.msk [vmem:[#allocation3 + $0x18] sm:$0xff] %vm1450_vm11, %v1394_v60  ;;  %v765_v61 = vpop.permute.xlu0 %764 }
 0x1ec   : > { %822 = vst.msk [vmem:[#allocation3 + $0x30] sm:$0xff] %vm815_vm5, %v765_v61  ;;  %1282 = vrot.lane.b32.xlu1 %v3269_v43, %s2910_s14  ;;  %v1107_v43 = vld [vmem:[#allocation2 + $0x8f] sm:$0xff] }
 0x1ed   : > { %1030 = vrot.lane.b32.xlu0 %v1609_v50, %s2916_s24 }
 0x1ee   : > { %v1521_v38 = vpop.permute.xlu1 %1520 }
 0x1ef   : > { %1581 = vst.msk [vmem:[#allocation3 + $0x18] sm:$0xff] %vm1577_vm12, %v1521_v38  ;;  %v892_v22 = vpop.permute.xlu0 %891 }
 0x1f0   : > { %949 = vst.msk [vmem:[#allocation3 + $0x30] sm:$0xff] %vm942_vm6, %v892_v22  ;;  %778 = vrot.lane.b32.xlu1 %v723_v63, %s4082_s17  ;;  %v1237_v22 = vld [vmem:[#allocation2 + $0xa8] sm:$0xff] }
 0x1f1   : > { %1157 = vrot.lane.b32.xlu0 %v1103_v1, %s2917_s25  ;;  %v1363_v1 = vld [vmem:[#allocation2 + $0xac] sm:$0xff] }
 0x1f2   : > { %v1648_v3 = vpop.permute.xlu1 %1647 }
 0x1f3   : > { %1708 = vst.msk [vmem:[#allocation3 + $0x18] sm:$0xff] %vm1704_vm13, %v1648_v3  ;;  %v1396_v53 = vpop.permute.xlu0 %1395 }
 0x1f4   : > { %1455 = vst.msk [vmem:[#allocation3 + $0x20] sm:$0xff] %vm1450_vm11, %v1396_v53  ;;  %905 = vrot.lane.b32.xlu1 %v850_v6, %s4085_s16  ;;  %v1364_v53 = vld [vmem:[#allocation2 + $0xb4] sm:$0xff] }
 0x1f5   : > { %1165 = vrot.lane.b32.xlu0 %v1107_v43, %s2917_s25  ;;  %v1490_v6 = vld [vmem:[#allocation2 + $0xad] sm:$0xff] }
 0x1f6   : > { %v1017_v8 = vpop.permute.xlu1 %1016 }
 0x1f7   : > { %1075 = vst.msk [vmem:[#allocation3 + $0x28] sm:$0xff] %vm1069_vm7, %v1017_v8  ;;  %v1523_v9 = vpop.permute.xlu0 %1522 }
 0x1f8   : > { %1582 = vst.msk [vmem:[#allocation3 + $0x20] sm:$0xff] %vm1577_vm12, %v1523_v9  ;;  %1167 = vrot.lane.b32.xlu1 %v1108_v10, %s2917_s25  ;;  %v1491_v9 = vld [vmem:[#allocation2 + $0xb5] sm:$0xff] }
 0x1f9   : > { %1292 = vrot.lane.b32.xlu0 %v3172_v47, %s2910_s14  ;;  %v1617_v10 = vld [vmem:[#allocation2 + $0xae] sm:$0xff] }
 0x1fa   : > { %v1144_v13 = vpop.permute.xlu1 %1143  ;;  %v1729_v19 = vld [vmem:[#allocation3 + $0x18] sm:$0xff] }
 0x1fb   : > { %1202 = vst.msk [vmem:[#allocation3 + $0x28] sm:$0xff] %vm1196_vm8, %v1144_v13  ;;  %v1650_v17 = vpop.permute.xlu0 %1649  ;;  %v1748_v18 = vpack.c.bf16 %v1729_v19, %v1728_v15  ;;  %v1618_v19 = vld [vmem:[#allocation2 + $0xb6] sm:$0xff] }
 0x1fc   : > { %1709 = vst.msk [vmem:[#allocation3 + $0x20] sm:$0xff] %vm1704_vm13, %v1650_v17  ;;  %1294 = vrot.lane.b32.xlu1 %v3174_v48, %s2910_s14  ;;  %v730_v17 = vld [vmem:[#allocation2 + $0xa1] sm:$0xff] }
 0x1fd   : > { %1419 = vrot.lane.b32.xlu0 %v1361_v21, %s2913_s21  ;;  %2734 = vmatmul.mubr.msk.bf16.gmra.mxu1 %vm1801_vm14, %v1748_v18 }
 0x1fe   : > { %v1271_v12 = vpop.permute.xlu1 %1270  ;;  %2737 = vmatprep.mubr.msk.bf16.mxu1 %vm2909_vm2, %v2907_v0 }
 0x1ff   : > { %1329 = vst.msk [vmem:[#allocation3 + $0x28] sm:$0xff] %vm1323_vm9, %v1271_v12  ;;  %v1019_v47 = vpop.permute.xlu0 %1018  ;;  %v857_v12 = vld [vmem:[#allocation2 + $0xa2] sm:$0xff] }
 0x200   : > { %1076 = vst.msk [vmem:[#allocation3 + $0x30] sm:$0xff] %vm1069_vm7, %v1019_v47  ;;  %1421 = vrot.lane.b32.xlu1 %v1362_v59, %s2913_s21 }
 0x201   : > { %1546 = vrot.lane.b32.xlu0 %v1488_v24, %s2914_s22  ;;  %v1111_v24 = vld [vmem:[#allocation2 + $0xaf] sm:$0xff] }
 0x202   : > { %v767_v48 = vpop.permute.xlu1 %766 }
 0x203   : > { %v1146_v26 = vpop.permute.xlu0 %1145  ;;  %823 = vst.msk [vmem:[#allocation3 + $0x38] sm:$0xff] %vm815_vm5, %v767_v48  ;;  %v1730_v60 = vld [vmem:[#allocation3 + $0x20] sm:$0xff]  ;;  %v1238_v48 = vld [vmem:[#allocation2 + $0xb0] sm:$0xff] }
 0x204   : > { %1203 = vst.msk [vmem:[#allocation3 + $0x30] sm:$0xff] %vm1196_vm8, %v1146_v26  ;;  %1548 = vrot.lane.b32.xlu1 %v1489_v27, %s2914_s22 }
 0x205   : > { %1673 = vrot.lane.b32.xlu0 %v1615_v29, %s4083_s23 }
 0x206   : > { %v894_v23 = vpop.permute.xlu1 %893 }
 0x207   : > { %v1273_v30 = vpop.permute.xlu0 %1272  ;;  %950 = vst.msk [vmem:[#allocation3 + $0x38] sm:$0xff] %vm942_vm6, %v894_v23  ;;  %v1492_v23 = vld [vmem:[#allocation2 + $0xbd] sm:$0xff] }
 0x208   : > { %1330 = vst.msk [vmem:[#allocation3 + $0x30] sm:$0xff] %vm1323_vm9, %v1273_v30  ;;  %1675 = vrot.lane.b32.xlu1 %v1616_v31, %s4083_s23  ;;  %s4090_s23 = smov 16  }
 0x209   : > { %788 = vrot.lane.b32.xlu0 %v728_v32, %s4082_s17  ;;  %v1619_v32 = vld [vmem:[#allocation2 + $0xbe] sm:$0xff] }
 0x20a   : > { %v1398_v45 = vpop.permute.xlu1 %1397 }
 0x20b   : > { %1456 = vst.msk [vmem:[#allocation3 + $0x28] sm:$0xff] %vm1450_vm11, %v1398_v45  ;;  %v769_v25 = vpop.permute.xlu0 %768 }
 0x20c   : > { %824 = vst.msk [vmem:[#allocation3 + $0x40] sm:$0xff] %vm815_vm5, %v769_v25  ;;  %790 = vrot.lane.b32.xlu1 %v729_v35, %s4082_s17  ;;  %s4089_s17 = smov 8  }
 0x20d   : > { %915 = vrot.lane.b32.xlu0 %v855_v37, %s4085_s16 }
 0x20e   : > { %v1525_v40 = vpop.permute.xlu1 %1524 }
 0x20f   : > { %1583 = vst.msk [vmem:[#allocation3 + $0x28] sm:$0xff] %vm1577_vm12, %v1525_v40  ;;  %v896_v42 = vpop.permute.xlu0 %895 }
 0x210   : > { %951 = vst.msk [vmem:[#allocation3 + $0x40] sm:$0xff] %vm942_vm6, %v896_v42  ;;  %917 = vrot.lane.b32.xlu1 %v856_v41, %s4085_s16  ;;  %s4088_s16 = smov 64  }
 0x211   : > { %1042 = vrot.lane.b32.xlu0 %v1615_v29, %s2916_s24  ;;  %v1365_v29 = vld [vmem:[#allocation2 + $0xbc] sm:$0xff] }
 0x212   : > { %v1652_v50 = vpop.permute.xlu1 %1651 }
 0x213   : > { %1710 = vst.msk [vmem:[#allocation3 + $0x28] sm:$0xff] %vm1704_vm13, %v1652_v50  ;;  %v1400_v51 = vpop.permute.xlu0 %1399 }
 0x214   : > { %1457 = vst.msk [vmem:[#allocation3 + $0x30] sm:$0xff] %vm1450_vm11, %v1400_v51  ;;  %1044 = vrot.lane.b32.xlu1 %v1616_v31, %s2916_s24 }
 0x215   : > { %1169 = vrot.lane.b32.xlu0 %v1109_v54, %s2917_s25 }
 0x216   : > { %v1021_v4 = vpop.permute.xlu1 %1020 }
 0x217   : > { %1077 = vst.msk [vmem:[#allocation3 + $0x38] sm:$0xff] %vm1069_vm7, %v1021_v4  ;;  %v1527_v56 = vpop.permute.xlu0 %1526 }
 0x218   : > { %1584 = vst.msk [vmem:[#allocation3 + $0x30] sm:$0xff] %vm1577_vm12, %v1527_v56  ;;  %1171 = vrot.lane.b32.xlu1 %v1110_v57, %s2917_s25 }
 0x219   : > { %1296 = vrot.lane.b32.xlu0 %v3340_v39, %s2910_s14 }
 0x21a   : > { %v1148_v58 = vpop.permute.xlu1 %1147  ;;  %v1731_v61 = vld [vmem:[#allocation3 + $0x28] sm:$0xff] }
 0x21b   : > { %1204 = vst.msk [vmem:[#allocation3 + $0x38] sm:$0xff] %vm1196_vm8, %v1148_v58  ;;  %v1654_v38 = vpop.permute.xlu0 %1653  ;;  %v1749_v63 = vpack.c.bf16 %v1731_v61, %v1730_v60 }
 0x21c   : > { %1711 = vst.msk [vmem:[#allocation3 + $0x30] sm:$0xff] %vm1704_vm13, %v1654_v38  ;;  %1298 = vrot.lane.b32.xlu1 %v1237_v22, %s2910_s14 }
 0x21d   : > { %1423 = vrot.lane.b32.xlu0 %v1363_v1, %s2913_s21  ;;  %2738 = vmatmul.mubr.msk.bf16.gmra.mxu1 %vm1801_vm14, %v1749_v63 }
 0x21e   : > { %v1275_v3 = vpop.permute.xlu1 %1274  ;;  %2741 = vmatprep.mubr.msk.bf16.mxu1 %vm2909_vm2, %v2907_v0 }
 0x21f   : > { %1331 = vst.msk [vmem:[#allocation3 + $0x38] sm:$0xff] %vm1323_vm9, %v1275_v3  ;;  %v1023_v39 = vpop.permute.xlu0 %1022 }
 0x220   : > { %1078 = vst.msk [vmem:[#allocation3 + $0x40] sm:$0xff] %vm1069_vm7, %v1023_v39  ;;  %1425 = vrot.lane.b32.xlu1 %v1364_v53, %s2913_s21 }
 0x221   : > { %1550 = vrot.lane.b32.xlu0 %v1490_v6, %s2914_s22 }
 0x222   : > { %v771_v43 = vpop.permute.xlu1 %770 }
 0x223   : > { %v1150_v8 = vpop.permute.xlu0 %1149  ;;  %825 = vst.msk [vmem:[#allocation3 + $0x48] sm:$0xff] %vm815_vm5, %v771_v43  ;;  %v1732_v25 = vld [vmem:[#allocation3 + $0x30] sm:$0xff] }
 0x224   : > { %1205 = vst.msk [vmem:[#allocation3 + $0x40] sm:$0xff] %vm1196_vm8, %v1150_v8  ;;  %1552 = vrot.lane.b32.xlu1 %v1491_v9, %s2914_s22 }
 0x225   : > { %1677 = vrot.lane.b32.xlu0 %v1617_v10, %s4088_s16 }
 0x226   : > { %v898_v13 = vpop.permute.xlu1 %897 }
 0x227   : > { %v1277_v15 = vpop.permute.xlu0 %1276  ;;  %952 = vst.msk [vmem:[#allocation3 + $0x48] sm:$0xff] %vm942_vm6, %v898_v13  ;;  %v1741_v13 = vld [vmem:[#allocation3 + $0x78] sm:$0xff] }
 0x228   : > { %1332 = vst.msk [vmem:[#allocation3 + $0x40] sm:$0xff] %vm1323_vm9, %v1277_v15  ;;  %1679 = vrot.lane.b32.xlu1 %v1618_v19, %s4088_s16  ;;  %v1740_v19 = vld [vmem:[#allocation3 + $0x70] sm:$0xff] }
 0x229   : > { %792 = vrot.lane.b32.xlu0 %v730_v17, %s4089_s17  ;;  %v1754_v17 = vpack.c.bf16 %v1741_v13, %v1740_v19  ;;  %s324_s17 = scalar_lea.vmem [#allocation4], %s323_s26 }
 0x22a   : > { %v1402_v18 = vpop.permute.xlu1 %1401 }
 0x22b   : > { %1458 = vst.msk [vmem:[#allocation3 + $0x38] sm:$0xff] %vm1450_vm11, %v1402_v18  ;;  %v773_v21 = vpop.permute.xlu0 %772 }
 0x22c   : > { %826 = vst.msk [vmem:[#allocation3 + $0x50] sm:$0xff] %vm815_vm5, %v773_v21  ;;  %919 = vrot.lane.b32.xlu1 %v857_v12, %s4090_s23  ;;  %s2505_s23 = sshll.u32 %s324_s17, 4  ;;  %s2506_s23 = int_to_ptr.vmem [resolvable:$true] %s2505_s23 }
 0x22d   : > { %1046 = vrot.lane.b32.xlu0 %v1617_v10, %s2916_s24  ;;  %s2493_s24 = scalar_lea.sflag [#allocation5], %s323_s26 }
 0x22e   : > { %v1529_v47 = vpop.permute.xlu1 %1528 }
 0x22f   : > { %1585 = vst.msk [vmem:[#allocation3 + $0x38] sm:$0xff] %vm1577_vm12, %v1529_v47  ;;  %v900_v59 = vpop.permute.xlu0 %899 }
 0x230   : > { %953 = vst.msk [vmem:[#allocation3 + $0x50] sm:$0xff] %vm942_vm6, %v900_v59  ;;  %1173 = vrot.lane.b32.xlu1 %v1111_v24, %s2917_s25  ;;  %s2845_s25 = scalar_lea.vmem %s2506_s23, 16 }
 0x231   : > { %1300 = vrot.lane.b32.xlu0 %v1238_v48, %s2910_s14  ;;  %p2846_p11 = scmp.ne.s32.totalorder %s2506_s23, %s2845_s25 }
 0x232   : > { %v1656_v26 = vpop.permute.xlu1 %1655 }
 0x233   : > { %1712 = vst.msk [vmem:[#allocation3 + $0x38] sm:$0xff] %vm1704_vm13, %v1656_v26  ;;  %v1404_v27 = vpop.permute.xlu0 %1403  ;;  %p2847_p12 = pnand %p2846_p11, %p3007_p5 }
 0x234   : > { %1459 = vst.msk [vmem:[#allocation3 + $0x40] sm:$0xff] %vm1450_vm11, %v1404_v27  ;;  %1427 = vrot.lane.b32.xlu1 %v1365_v29, %s2913_s21 }
 0x235   : > { %1554 = vrot.lane.b32.xlu0 %v1492_v23, %s2914_s22  ;;  %p2848_p13 = pneg %p2847_p12 }
 0x236   : > { %v1025_v30 = vpop.permute.xlu1 %1024 }
 0x237   : > { %1079 = vst.msk [vmem:[#allocation3 + $0x48] sm:$0xff] %vm1069_vm7, %v1025_v30  ;;  %v1531_v31 = vpop.permute.xlu0 %1530  ;;  %v3655_v30 = vld [vmem:[%s4076_s4] ss:$0 sm:$0xff] }
 0x238   : > { %1586 = vst.msk [vmem:[#allocation3 + $0x40] sm:$0xff] %vm1577_vm12, %v1531_v31  ;;  %1681 = vrot.lane.b32.xlu1 %v1619_v32, %s4088_s16  ;;  %s2632_s16 = sshll.u32 %s2990_s13, 4  ;;  %s2918_s13 = smov [#allocation4]  }
 0x239   : > { %s4037_s22 = scalar_lea.hbm %s4081_s9, %s2632_s16  ;;  %s2849_s29 = sshll.u32 %s2918_s13, 4  ;;  %s2850_s29 = int_to_ptr.vmem [resolvable:$false] %s2849_s29 }
 0x23a   : > { %v1152_v45 = vpop.permute.xlu1 %1151  ;;  %v1733_v35 = vld [vmem:[#allocation3 + $0x38] sm:$0xff]  ;;  %s2851_s27 = scalar_lea.vmem %s2850_s29, 32  ;;  %p2852_p0 = scmp.lt.s32.totalorder %s2506_s23, %s2850_s29 }
 0x23b   : > { %1206 = vst.msk [vmem:[#allocation3 + $0x48] sm:$0xff] %vm1196_vm8, %v1152_v45  ;;  %v1658_v37 = vpop.permute.xlu0 %1657  ;;  %v1750_v40 = vpack.c.bf16 %v1733_v35, %v1732_v25  ;;  %p2853_p1 = scmp.lt.s32.totalorder %s2851_s27, %s2845_s25 }
 0x23c   : > { %1713 = vst.msk [vmem:[#allocation3 + $0x40] sm:$0xff] %vm1704_vm13, %v1658_v37 }
 0x23d   : > { %2742 = vmatmul.mubr.msk.bf16.gmra.mxu1 %vm1801_vm14, %v1750_v40  ;;  %p2854_p2 = por %p2853_p1, %p2852_p0 }
 0x23e   : > { %v1279_v42 = vpop.permute.xlu1 %1278  ;;  %2745 = vmatprep.mubr.msk.bf16.mxu1 %vm2909_vm2, %v2907_v0 }
 0x23f   : > { %1333 = vst.msk [vmem:[#allocation3 + $0x48] sm:$0xff] %vm1323_vm9, %v1279_v42  ;;  %v1027_v41 = vpop.permute.xlu0 %1026  ;;  %p2855_p3 = pnand %p2854_p2, %p2848_p13 }
 0x240   : > { %1080 = vst.msk [vmem:[#allocation3 + $0x50] sm:$0xff] %vm1069_vm7, %v1027_v41 }
 0x242   : > { %v775_v33 = vpop.permute.xlu1 %774 }
 0x243   : > { %v1154_v46 = vpop.permute.xlu0 %1153  ;;  %827 = vst.msk [vmem:[#allocation3 + $0x58] sm:$0xff] %vm815_vm5, %v775_v33  ;;  %v1734_v38 = vld [vmem:[#allocation3 + $0x40] sm:$0xff] }
 0x244   : > { %1207 = vst.msk [vmem:[#allocation3 + $0x50] sm:$0xff] %vm1196_vm8, %v1154_v46 }
 0x246   : > { %v902_v49 = vpop.permute.xlu1 %901 }
 0x247   : > { %v1281_v50 = vpop.permute.xlu0 %1280  ;;  %954 = vst.msk [vmem:[#allocation3 + $0x58] sm:$0xff] %vm942_vm6, %v902_v49 }
 0x248   : > { %1334 = vst.msk [vmem:[#allocation3 + $0x50] sm:$0xff] %vm1323_vm9, %v1281_v50 }
 0x24a   : > { %v1406_v51 = vpop.permute.xlu1 %1405 }
 0x24b   : > { %v1408_v52 = vpop.permute.xlu0 %1407  ;;  %1460 = vst.msk [vmem:[#allocation3 + $0x48] sm:$0xff] %vm1450_vm11, %v1406_v51 }
 0x24c   : > { %1461 = vst.msk [vmem:[#allocation3 + $0x50] sm:$0xff] %vm1450_vm11, %v1408_v52 }
 0x24e   : > { %v1533_v54 = vpop.permute.xlu1 %1532 }
 0x24f   : > { %v1535_v4 = vpop.permute.xlu0 %1534  ;;  %1587 = vst.msk [vmem:[#allocation3 + $0x48] sm:$0xff] %vm1577_vm12, %v1533_v54 }
 0x250   : > { %1588 = vst.msk [vmem:[#allocation3 + $0x50] sm:$0xff] %vm1577_vm12, %v1535_v4 }
 0x252   : > { %v1660_v56 = vpop.permute.xlu1 %1659 }
 0x253   : > { %v1662_v57 = vpop.permute.xlu0 %1661  ;;  %1714 = vst.msk [vmem:[#allocation3 + $0x48] sm:$0xff] %vm1704_vm13, %v1660_v56 }
 0x254   : > { %1715 = vst.msk [vmem:[#allocation3 + $0x50] sm:$0xff] %vm1704_vm13, %v1662_v57 }
 0x256   : > { %v1029_v58 = vpop.permute.xlu1 %1028 }
 0x257   : > { %1081 = vst.msk [vmem:[#allocation3 + $0x58] sm:$0xff] %vm1069_vm7, %v1029_v58  ;;  %v777_v60 = vpop.permute.xlu0 %776 }
 0x258   : > { %828 = vst.msk [vmem:[#allocation3 + $0x60] sm:$0xff] %vm815_vm5, %v777_v60 }
 0x25a   : > { %v1156_v61 = vpop.permute.xlu1 %1155  ;;  %v1735_v22 = vld [vmem:[#allocation3 + $0x48] sm:$0xff] }
 0x25b   : > { %1208 = vst.msk [vmem:[#allocation3 + $0x58] sm:$0xff] %vm1196_vm8, %v1156_v61  ;;  %v904_v63 = vpop.permute.xlu0 %903  ;;  %v1751_v1 = vpack.c.bf16 %v1735_v22, %v1734_v38 }
 0x25c   : > { %955 = vst.msk [vmem:[#allocation3 + $0x60] sm:$0xff] %vm942_vm6, %v904_v63 }
 0x25d   : > { %2746 = vmatmul.mubr.msk.bf16.gmra.mxu1 %vm1801_vm14, %v1751_v1 }
 0x25e   : > { %v1283_v3 = vpop.permute.xlu1 %1282  ;;  %2749 = vmatprep.mubr.msk.bf16.mxu1 %vm2909_vm2, %v2907_v0 }
 0x25f   : > { %1335 = vst.msk [vmem:[#allocation3 + $0x58] sm:$0xff] %vm1323_vm9, %v1283_v3  ;;  %v1031_v39 = vpop.permute.xlu0 %1030 }
 0x260   : > { %1462 = vst.msk [vmem:[#allocation3 + $0x58] sm:$0xff] %vm1450_vm11, %v3297_v62 }
 0x261   : > { %1082 = vst.msk [vmem:[#allocation3 + $0x60] sm:$0xff] %vm1069_vm7, %v1031_v39 }
 0x262   : > { %1589 = vst.msk [vmem:[#allocation3 + $0x58] sm:$0xff] %vm1577_vm12, %v3302_v2  ;;  %v779_v53 = vpop.permute.xlu1 %778 }
 0x263   : > { %1716 = vst.msk [vmem:[#allocation3 + $0x58] sm:$0xff] %vm1704_vm13, %v3307_v7  ;;  %v1158_v6 = vpop.permute.xlu0 %1157 }
 0x264   : > { %829 = vst.msk [vmem:[#allocation3 + $0x68] sm:$0xff] %vm815_vm5, %v779_v53 }
 0x265   : > { %1209 = vst.msk [vmem:[#allocation3 + $0x60] sm:$0xff] %vm1196_vm8, %v1158_v6 }
 0x266   : > { %1336 = vst.msk [vmem:[#allocation3 + $0x60] sm:$0xff] %vm1323_vm9, %v3288_v55  ;;  %v906_v62 = vpop.permute.xlu1 %905  ;;  %v1736_v55 = vld [vmem:[#allocation3 + $0x50] sm:$0xff] }
 0x267   : > { %1463 = vst.msk [vmem:[#allocation3 + $0x60] sm:$0xff] %vm1450_vm11, %v3333_v34  ;;  %v1166_v2 = vpop.permute.xlu0 %1165 }
 0x268   : > { %1590 = vst.msk [vmem:[#allocation3 + $0x60] sm:$0xff] %vm1577_vm12, %v3338_v36 }
 0x269   : > { %956 = vst.msk [vmem:[#allocation3 + $0x68] sm:$0xff] %vm942_vm6, %v906_v62 }
 0x26a   : > { %1717 = vst.msk [vmem:[#allocation3 + $0x60] sm:$0xff] %vm1704_vm13, %v3347_v44  ;;  %v1737_v7 = vld [vmem:[#allocation3 + $0x58] sm:$0xff]  ;;  %v1168_v34 = vpop.permute.xlu1 %1167 }
 0x26b   : > { %1083 = vst.msk [vmem:[#allocation3 + $0x68] sm:$0xff] %vm1069_vm7, %v3313_v11  ;;  %v1752_v36 = vpack.c.bf16 %v1737_v7, %v1736_v55  ;;  %v1293_v44 = vpop.permute.xlu0 %1292 }
 0x26c   : > { %1213 = vst.msk [vmem:[#allocation3 + $0x80] sm:$0xff] %vm1196_vm8, %v1166_v2  ;;  %1210 = vst.msk [vmem:[#allocation3 + $0x68] sm:$0xff] %vm1196_vm8, %v3320_v16 }
 0x26d   : > { %1337 = vst.msk [vmem:[#allocation3 + $0x68] sm:$0xff] %vm1323_vm9, %v3327_v28  ;;  %1340 = vst.msk [vmem:[#allocation3 + $0x80] sm:$0xff] %vm1323_vm9, %v1293_v44  ;;  %2750 = vmatmul.mubr.msk.bf16.gmra.mxu1 %vm1801_vm14, %v1752_v36 }
 0x26e   : > { %1464 = vst.msk [vmem:[#allocation3 + $0x68] sm:$0xff] %vm1450_vm11, %v3367_v5  ;;  %2753 = vmatprep.mubr.msk.bf16.mxu1 %vm2909_vm2, %v2907_v0  ;;  %v1295_v11 = vpop.permute.xlu1 %1294 }
 0x26f   : > { %1214 = vst.msk [vmem:[#allocation3 + $0x88] sm:$0xff] %vm1196_vm8, %v1168_v34  ;;  %v1420_v16 = vpop.permute.xlu0 %1419 }
 0x270   : > { %1591 = vst.msk [vmem:[#allocation3 + $0x68] sm:$0xff] %vm1577_vm12, %v3373_v14 }
 0x271   : > { %1718 = vst.msk [vmem:[#allocation3 + $0x68] sm:$0xff] %vm1704_vm13, %v3378_v20  ;;  %v1738_v14 = vld [vmem:[#allocation3 + $0x60] sm:$0xff] }
 0x272   : > { %1341 = vst.msk [vmem:[#allocation3 + $0x88] sm:$0xff] %vm1323_vm9, %v1295_v11  ;;  %v1422_v28 = vpop.permute.xlu1 %1421 }
 0x273   : > { %1467 = vst.msk [vmem:[#allocation3 + $0x80] sm:$0xff] %vm1450_vm11, %v1420_v16  ;;  %1468 = vst.msk [vmem:[#allocation3 + $0x88] sm:$0xff] %vm1450_vm11, %v1422_v28  ;;  %v1547_v5 = vpop.permute.xlu0 %1546 }
 0x274   : > { %1594 = vst.msk [vmem:[#allocation3 + $0x80] sm:$0xff] %vm1577_vm12, %v1547_v5 }
 0x276   : > { %v1549_v9 = vpop.permute.xlu1 %1548 }
 0x277   : > { %1595 = vst.msk [vmem:[#allocation3 + $0x88] sm:$0xff] %vm1577_vm12, %v1549_v9  ;;  %v1674_v20 = vpop.permute.xlu0 %1673 }
 0x278   : > { %v1739_v43 = vld [vmem:[#allocation3 + $0x68] sm:$0xff]  ;;  %1721 = vst.msk [vmem:[#allocation3 + $0x80] sm:$0xff] %vm1704_vm13, %v1674_v20 }
 0x279   : > { %v1753_v8 = vpack.c.bf16 %v1739_v43, %v1738_v14 }
 0x27a   : > { %v1676_v10 = vpop.permute.xlu1 %1675 }
 0x27b   : > { %2754 = vmatmul.mubr.msk.bf16.gmra.mxu1 %vm1801_vm14, %v1753_v8  ;;  %1722 = vst.msk [vmem:[#allocation3 + $0x88] sm:$0xff] %vm1704_vm13, %v1676_v10  ;;  %v789_v15 = vpop.permute.xlu0 %788 }
 0x27c   : > { %2757 = vmatprep.mubr.msk.bf16.mxu1 %vm2909_vm2, %v2907_v0  ;;  %834 = vst.msk [vmem:[#allocation3 + $0x90] sm:$0xff] %vm815_vm5, %v789_v15 }
 0x27e   : > { %v791_v18 = vpop.permute.xlu1 %790 }
 0x27f   : > { %835 = vst.msk [vmem:[#allocation3 + $0x98] sm:$0xff] %vm815_vm5, %v791_v18  ;;  %v916_v21 = vpop.permute.xlu0 %915  ;;  %v1742_v24 = vld [vmem:[#allocation3 + $0x80] sm:$0xff] }
 0x280   : > { %961 = vst.msk [vmem:[#allocation3 + $0x90] sm:$0xff] %vm942_vm6, %v916_v21 }
 0x282   : > { %v918_v12 = vpop.permute.xlu1 %917  ;;  %v1743_v47 = vld [vmem:[#allocation3 + $0x88] sm:$0xff] }
 0x283   : > { %2758 = vmatmul.mubr.msk.bf16.gmra.mxu1 %vm1801_vm14, %v1754_v17  ;;  %962 = vst.msk [vmem:[#allocation3 + $0x98] sm:$0xff] %vm942_vm6, %v918_v12  ;;  %v1043_v59 = vpop.permute.xlu0 %1042  ;;  %v1755_v48 = vpack.c.bf16 %v1743_v47, %v1742_v24 }
 0x284   : > { %2761 = vmatprep.mubr.msk.bf16.mxu1 %vm2909_vm2, %v2907_v0  ;;  %1088 = vst.msk [vmem:[#allocation3 + $0x90] sm:$0xff] %vm1069_vm7, %v1043_v59 }
 0x286   : > { %v1045_v26 = vpop.permute.xlu1 %1044 }
 0x287   : > { %1089 = vst.msk [vmem:[#allocation3 + $0x98] sm:$0xff] %vm1069_vm7, %v1045_v26  ;;  %v1170_v27 = vpop.permute.xlu0 %1169 }
 0x288   : > { %1215 = vst.msk [vmem:[#allocation3 + $0x90] sm:$0xff] %vm1196_vm8, %v1170_v27 }
 0x28a   : > { %v1172_v29 = vpop.permute.xlu1 %1171 }
 0x28b   : > { %2762 = vmatmul.mubr.msk.bf16.gmra.mxu1 %vm1801_vm14, %v1755_v48  ;;  %1216 = vst.msk [vmem:[#allocation3 + $0x98] sm:$0xff] %vm1196_vm8, %v1172_v29  ;;  %v1297_v23 = vpop.permute.xlu0 %1296 }
 0x28c   : > { %2765 = vmatprep.mubr.msk.bf16.mxu1 %vm2909_vm2, %v2907_v0  ;;  %1342 = vst.msk [vmem:[#allocation3 + $0x90] sm:$0xff] %vm1323_vm9, %v1297_v23 }
 0x28d   : > { %v1872_v31 = vpop.f32.mrf.mxu1 }
 0x28e   : > { %v1873_v32 = vadd.f32 %v3655_v30, %v1872_v31  ;;  %v1299_v45 = vpop.permute.xlu1 %1298 }
 0x28f   : > { %1343 = vst.msk [vmem:[#allocation3 + $0x98] sm:$0xff] %vm1323_vm9, %v1299_v45  ;;  %v1424_v25 = vpop.permute.xlu0 %1423  ;;  %v2731_v35 = vpop.f32.mrf.mxu1 }
 0x290   : > { %v1958_v37 = vmax.f32 %v1873_v32, 0.0  ;;  %1469 = vst.msk [vmem:[#allocation3 + $0x90] sm:$0xff] %vm1450_vm11, %v1424_v25 }
 0x291   : > { %v1875_v40 = vpop.f32.mrf.mxu1 }
 0x292   : > { %v1876_v42 = vadd.f32 %v3655_v30, %v1875_v40  ;;  %2610 = vmatmul.mubr.msk.f32.vlgmr.msra.gmra.mxu0 %vm1983_vm15, %v1958_v37  ;;  %v1426_v41 = vpop.permute.xlu1 %1425 }
 0x293   : > { %1470 = vst.msk [vmem:[#allocation3 + $0x98] sm:$0xff] %vm1450_vm11, %v1426_v41  ;;  %v1551_v33 = vpop.permute.xlu0 %1550  ;;  %v2732_v46 = vpop.f32.mrf.mxu1  ;;  %2117 = vmatprep.mubr.f32.mxu0 %v2907_v0 }
 0x294   : > { %v1959_v49 = vmax.f32 %v1876_v42, 0.0  ;;  %1596 = vst.msk [vmem:[#allocation3 + $0x90] sm:$0xff] %vm1577_vm12, %v1551_v33 }
 0x296   : > { %2611 = vmatmul.mubr.msk.f32.gmra.mxu0 %vm1983_vm15, %v1959_v49  ;;  %v1553_v50 = vpop.permute.xlu1 %1552 }
 0x297   : > { %1597 = vst.msk [vmem:[#allocation3 + $0x98] sm:$0xff] %vm1577_vm12, %v1553_v50  ;;  %v1678_v51 = vpop.permute.xlu0 %1677  ;;  %2123 = vmatprep.mubr.f32.mxu0 %v2907_v0 }
 0x298   : > { %1723 = vst.msk [vmem:[#allocation3 + $0x90] sm:$0xff] %vm1704_vm13, %v1678_v51 }
 0x29a   : > { %v1680_v52 = vpop.permute.xlu1 %1679 }
 0x29b   : > { %1724 = vst.msk [vmem:[#allocation3 + $0x98] sm:$0xff] %vm1704_vm13, %v1680_v52  ;;  %v793_v54 = vpop.permute.xlu0 %792 }
 0x29c   : > { %836 = vst.msk [vmem:[#allocation3 + $0xa0] sm:$0xff] %vm815_vm5, %v793_v54 }
 0x29e   : > { %v920_v4 = vpop.permute.xlu1 %919 }
 0x29f   : > { %963 = vst.msk [vmem:[#allocation3 + $0xa0] sm:$0xff] %vm942_vm6, %v920_v4  ;;  %v1047_v56 = vpop.permute.xlu0 %1046  ;;  %v1744_v58 = vld [vmem:[#allocation3 + $0x90] sm:$0xff] }
 0x2a0   : > { %1090 = vst.msk [vmem:[#allocation3 + $0xa0] sm:$0xff] %vm1069_vm7, %v1047_v56 }
 0x2a2   : > { %v1174_v57 = vpop.permute.xlu1 %1173  ;;  %v1745_v60 = vld [vmem:[#allocation3 + $0x98] sm:$0xff] }
 0x2a3   : > { %1217 = vst.msk [vmem:[#allocation3 + $0xa0] sm:$0xff] %vm1196_vm8, %v1174_v57  ;;  %v1301_v61 = vpop.permute.xlu0 %1300  ;;  %v1756_v38 = vpack.c.bf16 %v1745_v60, %v1744_v58 }
 0x2a4   : > { %1344 = vst.msk [vmem:[#allocation3 + $0xa0] sm:$0xff] %vm1323_vm9, %v1301_v61 }
 0x2a5   : > { %2766 = vmatmul.mubr.msk.bf16.gmra.mxu1 %vm1801_vm14, %v1756_v38 }
 0x2a6   : > { %v1428_v22 = vpop.permute.xlu1 %1427  ;;  %2769 = vmatprep.mubr.msk.bf16.mxu1 %vm2909_vm2, %v2907_v0 }
 0x2a7   : > { %1471 = vst.msk [vmem:[#allocation3 + $0xa0] sm:$0xff] %vm1450_vm11, %v1428_v22  ;;  %v1555_v63 = vpop.permute.xlu0 %1554 }
 0x2a8   : > { %1598 = vst.msk [vmem:[#allocation3 + $0xa0] sm:$0xff] %vm1577_vm12, %v1555_v63 }
 0x2aa   : > { %v1682_v1 = vpop.permute.xlu1 %1681 }
 0x2ab   : > { %1725 = vst.msk [vmem:[#allocation3 + $0xa0] sm:$0xff] %vm1704_vm13, %v1682_v1 }
 0x2b2   : > { %v1746_v3 = vld [vmem:[#allocation3 + $0xa0] sm:$0xff] }
 0x2b3   : > { %v1757_v39 = vpack.c.bf16 %v1746_v3, %v1746_v3 }
 0x2b5   : > { %2770 = vmatmul.mubr.msk.bf16.gmra.mxu1 %vm1801_vm14, %v1757_v39 }
 0x2bd   : > { %v1880_v53 = vpop.f32.mrf.mxu1 }
 0x2be   : > { %v1881_v6 = vadd.f32 %v3655_v30, %v1880_v53 }
 0x2bf   : > { %v2735_v62 = vpop.f32.mrf.mxu1 }
 0x2c0   : > { %v1960_v2 = vmax.f32 %v1881_v6, 0.0 }
 0x2c1   : > { %v1883_v55 = vpop.f32.mrf.mxu1 }
 0x2c2   : > { %v1884_v7 = vadd.f32 %v3655_v30, %v1883_v55  ;;  %2612 = vmatmul.mubr.msk.f32.gmra.mxu0 %vm1983_vm15, %v1960_v2 }
 0x2c3   : > { %v2736_v34 = vpop.f32.mrf.mxu1  ;;  %2129 = vmatprep.mubr.f32.mxu0 %v2907_v0 }
 0x2c4   : > { %v1961_v36 = vmax.f32 %v1884_v7, 0.0 }
 0x2c6   : > { %2613 = vmatmul.mubr.msk.f32.gmra.mxu0 %vm1983_vm15, %v1961_v36 }
 0x2c7   : > { %2135 = vmatprep.mubr.f32.mxu0 %v2907_v0 }
 0x2dd   : > { %v1888_v44 = vpop.f32.mrf.mxu1 }
 0x2de   : > { %v1889_v11 = vadd.f32 %v3655_v30, %v1888_v44 }
 0x2df   : > { %v2739_v16 = vpop.f32.mrf.mxu1 }
 0x2e0   : > { %v1962_v28 = vmax.f32 %v1889_v11, 0.0 }
 0x2e1   : > { %v1891_v5 = vpop.f32.mrf.mxu1 }
 0x2e2   : > { %v1892_v14 = vadd.f32 %v3655_v30, %v1891_v5  ;;  %2614 = vmatmul.mubr.msk.f32.gmra.mxu0 %vm1983_vm15, %v1962_v28 }
 0x2e3   : > { %v2740_v43 = vpop.f32.mrf.mxu1  ;;  %2141 = vmatprep.mubr.f32.mxu0 %v2907_v0 }
 0x2e4   : > { %v1963_v8 = vmax.f32 %v1892_v14, 0.0 }
 0x2e6   : > { %2615 = vmatmul.mubr.msk.f32.gmra.mxu0 %vm1983_vm15, %v1963_v8 }
 0x2e7   : > { %2147 = vmatprep.mubr.f32.mxu0 %v2907_v0 }
 0x2fd   : > { %v1896_v9 = vpop.f32.mrf.mxu1 }
 0x2fe   : > { %v1897_v20 = vadd.f32 %v3655_v30, %v1896_v9  ;;  %v2411_v9 = vld [vmem:[%s4079_s7 + $0x78] sm:$0xff] }
 0x2ff   : > { %v2743_v10 = vpop.f32.mrf.mxu1  ;;  %2421 = vmatpush1.msra.mxu1 %v2411_v9 }
 0x300   : > { %v1964_v13 = vmax.f32 %v1897_v20, 0.0  ;;  %2422 = vmatprep.subr.mxu1 %v2907_v0  ;;  %v2410_v20 = vld [vmem:[%s4079_s7 + $0x70] sm:$0xff]  ;;  %v2408_v10 = vld [vmem:[%s4079_s7 + $0x60] sm:$0xff] }
 0x301   : > { %v1899_v15 = vpop.f32.mrf.mxu1  ;;  %2423 = vmatpush1.msra.mxu1 %v2410_v20  ;;  %v2246_v20 = vld [vmem:[%s4078_s6 + $0x40] sm:$0xff] }
 0x302   : > { %v1900_v19 = vadd.f32 %v3655_v30, %v1899_v15  ;;  %2616 = vmatmul.mubr.msk.f32.gmra.mxu0 %vm1983_vm15, %v1964_v13  ;;  %2424 = vmatprep.subr.mxu1 %v2907_v0  ;;  %v2407_v13 = vld [vmem:[%s4079_s7 + $0x58] sm:$0xff]  ;;  %v2406_v15 = vld [vmem:[%s4079_s7 + $0x50] sm:$0xff] }
 0x303   : > { %v2744_v17 = vpop.f32.mrf.mxu1  ;;  %2153 = vmatprep.mubr.f32.mxu0 %v2907_v0 }
 0x304   : > { %v1965_v18 = vmax.f32 %v1900_v19, 0.0  ;;  %v2405_v19 = vld [vmem:[%s4079_s7 + $0x48] sm:$0xff]  ;;  %v2404_v17 = vld [vmem:[%s4079_s7 + $0x40] sm:$0xff] }
 0x306   : > { %2617 = vmatmul.mubr.msk.f32.gmra.mxu0 %vm1983_vm15, %v1965_v18  ;;  %v2403_v18 = vld [vmem:[%s4079_s7 + $0x38] sm:$0xff] }
 0x307   : > { %2159 = vmatprep.mubr.f32.mxu0 %v2907_v0 }
 0x31d   : > { %v1904_v21 = vpop.f32.mrf.mxu1 }
 0x31e   : > { %v1905_v12 = vadd.f32 %v3655_v30, %v1904_v21  ;;  %v2402_v21 = vld [vmem:[%s4079_s7 + $0x30] sm:$0xff] }
 0x31f   : > { %v2747_v47 = vpop.f32.mrf.mxu1 }
 0x320   : > { %v1966_v59 = vmax.f32 %v1905_v12, 0.0  ;;  %v2401_v12 = vld [vmem:[%s4079_s7 + $0x28] sm:$0xff]  ;;  %v2400_v47 = vld [vmem:[%s4079_s7 + $0x20] sm:$0xff] }
 0x321   : > { %v1907_v24 = vpop.f32.mrf.mxu1 }
 0x322   : > { %v1908_v48 = vadd.f32 %v3655_v30, %v1907_v24  ;;  %2618 = vmatmul.mubr.msk.f32.gmra.mxu0 %vm1983_vm15, %v1966_v59 }
 0x323   : > { %v2748_v26 = vpop.f32.mrf.mxu1  ;;  %2165 = vmatprep.mubr.f32.mxu0 %v2907_v0 }
 0x324   : > { %v1967_v27 = vmax.f32 %v1908_v48, 0.0  ;;  %v2399_v48 = vld [vmem:[%s4079_s7 + $0x18] sm:$0xff] }
 0x326   : > { %2619 = vmatmul.mubr.msk.f32.gmra.mxu0 %vm1983_vm15, %v1967_v27  ;;  %v2398_v27 = vld [vmem:[%s4079_s7 + $0x10] sm:$0xff] }
 0x327   : > { %2171 = vmatprep.mubr.f32.mxu0 %v2907_v0 }
 0x32d   : > { %v1912_v29 = vpop.f32.mrf.mxu1 }
 0x32e   : > { %v1913_v23 = vadd.f32 %v3655_v30, %v1912_v29  ;;  %v2397_v29 = vld [vmem:[%s4079_s7 + $0x8] sm:$0xff] }
 0x32f   : > { %v2751_v31 = vpop.f32.mrf.mxu1 }
 0x330   : > { %v1968_v32 = vmax.f32 %v1913_v23, 0.0  ;;  %v2396_v23 = vld [vmem:[%s4079_s7] sm:$0xff] }
 0x331   : > { %v1915_v45 = vpop.f32.mrf.mxu1 }
 0x332   : > { %v1916_v25 = vadd.f32 %v3655_v30, %v1915_v45  ;;  %2620 = vmatmul.mubr.msk.f32.gmra.mxu0 %vm1983_vm15, %v1968_v32 }
 0x333   : > { %v2752_v35 = vpop.f32.mrf.mxu1  ;;  %2177 = vmatprep.mubr.f32.mxu0 %v2907_v0 }
 0x334   : > { %v1969_v37 = vmax.f32 %v1916_v25, 0.0 }
 0x336   : > { %2621 = vmatmul.mubr.msk.f32.gmra.mxu0 %vm1983_vm15, %v1969_v37 }
 0x337   : > { %2183 = vmatprep.mubr.f32.mxu0 %v2907_v0 }
 0x33b   : > { %v1920_v40 = vpop.f32.mrf.mxu1 }
 0x33c   : > { %v1921_v42 = vadd.f32 %v3655_v30, %v1920_v40  ;;  %v2415_v40 = vld [vmem:[%s4079_s7 + $0x98] sm:$0xff] }
 0x33d   : > { %v2755_v41 = vpop.f32.mrf.mxu1 }
 0x33e   : > { %v1970_v33 = vmax.f32 %v1921_v42, 0.0  ;;  %v2414_v42 = vld [vmem:[%s4079_s7 + $0x90] sm:$0xff] }
 0x33f   : > { %v1923_v46 = vpop.f32.mrf.mxu1 }
 0x340   : > { %v1924_v49 = vadd.f32 %v3655_v30, %v1923_v46  ;;  %2622 = vmatmul.mubr.msk.f32.gmra.mxu0 %vm1983_vm15, %v1970_v33  ;;  %v2413_v33 = vld [vmem:[%s4079_s7 + $0x88] sm:$0xff]  ;;  %v2412_v46 = vld [vmem:[%s4079_s7 + $0x80] sm:$0xff] }
 0x341   : > { %v2756_v50 = vpop.f32.mrf.mxu1  ;;  %2189 = vmatprep.mubr.f32.mxu0 %v2907_v0 }
 0x342   : > { %v1971_v51 = vmax.f32 %v1924_v49, 0.0 }
 0x343   : > { %v1928_v52 = vpop.f32.mrf.mxu1 }
 0x344   : > { %v1929_v54 = vadd.f32 %v3655_v30, %v1928_v52  ;;  %2623 = vmatmul.mubr.msk.f32.gmra.mxu0 %vm1983_vm15, %v1971_v51 }
 0x345   : > { %v2759_v4 = vpop.f32.mrf.mxu1  ;;  %2195 = vmatprep.mubr.f32.mxu0 %v2907_v0 }
 0x346   : > { %v1972_v56 = vmax.f32 %v1929_v54, 0.0 }
 0x347   : > { %v1931_v57 = vpop.f32.mrf.mxu1 }
 0x348   : > { %v1932_v58 = vadd.f32 %v3655_v30, %v1931_v57  ;;  %2624 = vmatmul.mubr.msk.f32.gmra.mxu0 %vm1983_vm15, %v1972_v56 }
 0x349   : > { %v2760_v60 = vpop.f32.mrf.mxu1  ;;  %2201 = vmatprep.mubr.f32.mxu0 %v2907_v0 }
 0x34a   : > { %v1973_v61 = vmax.f32 %v1932_v58, 0.0 }
 0x34b   : > { %v1936_v38 = vpop.f32.mrf.mxu1 }
 0x34c   : > { %v1937_v22 = vadd.f32 %v3655_v30, %v1936_v38  ;;  %2625 = vmatmul.mubr.msk.f32.gmra.mxu0 %vm1983_vm15, %v1973_v61 }
 0x34d   : > { %v2763_v63 = vpop.f32.mrf.mxu1  ;;  %2207 = vmatprep.mubr.f32.mxu0 %v2907_v0 }
 0x34e   : > { %v1974_v1 = vmax.f32 %v1937_v22, 0.0 }
 0x34f   : > { %v1939_v3 = vpop.f32.mrf.mxu1 }
 0x350   : > { %v1940_v39 = vadd.f32 %v3655_v30, %v1939_v3  ;;  %2626 = vmatmul.mubr.msk.f32.gmra.mxu0 %vm1983_vm15, %v1974_v1 }
 0x351   : > { %v2764_v53 = vpop.f32.mrf.mxu1  ;;  %2213 = vmatprep.mubr.f32.mxu0 %v2907_v0 }
 0x352   : > { %v1975_v6 = vmax.f32 %v1940_v39, 0.0  ;;  %v3787_v59 = vpop.f32.mrf.mxu0 }
 0x354   : > { %2627 = vmatmul.mubr.msk.f32.gmra.mxu0 %vm1983_vm15, %v1975_v6  ;;  %v2115_v24 = vpop.f32.mrf.mxu0  ;;  %v2240_v6 = vld [vmem:[%s4078_s6 + $0x10] sm:$0xff] }
 0x355   : > { %2219 = vmatprep.mubr.f32.mxu0 %v2907_v0 }
 0x356   : > { %v2119_v26 = vpop.f32.mrf.mxu0 }
 0x358   : > { %v2121_v31 = vpop.f32.mrf.mxu0 }
 0x365   : > { %v1944_v62 = vpop.f32.mrf.mxu1 }
 0x366   : > { %v1945_v2 = vadd.f32 %v3655_v30, %v1944_v62  ;;  %v2241_v62 = vld [vmem:[%s4078_s6 + $0x18] sm:$0xff] }
 0x367   : > { %v2767_v55 = vpop.f32.mrf.mxu1 }
 0x368   : > { %v1976_v7 = vmax.f32 %v1945_v2, 0.0  ;;  %v2239_v55 = vld [vmem:[%s4078_s6 + $0x8] sm:$0xff] }
 0x369   : > { %v1947_v34 = vpop.f32.mrf.mxu1 }
 0x36a   : > { %v1948_v36 = vadd.f32 %v3655_v30, %v1947_v34  ;;  %2628 = vmatmul.mubr.msk.f32.gmra.mxu0 %vm1983_vm15, %v1976_v7  ;;  %v2238_v7 = vld [vmem:[%s4078_s6] sm:$0xff] }
 0x36b   : > { %v2768_v44 = vpop.f32.mrf.mxu1  ;;  %2225 = vmatprep.mubr.f32.mxu0 %v2907_v0  ;;  %v2242_v34 = vld [vmem:[%s4078_s6 + $0x20] sm:$0xff] }
 0x36c   : > { %v1977_v11 = vmax.f32 %v1948_v36, 0.0  ;;  %v2243_v36 = vld [vmem:[%s4078_s6 + $0x28] sm:$0xff]  ;;  %v2282_v44 = vmul.f32 %v2240_v6, %v2119_v26 }
 0x36e   : > { %2629 = vmatmul.mubr.msk.f32.gmra.mxu0 %vm1983_vm15, %v1977_v11  ;;  %v2283_v11 = vmul.f32 %v2241_v62, %v2121_v31 }
 0x36f   : > { %2231 = vmatprep.mubr.f32.mxu0 %v2907_v0 }
 0x375   : > { %v1952_v16 = vpop.f32.mrf.mxu1 }
 0x376   : > { %v1953_v28 = vadd.f32 %v3655_v30, %v1952_v16  ;;  %v2409_v30 = vld [vmem:[%s4079_s7 + $0x68] sm:$0xff]  ;;  %v2281_v16 = vmul.f32 %v2239_v55, %v2115_v24 }
 0x377   : > { %v2771_v5 = vpop.f32.mrf.mxu1  ;;  %2425 = vmatpush1.msra.mxu1 %v2409_v30  ;;  %v2247_v30 = vld [vmem:[%s4078_s6 + $0x48] sm:$0xff] }
 0x378   : > { %v1978_v14 = vmax.f32 %v1953_v28, 0.0  ;;  %2426 = vmatprep.subr.mxu1 %v2907_v0  ;;  %v2244_v28 = vld [vmem:[%s4078_s6 + $0x30] sm:$0xff]  ;;  %v2245_v5 = vld [vmem:[%s4078_s6 + $0x38] sm:$0xff] }
 0x379   : > { %v1955_v43 = vpop.f32.mrf.mxu1  ;;  %2427 = vmatpush1.msra.mxu1 %v2408_v10 }
 0x37a   : > { %2630 = vmatmul.mubr.msk.f32.gmra.mxu0 %vm1983_vm15, %v1978_v14  ;;  %2428 = vmatprep.subr.mxu1 %v2907_v0  ;;  %v2280_v43 = vmul.f32 %v2238_v7, %v3787_v59 }
 0x37b   : > { %v2772_v8 = vpop.f32.mrf.mxu1  ;;  %2429 = vmatpush1.msra.mxu1 %v2407_v13  ;;  %v2350_v13 = vsel %vm2348_vm0, %v2283_v11, 0.0 }
 0x37c   : > { %2430 = vmatprep.subr.mxu1 %v2907_v0  ;;  %v2322_v10 = vadd.f32 %v2282_v44, %v2280_v43  ;;  %v2259_v43 = vld [vmem:[%s4078_s6 + $0xa8] sm:$0xff] }
 0x37d   : > { %2431 = vmatpush1.msra.mxu1 %v2406_v15 }
 0x37e   : > { %2432 = vmatprep.subr.mxu1 %v2907_v0 }
 0x37f   : > { %2433 = vmatpush1.msra.mxu1 %v2405_v19 }
 0x380   : > { %2434 = vmatprep.subr.mxu1 %v2907_v0 }
 0x381   : > { %2435 = vmatpush1.msra.mxu1 %v2404_v17  ;;  %v2349_v17 = vsel %vm2348_vm0, %v2281_v16, 0.0 }
 0x382   : > { %2436 = vmatprep.subr.mxu1 %v2907_v0  ;;  %v2125_v32 = vpop.f32.mrf.mxu0  ;;  %v2351_v26 = vadd.f32 %v2350_v13, %v2349_v17 }
 0x383   : > { %2437 = vmatpush1.msra.mxu1 %v2403_v18  ;;  %v2284_v8 = vmul.f32 %v2242_v34, %v2125_v32  ;;  %v2248_v18 = vld [vmem:[%s4078_s6 + $0x50] sm:$0xff] }
 0x384   : > { %2438 = vmatprep.subr.mxu1 %v2907_v0  ;;  %v2127_v45 = vpop.f32.mrf.mxu0 }
 0x385   : > { %2439 = vmatpush1.msra.mxu1 %v2402_v21  ;;  %v2285_v9 = vmul.f32 %v2243_v36, %v2127_v45  ;;  %v2249_v21 = vld [vmem:[%s4078_s6 + $0x58] sm:$0xff] }
 0x386   : > { %2440 = vmatprep.subr.mxu1 %v2907_v0  ;;  %v2131_v25 = vpop.f32.mrf.mxu0 }
 0x387   : > { %2441 = vmatpush1.msra.mxu1 %v2401_v12  ;;  %v2286_v15 = vmul.f32 %v2244_v28, %v2131_v25  ;;  %v2352_v59 = vsel %vm2348_vm0, %v2285_v9, 0.0 }
 0x388   : > { %2442 = vmatprep.subr.mxu1 %v2907_v0  ;;  %v2133_v35 = vpop.f32.mrf.mxu0  ;;  %v2353_v25 = vadd.f32 %v2352_v59, %v2351_v26 }
 0x389   : > { %2443 = vmatpush1.msra.mxu1 %v2400_v47  ;;  %v2287_v19 = vmul.f32 %v2245_v5, %v2133_v35  ;;  %v2323_v47 = vadd.f32 %v2322_v10, %v2284_v8  ;;  %v2252_v35 = vld [vmem:[%s4078_s6 + $0x70] sm:$0xff] }
 0x38a   : > { %2444 = vmatprep.subr.mxu1 %v2907_v0 }
 0x38b   : > { %2445 = vmatpush1.msra.mxu1 %v2399_v48  ;;  %v2354_v31 = vsel %vm2348_vm0, %v2287_v19, 0.0 }
 0x38c   : > { %2446 = vmatprep.subr.mxu1 %v2907_v0  ;;  %v2355_v6 = vadd.f32 %v2354_v31, %v2353_v25 }
 0x38d   : > { %2447 = vmatpush1.msra.mxu1 %v2398_v27  ;;  %v2250_v27 = vld [vmem:[%s4078_s6 + $0x60] sm:$0xff] }
 0x38e   : > { %2448 = vmatprep.subr.mxu1 %v2907_v0 }
 0x38f   : > { %2449 = vmatpush1.msra.mxu1 %v2397_v29  ;;  %v2251_v29 = vld [vmem:[%s4078_s6 + $0x68] sm:$0xff] }
 0x390   : > { %2450 = vmatprep.subr.mxu1 %v2907_v0 }
 0x391   : > { %2451 = vmatpush1.msra.mxu1 %v2396_v23  ;;  %v2324_v23 = vadd.f32 %v2323_v47, %v2286_v15 }
 0x392   : > { %2476 = vmatprep.subr.mxu1 %v2907_v0 }
 0x393   : > { %2477 = vmatpush2.msra.mxu1 %v2415_v40 }
 0x394   : > { %2478 = vmatprep.subr.mxu1 %v2907_v0 }
 0x395   : > { %2479 = vmatpush2.msra.mxu1 %v2414_v42 }
 0x396   : > { %2480 = vmatprep.subr.mxu1 %v2907_v0 }
 0x397   : > { %2481 = vmatpush2.msra.mxu1 %v2413_v33 }
 0x398   : > { %2482 = vmatprep.subr.mxu1 %v2907_v0 }
 0x399   : > { %2483 = vmatpush2.msra.mxu1 %v2412_v46 }
 0x3a2   : > { %v2137_v37 = vpop.f32.mrf.mxu0 }
 0x3a3   : > { %v2288_v24 = vmul.f32 %v2246_v20, %v2137_v37  ;;  %v2253_v37 = vld [vmem:[%s4078_s6 + $0x78] sm:$0xff] }
 0x3a4   : > { %v2139_v41 = vpop.f32.mrf.mxu0 }
 0x3a5   : > { %v2289_v48 = vmul.f32 %v2247_v30, %v2139_v41  ;;  %v2325_v42 = vadd.f32 %v2324_v23, %v2288_v24 }
 0x3a6   : > { %v2143_v49 = vpop.f32.mrf.mxu0 }
 0x3a7   : > { %v2290_v32 = vmul.f32 %v2248_v18, %v2143_v49  ;;  %v2356_v41 = vsel %vm2348_vm0, %v2289_v48, 0.0  ;;  %v2254_v49 = vld [vmem:[%s4078_s6 + $0x80] sm:$0xff] }
 0x3a8   : > { %v2145_v50 = vpop.f32.mrf.mxu0  ;;  %v2357_v36 = vadd.f32 %v2356_v41, %v2355_v6 }
 0x3a9   : > { %v2291_v45 = vmul.f32 %v2249_v21, %v2145_v50  ;;  %v2255_v50 = vld [vmem:[%s4078_s6 + $0x88] sm:$0xff]  ;;  %v2326_v62 = vadd.f32 %v2325_v42, %v2290_v32 }
 0x3aa   : > { %v2263_v21 = vld [vmem:[%s4078_s6 + $0xc8] sm:$0xff] }
 0x3ab   : > { %v2358_v55 = vsel %vm2348_vm0, %v2291_v45, 0.0  ;;  %v2267_v45 = vld [vmem:[%s4078_s6 + $0xe8] sm:$0xff] }
 0x3ac   : > { %v2359_v5 = vadd.f32 %v2358_v55, %v2357_v36  ;;  %v2271_v55 = vld [vmem:[%s4078_s6 + $0x108] sm:$0xff] }
 0x3c2   : > { %v2149_v51 = vpop.f32.mrf.mxu0 }
 0x3c3   : > { %v2292_v33 = vmul.f32 %v2250_v27, %v2149_v51  ;;  %v2256_v51 = vld [vmem:[%s4078_s6 + $0x90] sm:$0xff] }
 0x3c4   : > { %v2151_v52 = vpop.f32.mrf.mxu0 }
 0x3c5   : > { %v2293_v46 = vmul.f32 %v2251_v29, %v2151_v52  ;;  %v2257_v52 = vld [vmem:[%s4078_s6 + $0x98] sm:$0xff]  ;;  %v2327_v11 = vadd.f32 %v2326_v62, %v2292_v33 }
 0x3c6   : > { %v3820_v54 = vpop.f32.mrf.mxu0  ;;  %v2269_v33 = vld [vmem:[%s4078_s6 + $0xf8] sm:$0xff] }
 0x3c7   : > { %v2294_v7 = vmul.f32 %v2252_v35, %v3820_v54  ;;  %v2360_v16 = vsel %vm2348_vm0, %v2293_v46, 0.0 }
 0x3c8   : > { %v3822_v4 = vpop.f32.mrf.mxu0  ;;  %v2361_v10 = vadd.f32 %v2360_v16, %v2359_v5 }
 0x3c9   : > { %v2295_v34 = vmul.f32 %v2253_v37, %v3822_v4  ;;  %v2258_v4 = vld [vmem:[%s4078_s6 + $0xa0] sm:$0xff]  ;;  %v2328_v8 = vadd.f32 %v2327_v11, %v2294_v7 }
 0x3cb   : > { %v2362_v9 = vsel %vm2348_vm0, %v2295_v34, 0.0 }
 0x3e2   : > { %v3824_v56 = vpop.f32.mrf.mxu0 }
 0x3e3   : > { %v2296_v28 = vmul.f32 %v2254_v49, %v3824_v56  ;;  %v2260_v56 = vld [vmem:[%s4078_s6 + $0xb0] sm:$0xff] }
 0x3e4   : > { %v3826_v57 = vpop.f32.mrf.mxu0 }
 0x3e5   : > { %v2297_v54 = vmul.f32 %v2255_v50, %v3826_v57  ;;  %v2261_v57 = vld [vmem:[%s4078_s6 + $0xb8] sm:$0xff]  ;;  %v2329_v15 = vadd.f32 %v2328_v8, %v2296_v28 }
 0x3e6   : > { %v3828_v58 = vpop.f32.mrf.mxu0 }
 0x3e7   : > { %v2298_v20 = vmul.f32 %v2256_v51, %v3828_v58  ;;  %v2364_v19 = vsel %vm2348_vm0, %v2297_v54, 0.0  ;;  %v2363_v58 = vadd.f32 %v2362_v9, %v2361_v10  ;;  %v2277_v10 = vld [vmem:[%s4078_s6 + $0x138] sm:$0xff] }
 0x3e8   : > { %v3830_v60 = vpop.f32.mrf.mxu0 }
 0x3e9   : > { %v2299_v30 = vmul.f32 %v2257_v52, %v3830_v60  ;;  %v2262_v60 = vld [vmem:[%s4078_s6 + $0xc0] sm:$0xff]  ;;  %v2330_v47 = vadd.f32 %v2329_v15, %v2298_v20  ;;  %v2365_v26 = vadd.f32 %v2364_v19, %v2363_v58 }
 0x3eb   : > { %v2366_v59 = vsel %vm2348_vm0, %v2299_v30, 0.0 }
 0x3f2   : > { %v3832_v61 = vpop.f32.mrf.mxu0 }
 0x3f3   : > { %v2300_v17 = vmul.f32 %v2258_v4, %v3832_v61  ;;  %v2264_v61 = vld [vmem:[%s4078_s6 + $0xd0] sm:$0xff]  ;;  %v2275_v4 = vld [vmem:[%s4078_s6 + $0x128] sm:$0xff] }
 0x3f4   : > { %v3834_v38 = vpop.f32.mrf.mxu0 }
 0x3f5   : > { %v2301_v18 = vmul.f32 %v2259_v43, %v3834_v38  ;;  %v2265_v38 = vld [vmem:[%s4078_s6 + $0xd8] sm:$0xff]  ;;  %v2331_v29 = vadd.f32 %v2330_v47, %v2300_v17  ;;  %v2278_v47 = vld [vmem:[%s4078_s6 + $0x140] sm:$0xff] }
 0x3f6   : > { %v3836_v0 = vpop.f32.mrf.mxu0 }
 0x3f7   : > { %v2302_v24 = vmul.f32 %v2260_v56, %v3836_v0  ;;  %v2368_v23 = vsel %vm2348_vm0, %v2301_v18, 0.0  ;;  %v2367_v0 = vadd.f32 %v2366_v59, %v2365_v26 }
 0x3f8   : > { %v3838_v22 = vpop.f32.mrf.mxu0 }
 0x3f9   : > { %v2303_v48 = vmul.f32 %v2261_v57, %v3838_v22  ;;  %v2266_v22 = vld [vmem:[%s4078_s6 + $0xe0] sm:$0xff]  ;;  %v2332_v35 = vadd.f32 %v2331_v29, %v2302_v24 }
 0x3fb   : > { %v2370_v37 = vsel %vm2348_vm0, %v2303_v48, 0.0 }
 0x400   : > { %v3840_v63 = vpop.f32.mrf.mxu0 }
 0x401   : > { %v2304_v31 = vmul.f32 %v2262_v60, %v3840_v63  ;;  %v2369_v63 = vadd.f32 %v2368_v23, %v2367_v0 }
 0x402   : > { %v3842_v1 = vpop.f32.mrf.mxu0 }
 0x403   : > { %v2305_v32 = vmul.f32 %v2263_v21, %v3842_v1  ;;  %v2268_v1 = vld [vmem:[%s4078_s6 + $0xf0] sm:$0xff]  ;;  %v2333_v6 = vadd.f32 %v2332_v35, %v2304_v31 }
 0x404   : > { %v3844_v3 = vpop.f32.mrf.mxu0 }
 0x405   : > { %v2306_v42 = vmul.f32 %v2264_v61, %v3844_v3  ;;  %v2372_v49 = vsel %vm2348_vm0, %v2305_v32, 0.0  ;;  %v2371_v3 = vadd.f32 %v2370_v37, %v2369_v63  ;;  %v2279_v61 = vld [vmem:[%s4078_s6 + $0x148] sm:$0xff] }
 0x406   : > { %v3846_v39 = vpop.f32.mrf.mxu0 }
 0x407   : > { %v2307_v41 = vmul.f32 %v2265_v38, %v3846_v39  ;;  %v2270_v39 = vld [vmem:[%s4078_s6 + $0x100] sm:$0xff]  ;;  %v2334_v7 = vadd.f32 %v2333_v6, %v2306_v42  ;;  %v2373_v52 = vadd.f32 %v2372_v49, %v2371_v3 }
 0x408   : > { %v3848_v53 = vpop.f32.mrf.mxu0  ;;  %v2416_v3 = vld [vmem:[%s4080_s8] sm:$0x1] }
 0x409   : > { %v2308_v50 = vmul.f32 %v2266_v22, %v3848_v53  ;;  %v2374_v34 = vsel %vm2348_vm0, %v2307_v41, 0.0  ;;  %v2272_v53 = vld [vmem:[%s4078_s6 + $0x110] sm:$0xff] }
 0x40a   : > { %v3856_v2 = vpop.f32.mrf.mxu0 }
 0x40b   : > { %v2309_v62 = vmul.f32 %v2267_v45, %v3856_v2  ;;  %v2273_v2 = vld [vmem:[%s4078_s6 + $0x118] sm:$0xff]  ;;  %v2335_v16 = vadd.f32 %v2334_v7, %v2308_v50 }
 0x40c   : > { %v3876_v14 = vpop.f32.mrf.mxu0 }
 0x40d   : > { %v2310_v36 = vmul.f32 %v2268_v1, %v3876_v14  ;;  %v2376_v28 = vsel %vm2348_vm0, %v2309_v62, 0.0  ;;  %v2375_v14 = vadd.f32 %v2374_v34, %v2373_v52 }
 0x40e   : > { %v3893_v12 = vpop.f32.mrf.mxu0 }
 0x40f   : > { %v2311_v51 = vmul.f32 %v2269_v33, %v3893_v12  ;;  %v2274_v12 = vld [vmem:[%s4078_s6 + $0x120] sm:$0xff]  ;;  %v2336_v43 = vadd.f32 %v2335_v16, %v2310_v36  ;;  %v2377_v30 = vadd.f32 %v2376_v28, %v2375_v14 }
 0x410   : > { %v3909_v40 = vpop.f32.mrf.mxu0 }
 0x411   : > { %v2312_v54 = vmul.f32 %v2270_v39, %v3909_v40  ;;  %v2378_v8 = vsel %vm2348_vm0, %v2311_v51, 0.0  ;;  %v2276_v40 = vld [vmem:[%s4078_s6 + $0x130] sm:$0xff] }
 0x412   : > { %v3927_v44 = vpop.f32.mrf.mxu0  ;;  %v2379_v17 = vadd.f32 %v2378_v8, %v2377_v30 }
 0x413   : > { %v2313_v5 = vmul.f32 %v2271_v55, %v3927_v44  ;;  %v2337_v56 = vadd.f32 %v2336_v43, %v2312_v54 }
 0x414   : > { %v2215_v13 = vpop.f32.mrf.mxu0 }
 0x415   : > { %v2314_v9 = vmul.f32 %v2272_v53, %v2215_v13  ;;  %v2380_v57 = vsel %vm2348_vm0, %v2313_v5, 0.0 }
 0x416   : > { %v2217_v27 = vpop.f32.mrf.mxu0  ;;  %v2381_v21 = vadd.f32 %v2380_v57, %v2379_v17 }
 0x417   : > { %v2315_v20 = vmul.f32 %v2273_v2, %v2217_v27  ;;  %v2338_v18 = vadd.f32 %v2337_v56, %v2314_v9 }
 0x419   : > { %v2382_v13 = vsel %vm2348_vm0, %v2315_v20, 0.0 }
 0x41a   : > { %v2383_v48 = vadd.f32 %v2382_v13, %v2381_v21 }
 0x42a   : > { %v2221_v25 = vpop.f32.mrf.mxu0 }
 0x42b   : > { %v2316_v15 = vmul.f32 %v2274_v12, %v2221_v25 }
 0x42c   : > { %v2223_v46 = vpop.f32.mrf.mxu0 }
 0x42d   : > { %v2317_v19 = vmul.f32 %v2275_v4, %v2223_v46  ;;  %v2339_v59 = vadd.f32 %v2338_v18, %v2316_v15 }
 0x42e   : > { %v2227_v11 = vpop.f32.mrf.mxu0 }
 0x42f   : > { %v2318_v58 = vmul.f32 %v2276_v40, %v2227_v11  ;;  %v2384_v24 = vsel %vm2348_vm0, %v2317_v19, 0.0 }
 0x430   : > { %v2229_v44 = vpop.f32.mrf.mxu0  ;;  %v2385_v23 = vadd.f32 %v2384_v24, %v2383_v48 }
 0x431   : > { %v2319_v60 = vmul.f32 %v2277_v10, %v2229_v44  ;;  %v2340_v38 = vadd.f32 %v2339_v59, %v2318_v58 }
 0x433   : > { %v2386_v27 = vsel %vm2348_vm0, %v2319_v60, 0.0 }
 0x434   : > { %v2387_v22 = vadd.f32 %v2386_v27, %v2385_v23 }
 0x43a   : > { %v2233_v26 = vpop.f32.mrf.mxu0 }
 0x43b   : > { %v2320_v29 = vmul.f32 %v2278_v47, %v2233_v26 }
 0x43c   : > { %v2235_v31 = vpop.f32.mrf.mxu0 }
 0x43d   : > { %v2341_v32 = vadd.f32 %v2340_v38, %v2320_v29  ;;  %v2321_v0 = vmul.f32 %v2279_v61, %v2235_v31 }
 0x43f   : > { %v2342_v45 = vrot.slane %v2341_v32, 4  ;;  %v2388_v25 = vsel %vm2348_vm0, %v2321_v0, 0.0 }
 0x440   : > { %v2389_v35 = vadd.f32 %v2388_v25, %v2387_v22 }
 0x441   : > { %v2343_v37 = vadd.f32 %v2342_v45, %v2341_v32 }
 0x442   : > { %v2390_v42 = vrot.slane %v2389_v35, 4 }
 0x443   : > { %v2344_v41 = vrot.slane %v2343_v37, 2 }
 0x444   : > { %v2391_v63 = vadd.f32 %v2390_v42, %v2389_v35 }
 0x445   : > { %v2345_v1 = vadd.f32 %v2344_v41, %v2343_v37 }
 0x446   : > { %v2392_v33 = vrot.slane %v2391_v63, 2 }
 0x447   : > { %v2346_v6 = vrot.slane %v2345_v1, 1 }
 0x448   : > { %v2393_v46 = vadd.f32 %v2392_v33, %v2391_v63 }
 0x449   : > { %v2347_v62 = vadd.f32 %v2346_v6, %v2345_v1 }
 0x44a   : > { %v2394_v49 = vrot.slane %v2393_v46, 1 }
 0x44c   : > { %v2395_v50 = vadd.f32 %v2394_v49, %v2393_v46 }
 0x44e   : > { %2631 = vmatprep.mubr.msk.f32.mxu1 %vm2348_vm0, %v2395_v50 }
 0x44f   : > { %2485 = vmatmul.mubr.f32.vlgmr.msra.gmra.mxu1 %v2347_v62 }
 0x50f   : > { %v2486_v39 = vpop.f32.mrf.mxu1 }
 0x510   : > { %v2487_v55 = vadd.f32 %v2486_v39, %v2416_v3 }
 0x511   : > { %v2488_v7 = vpop.f32.mrf.mxu1 }
 0x512   : > { %2491 = vst.msk [vmem:[%s324_s17] sm:$0x1] %vm2490_vm1, %v2487_v55 }
 0x513   : > { %2858 = shalt.err (!%p2855_p3)
}
 0x514   : > { %s2859_s28 = scalar_lea.hbm %s4037_s22, 16  ;;  %s2863_s17 = scalar_lea.hbm %s4081_s9, 32 }
 0x515   : > { %p2860_p4 = scmp.ne.s32.totalorder %s4037_s22, %s2859_s28  ;;  %p2864_p9 = scmp.lt.s32.totalorder %s4037_s22, %s4081_s9 }
 0x516   : > { %p2865_p10 = scmp.lt.s32.totalorder %s2863_s17, %s2859_s28 }
 0x517   : > { %p2861_p7 = pnand %p2860_p4, %p3007_p5 }
 0x518   : > { %p2866_p11 = por %p2865_p10, %p2864_p9 }
 0x519   : > { %p2862_p8 = pneg %p2861_p7 }
 0x51b   : > { %p2867_p12 = pnand %p2866_p11, %p2862_p8 }
 0x51d   : > { %2870 = shalt.err (!%p2867_p12)
}
 0x51e   : > { %2776 = dma.vmem_to_hbm [thread:$0]  (%p3007_p5), %s2506_s23, 16, %s4037_s22, %s2493_s24  }
 0x51f PF: > { %p2782_p13 = scmp.ge.s32.totalorder %s2905_s12, 2  ;;  %s2517_s25 = sand.u32 1, %s2893_s30  }
 0x520   : > { %s2518_s13 = scalar_lea.sflag [#allocation5], %s2517_s25 }
 0x521   : > { %p2779_p0 = pnand %p2782_p13, %p3011_p6 }
 0x523   : > { %p2780_p1 = pneg %p2779_p0 }
 0x525   : > { %2888 = dma.done.wait (%p2780_p1), %s2518_s13, 16  }
 0x526   : > { %2890 = vsyncadd (%p2780_p1), %s2518_s13, 4294967280  ;;  %p19_p2 = scmp.ge.s32.totalorder %s2994_s15, 4   ;;  %s4091_s30 = smov %s2897_s10 }
 0x527   : > { %s4092_s10 = smov %s2901_s11  ;;  %s4093_s11 = smov %s3005_s18 }
 0x528   : > { %s4094_s12 = smov %s2994_s15  ;;  %21 = sbr.rel (!%p19_p2) target bundleno = 3 (0x3), region = 91 }
 0x52d   :  { %2522 = vsyncpa [#allocation5], 1 }
 0x52e   :  { %2524 = vsyncpa [#allocation5 + $0x1], 1 }

</bundles_post_ra>
